<compile_context>
chip_gen: v6e
topology: v6e:2x2x1
jax: 0.10.0
libtpu: 0.0.40
codegen_flags: <defaults>
</compile_context>

<pallas_src>
import functools

import jax
import jax.numpy as jnp
from jax import lax
from jax.experimental import pallas as pl
from jax.experimental.pallas import tpu as pltpu

# ----------------------- hyper-parameters (args.*) --------------------------
N_LAYERS = 2        # args.n_layers (== n_mlp)
CHANNELS = 4        # args.channels
KERNEL   = 3        # args.kernel
STRIDE   = 2        # fixed in the module
DILATION = 1        # args.dilation (not 3 -> constant dilation)
HIDDEN   = 32       # args.n_hidden
OUT_SIZE = 10       # args.output_size
IN_SIZE  = (16, 16) # args.input_size (len<3 -> in_channel=1)
BATCH    = 2
BN_EPS   = 1e-5


# --------------------------- Pallas kernels ----------------------------------
def _gated_from_packed(yp, n):
    """Gated unit from the packed pre-activation.

    yp : (M, 2n) f32 = x @ [Wh|Wg] + [bh|bg]   (BN scale already folded into Wh/bh)
    Returns (M, n) f32 = relu(yp[:, :n]) * sigmoid(yp[:, n:2n]), extracted with
    two tiny 0/1 selection matmuls (no lane slicing / rolling needed).
    """
    two_n = yp.shape[-1]
    rows = lax.broadcasted_iota(jnp.int32, (two_n, n), 0)
    cols = lax.broadcasted_iota(jnp.int32, (two_n, n), 1)
    sel_h = (rows == cols).astype(jnp.float32)        # picks columns [0, n)
    sel_g = (rows == cols + n).astype(jnp.float32)    # picks columns [n, 2n)
    h = jnp.dot(yp, sel_h, preferred_element_type=jnp.float32)
    g = jnp.dot(yp, sel_g, preferred_element_type=jnp.float32)
    return jnp.maximum(h, 0.0) * jax.nn.sigmoid(g)


def _packed_preact(x, wp_ref, bp_ref):
    """x:(M,K) -> (M, 2n) f32, single packed bf16 matmul with f32 accumulation."""
    return jnp.dot(x.astype(jnp.bfloat16), wp_ref[...],
                   preferred_element_type=jnp.float32) + bp_ref[...]


def gated_conv_kernel(x_ref, wp_ref, bp_ref, o_ref, *, n, relu):
    """One GatedConv2d (as im2col matmul) + folded eval-BN [+ ReLU]."""
    y = _gated_from_packed(_packed_preact(x_ref[...], wp_ref, bp_ref), n)
    if relu:                       # post-BN ReLU (BN shift == 0 folded away)
        y = jnp.maximum(y, 0.0)
    o_ref[...] = y                 # exactly (M, n) -- no wrapper-side slice


def gated_mlp_kernel(x_ref, w0_ref, b0_ref, w1_ref, b1_ref, o_ref,
                     *, n0, n1, relu0):
    """Two fused GatedDense layers; the intermediate never leaves the core."""
    y0 = _gated_from_packed(_packed_preact(x_ref[...], w0_ref, b0_ref), n0)
    if relu0:                      # post-BN1d ReLU (shift == 0 folded away)
        y0 = jnp.maximum(y0, 0.0)
    y1 = _gated_from_packed(_packed_preact(y0, w1_ref, b1_ref), n1)
    o_ref[...] = y1                # (B, n1)


# ------------------------------ wrappers --------------------------------------
_CP = pltpu.CompilerParams(dimension_semantics=("arbitrary",))


def gated_conv_layer(x2d, wp, bp, n, relu):
    """x2d:(M,K) f32, wp:(K,2n) bf16, bp:(1,2n) f32 -> (M,n) f32."""
    M, K = x2d.shape
    two_n = wp.shape[1]
    return pl.pallas_call(
        functools.partial(gated_conv_kernel, n=n, relu=relu),
        out_shape=jax.ShapeDtypeStruct((M, n), jnp.float32),
        grid=(1,),
        in_specs=[
            pl.BlockSpec((M, K), lambda i: (0, 0)),       # full-extent blocks:
            pl.BlockSpec((K, two_n), lambda i: (0, 0)),   # exempt from (8,128)
            pl.BlockSpec((1, two_n), lambda i: (0, 0)),
        ],
        out_specs=pl.BlockSpec((M, n), lambda i: (0, 0)),
        compiler_params=_CP,
    )(x2d, wp, bp)


def gated_mlp_fused(x2d, w0, b0, w1, b1, n0, n1, relu0):
    """Both GatedDense layers in one pallas_call. Returns (B, n1) f32."""
    B, K = x2d.shape
    return pl.pallas_call(
        functools.partial(gated_mlp_kernel, n0=n0, n1=n1, relu0=relu0),
        out_shape=jax.ShapeDtypeStruct((B, n1), jnp.float32),
        grid=(1,),
        in_specs=[
            pl.BlockSpec((B, K), lambda i: (0, 0)),
            pl.BlockSpec(w0.shape, lambda i: (0, 0)),
            pl.BlockSpec(b0.shape, lambda i: (0, 0)),
            pl.BlockSpec(w1.shape, lambda i: (0, 0)),
            pl.BlockSpec(b1.shape, lambda i: (0, 0)),
        ],
        out_specs=pl.BlockSpec((B, n1), lambda i: (0, 0)),
        compiler_params=_CP,
    )(x2d, w0, b0, w1, b1)


# ------------------------------ parameters ------------------------------------
def _bn_scale_shift(gamma, beta, mean, var, eps=BN_EPS):
    scale = gamma / jnp.sqrt(var + eps)
    shift = beta - mean * scale
    return scale, shift


def init_params(key):
    """Deterministic init (mirrors init_parameters: uniform(-0.01, 0.01));
    eval-mode BatchNorm with default affine/stats, folded into the h-branch."""
    params = {"conv": []}
    size = [IN_SIZE[0], IN_SIZE[1]]
    in_channel = 1

    # ---- conv stack --------------------------------------------------------
    for l in range(N_LAYERS):
        dil = DILATION
        pad = 3 * (dil + 1)
        in_s = in_channel if l == 0 else CHANNELS
        out_s = 1 if l == N_LAYERS - 1 else CHANNELS
        key, k1, k2, k3, k4 = jax.random.split(key, 5)
        wh = jax.random.uniform(k1, (out_s, in_s, KERNEL, KERNEL), jnp.float32, -0.01, 0.01)
        bh = jax.random.uniform(k2, (out_s,), jnp.float32, -0.01, 0.01)
        wg = jax.random.uniform(k3, (out_s, in_s, KERNEL, KERNEL), jnp.float32, -0.01, 0.01)
        bg = jax.random.uniform(k4, (out_s,), jnp.float32, -0.01, 0.01)
        relu = l < N_LAYERS - 1
        if relu:  # BatchNorm2d(eval, default stats) + ReLU + Dropout2d(eval)
            scale, shift = _bn_scale_shift(jnp.ones((out_s,)), jnp.zeros((out_s,)),
                                           jnp.zeros((out_s,)), jnp.ones((out_s,)))
        else:
            scale, shift = jnp.ones((out_s,)), jnp.zeros((out_s,))
        # Folding BN scale into Wh/bh requires scale > 0 and shift == 0.
        assert float(jnp.min(scale)) > 0.0 and float(jnp.max(jnp.abs(shift))) == 0.0
        # im2col patch columns are channel-major (c, ki, kj) -> matches PyTorch
        # weight.reshape(out_c, in_c*k*k).T exactly.
        wh2 = wh.reshape(out_s, -1).T * scale[None, :]          # (K, out_s)
        wg2 = wg.reshape(out_s, -1).T
        wp = jnp.concatenate([wh2, wg2], axis=1).astype(jnp.bfloat16)   # (K, 2*out_s)
        bp = jnp.concatenate([bh * scale, bg]).reshape(1, -1).astype(jnp.float32)
        params["conv"].append(dict(wp=wp, bp=bp, n=out_s, relu=relu, pad=pad, dil=dil))
        k_eff = dil * (KERNEL - 1) + 1
        size[0] = (size[0] + 2 * pad - k_eff) // STRIDE + 1
        size[1] = (size[1] + 2 * pad - k_eff) // STRIDE + 1

    # ---- MLP stack (two GatedDense layers, fused into one kernel) ----------
    mlp = []
    for l in range(N_LAYERS):
        in_s = size[0] * size[1] if l == 0 else HIDDEN
        out_s = OUT_SIZE if l == N_LAYERS - 1 else HIDDEN
        key, k1, k2, k3, k4 = jax.random.split(key, 5)
        wh = jax.random.uniform(k1, (out_s, in_s), jnp.float32, -0.01, 0.01)
        bh = jax.random.uniform(k2, (out_s,), jnp.float32, -0.01, 0.01)
        wg = jax.random.uniform(k3, (out_s, in_s), jnp.float32, -0.01, 0.01)
        bg = jax.random.uniform(k4, (out_s,), jnp.float32, -0.01, 0.01)
        relu = l < N_LAYERS - 1
        if relu:  # BatchNorm1d(eval) + ReLU + Dropout(eval)
            scale, shift = _bn_scale_shift(jnp.ones((out_s,)), jnp.zeros((out_s,)),
                                           jnp.zeros((out_s,)), jnp.ones((out_s,)))
        else:
            scale, shift = jnp.ones((out_s,)), jnp.zeros((out_s,))
        assert float(jnp.min(scale)) > 0.0 and float(jnp.max(jnp.abs(shift))) == 0.0
        wh2 = wh.T * scale[None, :]
        wg2 = wg.T
        wp = jnp.concatenate([wh2, wg2], axis=1).astype(jnp.bfloat16)   # (in_s, 2*out_s)
        bp = jnp.concatenate([bh * scale, bg]).reshape(1, -1).astype(jnp.float32)
        mlp.append(dict(wp=wp, bp=bp, n=out_s, relu=relu))

    params["mlp"] = dict(
        w0=mlp[0]["wp"], b0=mlp[0]["bp"], n0=mlp[0]["n"], relu0=mlp[0]["relu"],
        w1=mlp[1]["wp"], b1=mlp[1]["bp"], n1=mlp[1]["n"])
    return params


# ------------------------------ forward ---------------------------------------
def gated_cnn_forward(inputs, params):
    # TODO(synk): train-mode Dropout/Dropout2d & batch-stat BN omitted (eval-mode identity / running stats).
    B = inputs.shape[0]
    # NHWC activations end-to-end (equivalent to torch NCHW here: last conv has out_c == 1).
    out = inputs[..., None] if inputs.ndim == 3 else jnp.moveaxis(inputs, 1, -1)

    for cp in params["conv"]:
        # Single-op im2col; patch columns ordered channel-major (c, ki, kj).
        patches = lax.conv_general_dilated_patches(
            out, (KERNEL, KERNEL), (STRIDE, STRIDE),
            padding=((cp["pad"], cp["pad"]), (cp["pad"], cp["pad"])),
            rhs_dilation=(cp["dil"], cp["dil"]),
            dimension_numbers=("NHWC", "HWIO", "NHWC"),
            precision=lax.Precision.HIGHEST)
        _, OH, OW, K = patches.shape
        y = gated_conv_layer(patches.reshape(B * OH * OW, K),
                             cp["wp"], cp["bp"], cp["n"], cp["relu"])
        out = y.reshape(B, OH, OW, cp["n"])

    out = out.reshape(B, -1)                      # == torch .view(B, -1) since C==1
    mp = params["mlp"]
    out = gated_mlp_fused(out, mp["w0"], mp["b0"], mp["w1"], mp["b1"],
                          mp["n0"], mp["n1"], mp["relu0"])
    return out


if __name__ == "__main__":
    key = jax.random.PRNGKey(0)
    k_param, k_x = jax.random.split(key)
    params = init_params(k_param)
    x = jax.random.normal(k_x, (BATCH, IN_SIZE[0], IN_SIZE[1]), jnp.float32)

    fwd = jax.jit(lambda inp: gated_cnn_forward(inp, params))
    out = jax.block_until_ready(fwd(x))
    assert out.shape == (BATCH, OUT_SIZE), out.shape
    assert bool(jnp.all(jnp.isfinite(out)))
    print("KERNEL_OK")
</pallas_src>

<mosaic_0001>
module attributes {stable_mosaic.version = 11 : i64} {
  func.func @gated_conv_kernel(%arg0: i32, %arg1: memref<338x9xf32, #tpu.memory_space<vmem>>, %arg2: memref<9x8xbf16, #tpu.memory_space<vmem>>, %arg3: memref<1x8xf32, #tpu.memory_space<vmem>>, %arg4: memref<338x4xf32, #tpu.memory_space<vmem>>) attributes {dimension_semantics = [#tpu.dimension_semantics<arbitrary>], iteration_bounds = array<i64: 1>, scalar_prefetch = 0 : i64, scratch_operands = 0 : i64, tpu.core_type = #tpu.core_type<tc>, window_params = [{pipeline_mode = #tpu.pipeline_mode<synchronous>, transform_indices = @transform_0, window_bounds = array<i64: 338, 9>}, {pipeline_mode = #tpu.pipeline_mode<synchronous>, transform_indices = @transform_1, window_bounds = array<i64: 9, 8>}, {pipeline_mode = #tpu.pipeline_mode<synchronous>, transform_indices = @transform_2, window_bounds = array<i64: 1, 8>}, {pipeline_mode = #tpu.pipeline_mode<synchronous>, transform_indices = @transform_3, window_bounds = array<i64: 338, 4>}]} {
    %c0 = arith.constant 0 : index
    %c0_0 = arith.constant 0 : index
    %0 = vector.load %arg1[%c0, %c0_0] : memref<338x9xf32, #tpu.memory_space<vmem>>, vector<338x9xf32>
    %1 = arith.truncf %0 : vector<338x9xf32> to vector<338x9xbf16>
    %c0_1 = arith.constant 0 : index
    %c0_2 = arith.constant 0 : index
    %2 = vector.load %arg2[%c0_1, %c0_2] : memref<9x8xbf16, #tpu.memory_space<vmem>>, vector<9x8xbf16>
    %cst = arith.constant dense<0.000000e+00> : vector<338x8xf32>
    %3 = tpu.matmul %1, %2, %cst {dimension_numbers = #tpu.dot_dimension_numbers<[1], [0], [0], [1], [0, 0, 1, 1], [], []>} : vector<338x9xbf16>, vector<9x8xbf16>, vector<338x8xf32> -> vector<338x8xf32>
    %c0_3 = arith.constant 0 : index
    %c0_4 = arith.constant 0 : index
    %4 = vector.load %arg3[%c0_3, %c0_4] : memref<1x8xf32, #tpu.memory_space<vmem>>, vector<1x8xf32>
    %5 = vector.broadcast %4 : vector<1x8xf32> to vector<338x8xf32>
    %6 = arith.addf %3, %5 : vector<338x8xf32>
    %7 = tpu.iota {dimensions = array<i32: 0>} : vector<8x4xi32>
    %8 = tpu.iota {dimensions = array<i32: 1>} : vector<8x4xi32>
    %9 = arith.cmpi eq, %7, %8 : vector<8x4xi32>
    %10 = arith.extui %9 : vector<8x4xi1> to vector<8x4xi32>
    %11 = arith.sitofp %10 : vector<8x4xi32> to vector<8x4xf32>
    %c4_i32 = arith.constant 4 : i32
    %12 = vector.broadcast %c4_i32 : i32 to vector<8x4xi32>
    %13 = arith.addi %8, %12 : vector<8x4xi32>
    %14 = arith.cmpi eq, %7, %13 : vector<8x4xi32>
    %15 = arith.extui %14 : vector<8x4xi1> to vector<8x4xi32>
    %16 = arith.sitofp %15 : vector<8x4xi32> to vector<8x4xf32>
    %cst_5 = arith.constant dense<0.000000e+00> : vector<338x4xf32>
    %17 = tpu.matmul %6, %11, %cst_5 {dimension_numbers = #tpu.dot_dimension_numbers<[1], [0], [0], [1], [0, 0, 1, 1], [], []>} : vector<338x8xf32>, vector<8x4xf32>, vector<338x4xf32> -> vector<338x4xf32>
    %cst_6 = arith.constant dense<0.000000e+00> : vector<338x4xf32>
    %18 = tpu.matmul %6, %16, %cst_6 {dimension_numbers = #tpu.dot_dimension_numbers<[1], [0], [0], [1], [0, 0, 1, 1], [], []>} : vector<338x8xf32>, vector<8x4xf32>, vector<338x4xf32> -> vector<338x4xf32>
    %cst_7 = arith.constant 0.000000e+00 : f32
    %19 = vector.broadcast %cst_7 : f32 to vector<338x4xf32>
    %20 = arith.maximumf %17, %19 : vector<338x4xf32>
    %21 = arith.negf %18 : vector<338x4xf32>
    %22 = math.exp %21 : vector<338x4xf32>
    %cst_8 = arith.constant 1.000000e+00 : f32
    %23 = vector.broadcast %cst_8 : f32 to vector<338x4xf32>
    %24 = arith.addf %23, %22 : vector<338x4xf32>
    %25 = arith.divf %23, %24 : vector<338x4xf32>
    %26 = arith.mulf %20, %25 : vector<338x4xf32>
    %cst_9 = arith.constant 0.000000e+00 : f32
    %27 = vector.broadcast %cst_9 : f32 to vector<338x4xf32>
    %28 = arith.maximumf %26, %27 : vector<338x4xf32>
    %c0_10 = arith.constant 0 : index
    %c0_11 = arith.constant 0 : index
    %29 = vector.load %arg4[%c0_10, %c0_11] : memref<338x4xf32, #tpu.memory_space<vmem>>, vector<338x4xf32>
    tpu.vector_store %arg4[%c0_10, %c0_11], %28 {strides = array<i32>} : memref<338x4xf32, #tpu.memory_space<vmem>>, vector<338x4xf32>,
    return
  }
  func.func @transform_0(%arg0: i32) -> (i32, i32) {
    %c0_i32 = arith.constant 0 : i32
    %c0_i32_0 = arith.constant 0 : i32
    %c0_i32_1 = arith.constant 0 : i32
    return %c0_i32, %c0_i32_0 : i32, i32
  }
  func.func @transform_1(%arg0: i32) -> (i32, i32) {
    %c0_i32 = arith.constant 0 : i32
    %c0_i32_0 = arith.constant 0 : i32
    %c0_i32_1 = arith.constant 0 : i32
    return %c0_i32, %c0_i32_0 : i32, i32
  }
  func.func @transform_2(%arg0: i32) -> (i32, i32) {
    %c0_i32 = arith.constant 0 : i32
    %c0_i32_0 = arith.constant 0 : i32
    %c0_i32_1 = arith.constant 0 : i32
    return %c0_i32, %c0_i32_0 : i32, i32
  }
  func.func @transform_3(%arg0: i32) -> (i32, i32) {
    %c0_i32 = arith.constant 0 : i32
    %c0_i32_0 = arith.constant 0 : i32
    %c0_i32_1 = arith.constant 0 : i32
    return %c0_i32, %c0_i32_0 : i32, i32
  }
}

module attributes {stable_mosaic.version = 11 : i64} {
  func.func @gated_conv_kernel(%arg0: i32, %arg1: memref<288x36xf32, #tpu.memory_space<vmem>>, %arg2: memref<36x2xbf16, #tpu.memory_space<vmem>>, %arg3: memref<1x2xf32, #tpu.memory_space<vmem>>, %arg4: memref<288x1xf32, #tpu.memory_space<vmem>>) attributes {dimension_semantics = [#tpu.dimension_semantics<arbitrary>], iteration_bounds = array<i64: 1>, scalar_prefetch = 0 : i64, scratch_operands = 0 : i64, tpu.core_type = #tpu.core_type<tc>, window_params = [{pipeline_mode = #tpu.pipeline_mode<synchronous>, transform_indices = @transform_0, window_bounds = array<i64: 288, 36>}, {pipeline_mode = #tpu.pipeline_mode<synchronous>, transform_indices = @transform_1, window_bounds = array<i64: 36, 2>}, {pipeline_mode = #tpu.pipeline_mode<synchronous>, transform_indices = @transform_2, window_bounds = array<i64: 1, 2>}, {pipeline_mode = #tpu.pipeline_mode<synchronous>, transform_indices = @transform_3, window_bounds = array<i64: 288, 1>}]} {
    %c0 = arith.constant 0 : index
    %c0_0 = arith.constant 0 : index
    %0 = vector.load %arg1[%c0, %c0_0] : memref<288x36xf32, #tpu.memory_space<vmem>>, vector<288x36xf32>
    %1 = arith.truncf %0 : vector<288x36xf32> to vector<288x36xbf16>
    %c0_1 = arith.constant 0 : index
    %c0_2 = arith.constant 0 : index
    %2 = vector.load %arg2[%c0_1, %c0_2] : memref<36x2xbf16, #tpu.memory_space<vmem>>, vector<36x2xbf16>
    %cst = arith.constant dense<0.000000e+00> : vector<288x2xf32>
    %3 = tpu.matmul %1, %2, %cst {dimension_numbers = #tpu.dot_dimension_numbers<[1], [0], [0], [1], [0, 0, 1, 1], [], []>} : vector<288x36xbf16>, vector<36x2xbf16>, vector<288x2xf32> -> vector<288x2xf32>
    %c0_3 = arith.constant 0 : index
    %c0_4 = arith.constant 0 : index
    %4 = vector.load %arg3[%c0_3, %c0_4] : memref<1x2xf32, #tpu.memory_space<vmem>>, vector<1x2xf32>
    %5 = vector.broadcast %4 : vector<1x2xf32> to vector<288x2xf32>
    %6 = arith.addf %3, %5 : vector<288x2xf32>
    %7 = tpu.iota {dimensions = array<i32: 0>} : vector<2x1xi32>
    %8 = tpu.iota {dimensions = array<i32: 1>} : vector<2x1xi32>
    %9 = arith.cmpi eq, %7, %8 : vector<2x1xi32>
    %10 = arith.extui %9 : vector<2x1xi1> to vector<2x1xi32>
    %11 = arith.sitofp %10 : vector<2x1xi32> to vector<2x1xf32>
    %c1_i32 = arith.constant 1 : i32
    %12 = vector.broadcast %c1_i32 : i32 to vector<2x1xi32>
    %13 = arith.addi %8, %12 : vector<2x1xi32>
    %14 = arith.cmpi eq, %7, %13 : vector<2x1xi32>
    %15 = arith.extui %14 : vector<2x1xi1> to vector<2x1xi32>
    %16 = arith.sitofp %15 : vector<2x1xi32> to vector<2x1xf32>
    %cst_5 = arith.constant dense<0.000000e+00> : vector<288x1xf32>
    %17 = tpu.matmul %6, %11, %cst_5 {dimension_numbers = #tpu.dot_dimension_numbers<[1], [0], [0], [1], [0, 0, 1, 1], [], []>} : vector<288x2xf32>, vector<2x1xf32>, vector<288x1xf32> -> vector<288x1xf32>
    %cst_6 = arith.constant dense<0.000000e+00> : vector<288x1xf32>
    %18 = tpu.matmul %6, %16, %cst_6 {dimension_numbers = #tpu.dot_dimension_numbers<[1], [0], [0], [1], [0, 0, 1, 1], [], []>} : vector<288x2xf32>, vector<2x1xf32>, vector<288x1xf32> -> vector<288x1xf32>
    %cst_7 = arith.constant 0.000000e+00 : f32
    %19 = vector.broadcast %cst_7 : f32 to vector<288x1xf32>
    %20 = arith.maximumf %17, %19 : vector<288x1xf32>
    %21 = arith.negf %18 : vector<288x1xf32>
    %22 = math.exp %21 : vector<288x1xf32>
    %cst_8 = arith.constant 1.000000e+00 : f32
    %23 = vector.broadcast %cst_8 : f32 to vector<288x1xf32>
    %24 = arith.addf %23, %22 : vector<288x1xf32>
    %25 = arith.divf %23, %24 : vector<288x1xf32>
    %26 = arith.mulf %20, %25 : vector<288x1xf32>
    %c0_9 = arith.constant 0 : index
    %c0_10 = arith.constant 0 : index
    %27 = vector.load %arg4[%c0_9, %c0_10] : memref<288x1xf32, #tpu.memory_space<vmem>>, vector<288x1xf32>
    tpu.vector_store %arg4[%c0_9, %c0_10], %26 {strides = array<i32>} : memref<288x1xf32, #tpu.memory_space<vmem>>, vector<288x1xf32>,
    return
  }
  func.func @transform_0(%arg0: i32) -> (i32, i32) {
    %c0_i32 = arith.constant 0 : i32
    %c0_i32_0 = arith.constant 0 : i32
    %c0_i32_1 = arith.constant 0 : i32
    return %c0_i32, %c0_i32_0 : i32, i32
  }
  func.func @transform_1(%arg0: i32) -> (i32, i32) {
    %c0_i32 = arith.constant 0 : i32
    %c0_i32_0 = arith.constant 0 : i32
    %c0_i32_1 = arith.constant 0 : i32
    return %c0_i32, %c0_i32_0 : i32, i32
  }
  func.func @transform_2(%arg0: i32) -> (i32, i32) {
    %c0_i32 = arith.constant 0 : i32
    %c0_i32_0 = arith.constant 0 : i32
    %c0_i32_1 = arith.constant 0 : i32
    return %c0_i32, %c0_i32_0 : i32, i32
  }
  func.func @transform_3(%arg0: i32) -> (i32, i32) {
    %c0_i32 = arith.constant 0 : i32
    %c0_i32_0 = arith.constant 0 : i32
    %c0_i32_1 = arith.constant 0 : i32
    return %c0_i32, %c0_i32_0 : i32, i32
  }
}

module attributes {stable_mosaic.version = 11 : i64} {
  func.func @gated_mlp_kernel(%arg0: i32, %arg1: memref<2x144xf32, #tpu.memory_space<vmem>>, %arg2: memref<144x64xbf16, #tpu.memory_space<vmem>>, %arg3: memref<1x64xf32, #tpu.memory_space<vmem>>, %arg4: memref<32x20xbf16, #tpu.memory_space<vmem>>, %arg5: memref<1x20xf32, #tpu.memory_space<vmem>>, %arg6: memref<2x10xf32, #tpu.memory_space<vmem>>) attributes {dimension_semantics = [#tpu.dimension_semantics<arbitrary>], iteration_bounds = array<i64: 1>, scalar_prefetch = 0 : i64, scratch_operands = 0 : i64, tpu.core_type = #tpu.core_type<tc>, window_params = [{pipeline_mode = #tpu.pipeline_mode<synchronous>, transform_indices = @transform_0, window_bounds = array<i64: 2, 144>}, {pipeline_mode = #tpu.pipeline_mode<synchronous>, transform_indices = @transform_1, window_bounds = array<i64: 144, 64>}, {pipeline_mode = #tpu.pipeline_mode<synchronous>, transform_indices = @transform_2, window_bounds = array<i64: 1, 64>}, {pipeline_mode = #tpu.pipeline_mode<synchronous>, transform_indices = @transform_3, window_bounds = array<i64: 32, 20>}, {pipeline_mode = #tpu.pipeline_mode<synchronous>, transform_indices = @transform_4, window_bounds = array<i64: 1, 20>}, {pipeline_mode = #tpu.pipeline_mode<synchronous>, transform_indices = @transform_5, window_bounds = array<i64: 2, 10>}]} {
    %c0 = arith.constant 0 : index
    %c0_0 = arith.constant 0 : index
    %0 = vector.load %arg1[%c0, %c0_0] : memref<2x144xf32, #tpu.memory_space<vmem>>, vector<2x144xf32>
    %1 = arith.truncf %0 : vector<2x144xf32> to vector<2x144xbf16>
    %c0_1 = arith.constant 0 : index
    %c0_2 = arith.constant 0 : index
    %2 = vector.load %arg2[%c0_1, %c0_2] : memref<144x64xbf16, #tpu.memory_space<vmem>>, vector<144x64xbf16>
    %cst = arith.constant dense<0.000000e+00> : vector<2x64xf32>
    %3 = tpu.matmul %1, %2, %cst {dimension_numbers = #tpu.dot_dimension_numbers<[1], [0], [0], [1], [0, 0, 1, 1], [], []>} : vector<2x144xbf16>, vector<144x64xbf16>, vector<2x64xf32> -> vector<2x64xf32>
    %c0_3 = arith.constant 0 : index
    %c0_4 = arith.constant 0 : index
    %4 = vector.load %arg3[%c0_3, %c0_4] : memref<1x64xf32, #tpu.memory_space<vmem>>, vector<1x64xf32>
    %5 = vector.broadcast %4 : vector<1x64xf32> to vector<2x64xf32>
    %6 = arith.addf %3, %5 : vector<2x64xf32>
    %7 = tpu.iota {dimensions = array<i32: 0>} : vector<64x32xi32>
    %8 = tpu.iota {dimensions = array<i32: 1>} : vector<64x32xi32>
    %9 = arith.cmpi eq, %7, %8 : vector<64x32xi32>
    %10 = arith.extui %9 : vector<64x32xi1> to vector<64x32xi32>
    %11 = arith.sitofp %10 : vector<64x32xi32> to vector<64x32xf32>
    %c32_i32 = arith.constant 32 : i32
    %12 = vector.broadcast %c32_i32 : i32 to vector<64x32xi32>
    %13 = arith.addi %8, %12 : vector<64x32xi32>
    %14 = arith.cmpi eq, %7, %13 : vector<64x32xi32>
    %15 = arith.extui %14 : vector<64x32xi1> to vector<64x32xi32>
    %16 = arith.sitofp %15 : vector<64x32xi32> to vector<64x32xf32>
    %cst_5 = arith.constant dense<0.000000e+00> : vector<2x32xf32>
    %17 = tpu.matmul %6, %11, %cst_5 {dimension_numbers = #tpu.dot_dimension_numbers<[1], [0], [0], [1], [0, 0, 1, 1], [], []>} : vector<2x64xf32>, vector<64x32xf32>, vector<2x32xf32> -> vector<2x32xf32>
    %cst_6 = arith.constant dense<0.000000e+00> : vector<2x32xf32>
    %18 = tpu.matmul %6, %16, %cst_6 {dimension_numbers = #tpu.dot_dimension_numbers<[1], [0], [0], [1], [0, 0, 1, 1], [], []>} : vector<2x64xf32>, vector<64x32xf32>, vector<2x32xf32> -> vector<2x32xf32>
    %cst_7 = arith.constant 0.000000e+00 : f32
    %19 = vector.broadcast %cst_7 : f32 to vector<2x32xf32>
    %20 = arith.maximumf %17, %19 : vector<2x32xf32>
    %21 = arith.negf %18 : vector<2x32xf32>
    %22 = math.exp %21 : vector<2x32xf32>
    %cst_8 = arith.constant 1.000000e+00 : f32
    %23 = vector.broadcast %cst_8 : f32 to vector<2x32xf32>
    %24 = arith.addf %23, %22 : vector<2x32xf32>
    %25 = arith.divf %23, %24 : vector<2x32xf32>
    %26 = arith.mulf %20, %25 : vector<2x32xf32>
    %cst_9 = arith.constant 0.000000e+00 : f32
    %27 = vector.broadcast %cst_9 : f32 to vector<2x32xf32>
    %28 = arith.maximumf %26, %27 : vector<2x32xf32>
    %29 = arith.truncf %28 : vector<2x32xf32> to vector<2x32xbf16>
    %c0_10 = arith.constant 0 : index
    %c0_11 = arith.constant 0 : index
    %30 = vector.load %arg4[%c0_10, %c0_11] : memref<32x20xbf16, #tpu.memory_space<vmem>>, vector<32x20xbf16>
    %cst_12 = arith.constant dense<0.000000e+00> : vector<2x20xf32>
    %31 = tpu.matmul %29, %30, %cst_12 {dimension_numbers = #tpu.dot_dimension_numbers<[1], [0], [0], [1], [0, 0, 1, 1], [], []>} : vector<2x32xbf16>, vector<32x20xbf16>, vector<2x20xf32> -> vector<2x20xf32>
    %c0_13 = arith.constant 0 : index
    %c0_14 = arith.constant 0 : index
    %32 = vector.load %arg5[%c0_13, %c0_14] : memref<1x20xf32, #tpu.memory_space<vmem>>, vector<1x20xf32>
    %33 = vector.broadcast %32 : vector<1x20xf32> to vector<2x20xf32>
    %34 = arith.addf %31, %33 : vector<2x20xf32>
    %35 = tpu.iota {dimensions = array<i32: 0>} : vector<20x10xi32>
    %36 = tpu.iota {dimensions = array<i32: 1>} : vector<20x10xi32>
    %37 = arith.cmpi eq, %35, %36 : vector<20x10xi32>
    %38 = arith.extui %37 : vector<20x10xi1> to vector<20x10xi32>
    %39 = arith.sitofp %38 : vector<20x10xi32> to vector<20x10xf32>
    %c10_i32 = arith.constant 10 : i32
    %40 = vector.broadcast %c10_i32 : i32 to vector<20x10xi32>
    %41 = arith.addi %36, %40 : vector<20x10xi32>
    %42 = arith.cmpi eq, %35, %41 : vector<20x10xi32>
    %43 = arith.extui %42 : vector<20x10xi1> to vector<20x10xi32>
    %44 = arith.sitofp %43 : vector<20x10xi32> to vector<20x10xf32>
    %cst_15 = arith.constant dense<0.000000e+00> : vector<2x10xf32>
    %45 = tpu.matmul %34, %39, %cst_15 {dimension_numbers = #tpu.dot_dimension_numbers<[1], [0], [0], [1], [0, 0, 1, 1], [], []>} : vector<2x20xf32>, vector<20x10xf32>, vector<2x10xf32> -> vector<2x10xf32>
    %cst_16 = arith.constant dense<0.000000e+00> : vector<2x10xf32>
    %46 = tpu.matmul %34, %44, %cst_16 {dimension_numbers = #tpu.dot_dimension_numbers<[1], [0], [0], [1], [0, 0, 1, 1], [], []>} : vector<2x20xf32>, vector<20x10xf32>, vector<2x10xf32> -> vector<2x10xf32>
    %cst_17 = arith.constant 0.000000e+00 : f32
    %47 = vector.broadcast %cst_17 : f32 to vector<2x10xf32>
    %48 = arith.maximumf %45, %47 : vector<2x10xf32>
    %49 = arith.negf %46 : vector<2x10xf32>
    %50 = math.exp %49 : vector<2x10xf32>
    %cst_18 = arith.constant 1.000000e+00 : f32
    %51 = vector.broadcast %cst_18 : f32 to vector<2x10xf32>
    %52 = arith.addf %51, %50 : vector<2x10xf32>
    %53 = arith.divf %51, %52 : vector<2x10xf32>
    %54 = arith.mulf %48, %53 : vector<2x10xf32>
    %c0_19 = arith.constant 0 : index
    %c0_20 = arith.constant 0 : index
    %55 = vector.load %arg6[%c0_19, %c0_20] : memref<2x10xf32, #tpu.memory_space<vmem>>, vector<2x10xf32>
    tpu.vector_store %arg6[%c0_19, %c0_20], %54 {strides = array<i32>} : memref<2x10xf32, #tpu.memory_space<vmem>>, vector<2x10xf32>,
    return
  }
  func.func @transform_0(%arg0: i32) -> (i32, i32) {
    %c0_i32 = arith.constant 0 : i32
    %c0_i32_0 = arith.constant 0 : i32
    %c0_i32_1 = arith.constant 0 : i32
    return %c0_i32, %c0_i32_0 : i32, i32
  }
  func.func @transform_1(%arg0: i32) -> (i32, i32) {
    %c0_i32 = arith.constant 0 : i32
    %c0_i32_0 = arith.constant 0 : i32
    %c0_i32_1 = arith.constant 0 : i32
    return %c0_i32, %c0_i32_0 : i32, i32
  }
  func.func @transform_2(%arg0: i32) -> (i32, i32) {
    %c0_i32 = arith.constant 0 : i32
    %c0_i32_0 = arith.constant 0 : i32
    %c0_i32_1 = arith.constant 0 : i32
    return %c0_i32, %c0_i32_0 : i32, i32
  }
  func.func @transform_3(%arg0: i32) -> (i32, i32) {
    %c0_i32 = arith.constant 0 : i32
    %c0_i32_0 = arith.constant 0 : i32
    %c0_i32_1 = arith.constant 0 : i32
    return %c0_i32, %c0_i32_0 : i32, i32
  }
  func.func @transform_4(%arg0: i32) -> (i32, i32) {
    %c0_i32 = arith.constant 0 : i32
    %c0_i32_0 = arith.constant 0 : i32
    %c0_i32_1 = arith.constant 0 : i32
    return %c0_i32, %c0_i32_0 : i32, i32
  }
  func.func @transform_5(%arg0: i32) -> (i32, i32) {
    %c0_i32 = arith.constant 0 : i32
    %c0_i32_0 = arith.constant 0 : i32
    %c0_i32_1 = arith.constant 0 : i32
    return %c0_i32, %c0_i32_0 : i32, i32
  }
}

</mosaic_0001>

<bundles_post_ra>
// kernel: _lambda_.3
= control target key start
LH: loop header
LB: loop body
LE: loop exit
PB: predicated region body
PF: predicated region fallthrough
CT: control target
= control target key end

     0   :  { %vm161_vm0 = vcmask 1043456   ;;  %vm162_vm1 = vcmask 1044480   ;;  %v2268_v1 = vmov 65535   ;;  %vm94_vm2 = vcmask 72704   ;;  %s3129_s1 = inlined_call_operand.vmem [shape: bf16[9,8], index: 1, kind: input, shape index: {}]   ;;  %s3130_s0 = inlined_call_operand.vmem [shape: f32[338,9], index: 0, kind: input, shape index: {}]   ;;  %s3131_s2 = inlined_call_operand.vmem [shape: f32[1,8], index: 2, kind: input, shape index: {}]   ;;  %s3132_s3 = inlined_call_operand.vmem [shape: f32[338,4], index: 3, kind: output, shape index: {}]  }
   0x1   :  { %v2095_v0 = vld [vmem:[%s3129_s1] sm:$0x1f]   ;;  %v163_v2 = vsel %vm161_vm0, 4294967295, %v2268_v1  ;;  %v16_v4 = vld [vmem:[%s3130_s0 + $0x8] sm:$0xff]  ;;  %v17_v7 = vld [vmem:[%s3130_s0 + $0x10] sm:$0xff]  ;;  %v376_v62 = vlaneseq  ;;  %vm2271_vm5 = vmmov 0  }
   0x2   :  { %v15_v3 = vld [vmem:[%s3130_s0] sm:$0xff]  ;;  %v164_v5 = vsel %vm162_vm1, %v163_v2, 0  ;;  %v18_v8 = vld [vmem:[%s3130_s0 + $0x18] sm:$0xff]  ;;  %v20_v11 = vld [vmem:[%s3130_s0 + $0x28] sm:$0xff]  ;;  %vm387_vm6 = vcmask 64512   ;;  %vm1464_vm7 = vcmask 31744  }
   0x3   :  { %v58_v6 = vpack.c.bf16 %v16_v4, %v15_v3  ;;  %v166_v9 = vand.u32 %v2095_v0, %v164_v5  ;;  %v19_v10 = vld [vmem:[%s3130_s0 + $0x20] sm:$0xff]  ;;  %v59_v12 = vpack.c.bf16 %v18_v8, %v17_v7  ;;  %v21_v14 = vld [vmem:[%s3130_s0 + $0x30] sm:$0xff]  ;;  %v22_v15 = vld [vmem:[%s3130_s0 + $0x38] sm:$0xff]  ;;  %v379_v63 = vand.u32 127, %v376_v62 }
   0x4   :  { %v60_v13 = vpack.c.bf16 %v20_v11, %v19_v10  ;;  %v23_v16 = vld [vmem:[%s3130_s0 + $0x40] sm:$0xff]  ;;  %v24_v17 = vld [vmem:[%s3130_s0 + $0x48] sm:$0xff]  ;;  %v61_v18 = vpack.c.bf16 %v22_v15, %v21_v14  ;;  %v25_v20 = vld [vmem:[%s3130_s0 + $0x50] sm:$0xff]  ;;  %v377_v2 = vshrl.u32 %v376_v62, 7  ;;  %v2270_v8 = vmov 1.0  }
   0x5   :  { %1783 = vmatprep.mubr.msk.bf16.mxu0 %vm94_vm2, %v58_v6  ;;  %1781 = vmatprep.subr.bf16.mxu0 %v166_v9  ;;  %v62_v19 = vpack.c.bf16 %v24_v17, %v23_v16  ;;  %v26_v21 = vld [vmem:[%s3130_s0 + $0x58] sm:$0xff]  ;;  %v27_v22 = vld [vmem:[%s3130_s0 + $0x60] sm:$0xff]  ;;  %v28_v23 = vld [vmem:[%s3130_s0 + $0x68] sm:$0xff]  ;;  %v383_v3 = vadd.s32 4, %v379_v63  ;;  %v2269_v6 = vmov 0.0   ;;  %vm1507_vm8 = vcmask 25600  }
   0x6   :  { %1782 = vmatpush3.bf16.msra.mxu0 %v166_v9  ;;  %v63_v24 = vpack.c.bf16 %v26_v21, %v25_v20  ;;  %v64_v25 = vpack.c.bf16 %v28_v23, %v27_v22  ;;  %v29_v26 = vld [vmem:[%s3130_s0 + $0x70] sm:$0xff]  ;;  %v30_v27 = vld [vmem:[%s3130_s0 + $0x78] sm:$0xff]  ;;  %v31_v28 = vld [vmem:[%s3130_s0 + $0x80] sm:$0xff]  ;;  %1827 = vmatprep.subr.mxu1 %v2269_v6  ;;  %vm380_vm3 = vcmp.eq.s32.totalorder %v377_v2, %v379_v63 }
   0x7   :  { %v32_v29 = vld [vmem:[%s3130_s0 + $0x88] sm:$0xff]  ;;  %v65_v30 = vpack.c.bf16 %v30_v27, %v29_v26  ;;  %v33_v32 = vld [vmem:[%s3130_s0 + $0x90] sm:$0xff]  ;;  %v34_v33 = vld [vmem:[%s3130_s0 + $0x98] sm:$0xff]  ;;  %1958 = vmatprep.subr.mxu0 %v2269_v6  ;;  %vm384_vm4 = vcmp.eq.s32.totalorder %v377_v2, %v383_v3  ;;  %1828 = vmatpush3.msk.msra.mxu1 %vm380_vm3, %v2270_v8 }
   0x8   :  { %v66_v31 = vpack.c.bf16 %v32_v29, %v31_v28  ;;  %v35_v34 = vld [vmem:[%s3130_s0 + $0xa0] sm:$0xff]  ;;  %v36_v35 = vld [vmem:[%s3130_s0 + $0xa8] sm:$0xff]  ;;  %v67_v36 = vpack.c.bf16 %v34_v33, %v33_v32  ;;  %v37_v38 = vld [vmem:[%s3130_s0 + $0xb0] sm:$0xff]  ;;  %1829 = vmatprep.mubr.msk.f32.mxu1 %vm2271_vm5, %v2269_v6  ;;  %2089 = vmatprep.subr.mxu1 %v2269_v6 }
   0x9   :  { %1784 = vmatmul.mubr.msk.bf16.vlgmr.msra.gmra.mxu0 %vm94_vm2, %v59_v12  ;;  %v68_v37 = vpack.c.bf16 %v36_v35, %v35_v34  ;;  %v38_v39 = vld [vmem:[%s3130_s0 + $0xb8] sm:$0xff]  ;;  %v39_v40 = vld [vmem:[%s3130_s0 + $0xc0] sm:$0xff]  ;;  %v40_v41 = vld [vmem:[%s3130_s0 + $0xc8] sm:$0xff] }
   0xa   :  { %1787 = vmatprep.mubr.msk.bf16.mxu0 %vm94_vm2, %v60_v13  ;;  %v69_v42 = vpack.c.bf16 %v38_v39, %v37_v38  ;;  %v70_v43 = vpack.c.bf16 %v40_v41, %v39_v40  ;;  %v41_v44 = vld [vmem:[%s3130_s0 + $0xd0] sm:$0xff]  ;;  %v42_v45 = vld [vmem:[%s3130_s0 + $0xd8] sm:$0xff]  ;;  %v43_v46 = vld [vmem:[%s3130_s0 + $0xe0] sm:$0xff]  ;;  %1959 = vmatpush3.msk.msra.mxu0 %vm384_vm4, %v2270_v8 }
   0xb   :  { %v44_v47 = vld [vmem:[%s3130_s0 + $0xe8] sm:$0xff]  ;;  %v71_v48 = vpack.c.bf16 %v42_v45, %v41_v44  ;;  %v45_v50 = vld [vmem:[%s3130_s0 + $0xf0] sm:$0xff]  ;;  %v46_v51 = vld [vmem:[%s3130_s0 + $0xf8] sm:$0xff] }
   0xc   :  { %v72_v49 = vpack.c.bf16 %v44_v47, %v43_v46  ;;  %v47_v52 = vld [vmem:[%s3130_s0 + $0x100] sm:$0xff]  ;;  %v48_v53 = vld [vmem:[%s3130_s0 + $0x108] sm:$0xff]  ;;  %v73_v54 = vpack.c.bf16 %v46_v51, %v45_v50  ;;  %v49_v56 = vld [vmem:[%s3130_s0 + $0x110] sm:$0xff] }
   0xd   :  { %v74_v55 = vpack.c.bf16 %v48_v53, %v47_v52  ;;  %v50_v57 = vld [vmem:[%s3130_s0 + $0x118] sm:$0xff]  ;;  %v51_v58 = vld [vmem:[%s3130_s0 + $0x120] sm:$0xff]  ;;  %v52_v59 = vld [vmem:[%s3130_s0 + $0x128] sm:$0xff] }
   0xe   :  { %v75_v60 = vpack.c.bf16 %v50_v57, %v49_v56  ;;  %v76_v61 = vpack.c.bf16 %v52_v59, %v51_v58  ;;  %v53_v0 = vld [vmem:[%s3130_s0 + $0x130] sm:$0xff]  ;;  %v54_v1 = vld [vmem:[%s3130_s0 + $0x138] sm:$0xff]  ;;  %v55_v4 = vld [vmem:[%s3130_s0 + $0x140] sm:$0xff] }
   0xf   :  { %v56_v5 = vld [vmem:[%s3130_s0 + $0x148] sm:$0xff]  ;;  %v77_v7 = vpack.c.bf16 %v54_v1, %v53_v0  ;;  %v57_v10 = vld [vmem:[%s3130_s0 + $0x150] sm:$0x3]  ;;  %v2457_v13 = vld [vmem:[%s3131_s2] ss:$0 sm:$0xff] }
  0x10   :  { %v78_v9 = vpack.c.bf16 %v56_v5, %v55_v4  ;;  %v79_v11 = vpack.c.bf16 %v57_v10, %v57_v10 }
  0x11   :  { %1788 = vmatmul.mubr.msk.bf16.gmra.mxu0 %vm94_vm2, %v61_v18 }
  0x12   :  { %1791 = vmatprep.mubr.msk.bf16.mxu0 %vm94_vm2, %v62_v19 }
  0x19   :  { %1792 = vmatmul.mubr.msk.bf16.gmra.mxu0 %vm94_vm2, %v63_v24 }
  0x1a   :  { %1795 = vmatprep.mubr.msk.bf16.mxu0 %vm94_vm2, %v64_v25 }
  0x21   :  { %1796 = vmatmul.mubr.msk.bf16.gmra.mxu0 %vm94_vm2, %v65_v30 }
  0x22   :  { %1799 = vmatprep.mubr.msk.bf16.mxu0 %vm94_vm2, %v66_v31 }
  0x29   :  { %1800 = vmatmul.mubr.msk.bf16.gmra.mxu0 %vm94_vm2, %v67_v36 }
  0x2a   :  { %1803 = vmatprep.mubr.msk.bf16.mxu0 %vm94_vm2, %v68_v37 }
  0x31   :  { %1804 = vmatmul.mubr.msk.bf16.gmra.mxu0 %vm94_vm2, %v69_v42 }
  0x32   :  { %1807 = vmatprep.mubr.msk.bf16.mxu0 %vm94_vm2, %v70_v43 }
  0x39   :  { %1808 = vmatmul.mubr.msk.bf16.gmra.mxu0 %vm94_vm2, %v71_v48 }
  0x3a   :  { %1811 = vmatprep.mubr.msk.bf16.mxu0 %vm94_vm2, %v72_v49 }
  0x41   :  { %1812 = vmatmul.mubr.msk.bf16.gmra.mxu0 %vm94_vm2, %v73_v54 }
  0x42   :  { %1815 = vmatprep.mubr.msk.bf16.mxu0 %vm94_vm2, %v74_v55 }
  0x49   :  { %1816 = vmatmul.mubr.msk.bf16.gmra.mxu0 %vm94_vm2, %v75_v60 }
  0x4a   :  { %1819 = vmatprep.mubr.msk.bf16.mxu0 %vm94_vm2, %v76_v61 }
  0x51   :  { %1820 = vmatmul.mubr.msk.bf16.gmra.mxu0 %vm94_vm2, %v77_v7 }
  0x52   :  { %1823 = vmatprep.mubr.msk.bf16.mxu0 %vm94_vm2, %v78_v9 }
  0x59   :  { %1824 = vmatmul.mubr.msk.bf16.gmra.mxu0 %vm94_vm2, %v79_v11 }
  0x5a   :  { %1960 = vmatprep.mubr.msk.f32.mxu0 %vm2271_vm5, %v2269_v6 }
  0xc9   :  { %v1785_v12 = vpop.f32.mrf.mxu0 }
  0xca   :  { %v211_v21 = vadd.f32 %v1785_v12, %v2457_v13 }
  0xcb   :  { %v202_v14 = vpop.f32.mrf.mxu0 }
  0xcc   :  { %v203_v15 = vadd.f32 %v2457_v13, %v202_v14 }
  0xcd   :  { %v1786_v16 = vpop.f32.mrf.mxu0 }
  0xce   :  { %1830 = vmatmul.mubr.msk.f32.vlgmr.msra.gmra.mxu1 %vm387_vm6, %v203_v15  ;;  %1961 = vmatmul.mubr.msk.f32.vlgmr.msra.gmra.mxu0 %vm387_vm6, %v203_v15  ;;  %v214_v24 = vadd.f32 %v1786_v16, %v2457_v13 }
  0xcf   :  { %2090 = vmatpush3.msk.msra.mxu1 %vm384_vm4, %v2270_v8  ;;  %v205_v17 = vpop.f32.mrf.mxu0  ;;  %1832 = vmatprep.mubr.msk.f32.mxu1 %vm2271_vm5, %v2269_v6 }
  0xd0   :  { %v206_v18 = vadd.f32 %v2457_v13, %v205_v17  ;;  %1963 = vmatprep.mubr.msk.f32.mxu0 %vm2271_vm5, %v2269_v6 }
  0xd1   :  { %v1789_v19 = vpop.f32.mrf.mxu0 }
  0xd2   :  { %1833 = vmatmul.mubr.msk.f32.gmra.mxu1 %vm387_vm6, %v206_v18  ;;  %1964 = vmatmul.mubr.msk.f32.gmra.mxu0 %vm387_vm6, %v206_v18  ;;  %v227_v33 = vadd.f32 %v1789_v19, %v2457_v13 }
  0xd3   :  { %v218_v20 = vpop.f32.mrf.mxu0  ;;  %1835 = vmatprep.mubr.msk.f32.mxu1 %vm2271_vm5, %v2269_v6  ;;  %1966 = vmatprep.mubr.msk.f32.mxu0 %vm2271_vm5, %v2269_v6 }
  0xd4   :  { %v219_v27 = vadd.f32 %v2457_v13, %v218_v20 }
  0xd5   :  { %v1790_v22 = vpop.f32.mrf.mxu0 }
  0xd6   :  { %1836 = vmatmul.mubr.msk.f32.gmra.mxu1 %vm387_vm6, %v211_v21  ;;  %1967 = vmatmul.mubr.msk.f32.gmra.mxu0 %vm387_vm6, %v211_v21  ;;  %v230_v36 = vadd.f32 %v1790_v22, %v2457_v13 }
  0xd7   :  { %v221_v23 = vpop.f32.mrf.mxu0  ;;  %1838 = vmatprep.mubr.msk.f32.mxu1 %vm2271_vm5, %v2269_v6  ;;  %1969 = vmatprep.mubr.msk.f32.mxu0 %vm2271_vm5, %v2269_v6 }
  0xd8   :  { %v222_v30 = vadd.f32 %v2457_v13, %v221_v23 }
  0xd9   :  { %v1793_v25 = vpop.f32.mrf.mxu0 }
  0xda   :  { %1839 = vmatmul.mubr.msk.f32.gmra.mxu1 %vm387_vm6, %v214_v24  ;;  %1970 = vmatmul.mubr.msk.f32.gmra.mxu0 %vm387_vm6, %v214_v24  ;;  %v243_v45 = vadd.f32 %v1793_v25, %v2457_v13 }
  0xdb   :  { %1841 = vmatprep.mubr.msk.f32.mxu1 %vm2271_vm5, %v2269_v6  ;;  %1972 = vmatprep.mubr.msk.f32.mxu0 %vm2271_vm5, %v2269_v6  ;;  %v234_v26 = vpop.f32.mrf.mxu0 }
  0xdc   :  { %v235_v39 = vadd.f32 %v2457_v13, %v234_v26 }
  0xdd   :  { %v1794_v28 = vpop.f32.mrf.mxu0 }
  0xde   :  { %1842 = vmatmul.mubr.msk.f32.gmra.mxu1 %vm387_vm6, %v219_v27  ;;  %1973 = vmatmul.mubr.msk.f32.gmra.mxu0 %vm387_vm6, %v219_v27  ;;  %v246_v48 = vadd.f32 %v1794_v28, %v2457_v13 }
  0xdf   :  { %1844 = vmatprep.mubr.msk.f32.mxu1 %vm2271_vm5, %v2269_v6  ;;  %1975 = vmatprep.mubr.msk.f32.mxu0 %vm2271_vm5, %v2269_v6  ;;  %v237_v29 = vpop.f32.mrf.mxu0 }
  0xe0   :  { %v238_v42 = vadd.f32 %v2457_v13, %v237_v29 }
  0xe1   :  { %v1797_v31 = vpop.f32.mrf.mxu0 }
  0xe2   :  { %1845 = vmatmul.mubr.msk.f32.gmra.mxu1 %vm387_vm6, %v222_v30  ;;  %1976 = vmatmul.mubr.msk.f32.gmra.mxu0 %vm387_vm6, %v222_v30  ;;  %v259_v57 = vadd.f32 %v1797_v31, %v2457_v13 }
  0xe3   :  { %1847 = vmatprep.mubr.msk.f32.mxu1 %vm2271_vm5, %v2269_v6  ;;  %1978 = vmatprep.mubr.msk.f32.mxu0 %vm2271_vm5, %v2269_v6  ;;  %v250_v32 = vpop.f32.mrf.mxu0 }
  0xe4   :  { %v251_v51 = vadd.f32 %v2457_v13, %v250_v32 }
  0xe5   :  { %v1798_v34 = vpop.f32.mrf.mxu0 }
  0xe6   :  { %1848 = vmatmul.mubr.msk.f32.gmra.mxu1 %vm387_vm6, %v227_v33  ;;  %1979 = vmatmul.mubr.msk.f32.gmra.mxu0 %vm387_vm6, %v227_v33  ;;  %v262_v60 = vadd.f32 %v1798_v34, %v2457_v13 }
  0xe7   :  { %1850 = vmatprep.mubr.msk.f32.mxu1 %vm2271_vm5, %v2269_v6  ;;  %1981 = vmatprep.mubr.msk.f32.mxu0 %vm2271_vm5, %v2269_v6  ;;  %v253_v35 = vpop.f32.mrf.mxu0 }
  0xe8   :  { %v254_v54 = vadd.f32 %v2457_v13, %v253_v35 }
  0xe9   :  { %v2510_v37 = vpop.f32.mrf.mxu0 }
  0xea   :  { %1851 = vmatmul.mubr.msk.f32.gmra.mxu1 %vm387_vm6, %v230_v36  ;;  %1982 = vmatmul.mubr.msk.f32.gmra.mxu0 %vm387_vm6, %v230_v36  ;;  %v275_v5 = vadd.f32 %v2510_v37, %v2457_v13 }
  0xeb   :  { %1853 = vmatprep.mubr.msk.f32.mxu1 %vm2271_vm5, %v2269_v6  ;;  %1984 = vmatprep.mubr.msk.f32.mxu0 %vm2271_vm5, %v2269_v6  ;;  %v266_v38 = vpop.f32.mrf.mxu0 }
  0xec   :  { %v267_v63 = vadd.f32 %v2457_v13, %v266_v38 }
  0xed   :  { %v2519_v40 = vpop.f32.mrf.mxu0 }
  0xee   :  { %1854 = vmatmul.mubr.msk.f32.gmra.mxu1 %vm387_vm6, %v235_v39  ;;  %1985 = vmatmul.mubr.msk.f32.gmra.mxu0 %vm387_vm6, %v235_v39  ;;  %v278_v9 = vadd.f32 %v2519_v40, %v2457_v13 }
  0xef   :  { %1856 = vmatprep.mubr.msk.f32.mxu1 %vm2271_vm5, %v2269_v6  ;;  %1987 = vmatprep.mubr.msk.f32.mxu0 %vm2271_vm5, %v2269_v6  ;;  %v269_v41 = vpop.f32.mrf.mxu0 }
  0xf0   :  { %v270_v2 = vadd.f32 %v2457_v13, %v269_v41 }
  0xf1   :  { %v2528_v43 = vpop.f32.mrf.mxu0 }
  0xf2   :  { %1857 = vmatmul.mubr.msk.f32.gmra.mxu1 %vm387_vm6, %v238_v42  ;;  %1988 = vmatmul.mubr.msk.f32.gmra.mxu0 %vm387_vm6, %v238_v42  ;;  %v291_v16 = vadd.f32 %v2528_v43, %v2457_v13 }
  0xf3   :  { %1859 = vmatprep.mubr.msk.f32.mxu1 %vm2271_vm5, %v2269_v6  ;;  %1990 = vmatprep.mubr.msk.f32.mxu0 %vm2271_vm5, %v2269_v6  ;;  %v2536_v44 = vpop.f32.mrf.mxu0 }
  0xf4   :  { %v283_v12 = vadd.f32 %v2457_v13, %v2536_v44 }
  0xf5   :  { %v2539_v46 = vpop.f32.mrf.mxu0 }
  0xf6   :  { %1860 = vmatmul.mubr.msk.f32.gmra.mxu1 %vm387_vm6, %v243_v45  ;;  %1991 = vmatmul.mubr.msk.f32.gmra.mxu0 %vm387_vm6, %v243_v45  ;;  %v294_v17 = vadd.f32 %v2539_v46, %v2457_v13 }
  0xf7   :  { %1862 = vmatprep.mubr.msk.f32.mxu1 %vm2271_vm5, %v2269_v6  ;;  %1993 = vmatprep.mubr.msk.f32.mxu0 %vm2271_vm5, %v2269_v6  ;;  %v2547_v47 = vpop.f32.mrf.mxu0 }
  0xf8   :  { %v286_v15 = vadd.f32 %v2457_v13, %v2547_v47 }
  0xf9   :  { %v2550_v49 = vpop.f32.mrf.mxu0 }
  0xfa   :  { %1863 = vmatmul.mubr.msk.f32.gmra.mxu1 %vm387_vm6, %v246_v48  ;;  %1994 = vmatmul.mubr.msk.f32.gmra.mxu0 %vm387_vm6, %v246_v48  ;;  %v307_v20 = vadd.f32 %v2550_v49, %v2457_v13 }
  0xfb   :  { %1865 = vmatprep.mubr.msk.f32.mxu1 %vm2271_vm5, %v2269_v6  ;;  %1996 = vmatprep.mubr.msk.f32.mxu0 %vm2271_vm5, %v2269_v6  ;;  %v2558_v50 = vpop.f32.mrf.mxu0 }
  0xfc   :  { %v299_v18 = vadd.f32 %v2457_v13, %v2558_v50 }
  0xfd   :  { %v2561_v52 = vpop.f32.mrf.mxu0 }
  0xfe   :  { %1866 = vmatmul.mubr.msk.f32.gmra.mxu1 %vm387_vm6, %v251_v51  ;;  %1997 = vmatmul.mubr.msk.f32.gmra.mxu0 %vm387_vm6, %v251_v51  ;;  %v310_v21 = vadd.f32 %v2561_v52, %v2457_v13 }
  0xff   :  { %1868 = vmatprep.mubr.msk.f32.mxu1 %vm2271_vm5, %v2269_v6  ;;  %1999 = vmatprep.mubr.msk.f32.mxu0 %vm2271_vm5, %v2269_v6  ;;  %v2569_v53 = vpop.f32.mrf.mxu0 }
 0x100   :  { %v302_v19 = vadd.f32 %v2457_v13, %v2569_v53 }
 0x101   :  { %v2572_v55 = vpop.f32.mrf.mxu0 }
 0x102   :  { %1869 = vmatmul.mubr.msk.f32.gmra.mxu1 %vm387_vm6, %v254_v54  ;;  %2000 = vmatmul.mubr.msk.f32.gmra.mxu0 %vm387_vm6, %v254_v54  ;;  %v323_v24 = vadd.f32 %v2572_v55, %v2457_v13 }
 0x103   :  { %1871 = vmatprep.mubr.msk.f32.mxu1 %vm2271_vm5, %v2269_v6  ;;  %2002 = vmatprep.mubr.msk.f32.mxu0 %vm2271_vm5, %v2269_v6  ;;  %v2580_v56 = vpop.f32.mrf.mxu0 }
 0x104   :  { %v315_v22 = vadd.f32 %v2457_v13, %v2580_v56 }
 0x105   :  { %v2583_v58 = vpop.f32.mrf.mxu0 }
 0x106   :  { %1872 = vmatmul.mubr.msk.f32.gmra.mxu1 %vm387_vm6, %v259_v57  ;;  %2003 = vmatmul.mubr.msk.f32.gmra.mxu0 %vm387_vm6, %v259_v57  ;;  %v326_v25 = vadd.f32 %v2583_v58, %v2457_v13 }
 0x107   :  { %1874 = vmatprep.mubr.msk.f32.mxu1 %vm2271_vm5, %v2269_v6  ;;  %2005 = vmatprep.mubr.msk.f32.mxu0 %vm2271_vm5, %v2269_v6  ;;  %v2591_v59 = vpop.f32.mrf.mxu0 }
 0x108   :  { %v318_v23 = vadd.f32 %v2457_v13, %v2591_v59 }
 0x109   :  { %v2594_v61 = vpop.f32.mrf.mxu0 }
 0x10a   :  { %1875 = vmatmul.mubr.msk.f32.gmra.mxu1 %vm387_vm6, %v262_v60  ;;  %2006 = vmatmul.mubr.msk.f32.gmra.mxu0 %vm387_vm6, %v262_v60  ;;  %v339_v28 = vadd.f32 %v2594_v61, %v2457_v13 }
 0x10b   :  { %1877 = vmatprep.mubr.msk.f32.mxu1 %vm2271_vm5, %v2269_v6  ;;  %2008 = vmatprep.mubr.msk.f32.mxu0 %vm2271_vm5, %v2269_v6  ;;  %v2602_v62 = vpop.f32.mrf.mxu0 }
 0x10c   :  { %v331_v26 = vadd.f32 %v2457_v13, %v2602_v62 }
 0x10d   :  { %v2605_v0 = vpop.f32.mrf.mxu0 }
 0x10e   :  { %1878 = vmatmul.mubr.msk.f32.gmra.mxu1 %vm387_vm6, %v267_v63  ;;  %2009 = vmatmul.mubr.msk.f32.gmra.mxu0 %vm387_vm6, %v267_v63  ;;  %v342_v29 = vadd.f32 %v2605_v0, %v2457_v13 }
 0x10f   :  { %1880 = vmatprep.mubr.msk.f32.mxu1 %vm2271_vm5, %v2269_v6  ;;  %2011 = vmatprep.mubr.msk.f32.mxu0 %vm2271_vm5, %v2269_v6  ;;  %v2613_v1 = vpop.f32.mrf.mxu0 }
 0x110   :  { %v334_v27 = vadd.f32 %v2457_v13, %v2613_v1 }
 0x111   :  { %v2616_v3 = vpop.f32.mrf.mxu0 }
 0x112   :  { %1881 = vmatmul.mubr.msk.f32.gmra.mxu1 %vm387_vm6, %v270_v2  ;;  %2012 = vmatmul.mubr.msk.f32.gmra.mxu0 %vm387_vm6, %v270_v2  ;;  %v355_v32 = vadd.f32 %v2616_v3, %v2457_v13 }
 0x113   :  { %1883 = vmatprep.mubr.msk.f32.mxu1 %vm2271_vm5, %v2269_v6  ;;  %2014 = vmatprep.mubr.msk.f32.mxu0 %vm2271_vm5, %v2269_v6  ;;  %v2624_v4 = vpop.f32.mrf.mxu0 }
 0x114   :  { %v347_v30 = vadd.f32 %v2457_v13, %v2624_v4 }
 0x115   :  { %v2628_v7 = vpop.f32.mrf.mxu0 }
 0x116   :  { %1884 = vmatmul.mubr.msk.f32.gmra.mxu1 %vm387_vm6, %v275_v5  ;;  %2015 = vmatmul.mubr.msk.f32.gmra.mxu0 %vm387_vm6, %v275_v5  ;;  %v358_v33 = vadd.f32 %v2628_v7, %v2457_v13 }
 0x117   :  { %1886 = vmatprep.mubr.msk.f32.mxu1 %vm2271_vm5, %v2269_v6  ;;  %2017 = vmatprep.mubr.msk.f32.mxu0 %vm2271_vm5, %v2269_v6  ;;  %v2636_v8 = vpop.f32.mrf.mxu0 }
 0x118   :  { %v350_v31 = vadd.f32 %v2457_v13, %v2636_v8 }
 0x119   :  { %v2640_v10 = vpop.f32.mrf.mxu0 }
 0x11a   :  { %1887 = vmatmul.mubr.msk.f32.gmra.mxu1 %vm387_vm6, %v278_v9  ;;  %2018 = vmatmul.mubr.msk.f32.gmra.mxu0 %vm387_vm6, %v278_v9  ;;  %v371_v37 = vadd.f32 %v2640_v10, %v2457_v13 }
 0x11b   :  { %1889 = vmatprep.mubr.msk.f32.mxu1 %vm2271_vm5, %v2269_v6  ;;  %2020 = vmatprep.mubr.msk.f32.mxu0 %vm2271_vm5, %v2269_v6  ;;  %v2648_v11 = vpop.f32.mrf.mxu0 }
 0x11c   :  { %v363_v34 = vadd.f32 %v2457_v13, %v2648_v11 }
 0x11d   :  { %v1826_v14 = vpop.f32.mrf.mxu0 }
 0x11e   :  { %1890 = vmatmul.mubr.msk.f32.gmra.mxu1 %vm387_vm6, %v283_v12  ;;  %2021 = vmatmul.mubr.msk.f32.gmra.mxu0 %vm387_vm6, %v283_v12 }
 0x11f   :  { %1892 = vmatprep.mubr.msk.f32.mxu1 %vm2271_vm5, %v2269_v6  ;;  %2023 = vmatprep.mubr.msk.f32.mxu0 %vm2271_vm5, %v2269_v6  ;;  %v365_v35 = vpop.f32.mrf.mxu0 }
 0x120   :  { %v366_v36 = vadd.f32 %v2457_v13, %v365_v35 }
 0x122   :  { %1893 = vmatmul.mubr.msk.f32.gmra.mxu1 %vm387_vm6, %v286_v15  ;;  %2024 = vmatmul.mubr.msk.f32.gmra.mxu0 %vm387_vm6, %v286_v15 }
 0x123   :  { %1895 = vmatprep.mubr.msk.f32.mxu1 %vm2271_vm5, %v2269_v6  ;;  %2026 = vmatprep.mubr.msk.f32.mxu0 %vm2271_vm5, %v2269_v6 }
 0x126   :  { %1896 = vmatmul.mubr.msk.f32.gmra.mxu1 %vm387_vm6, %v291_v16  ;;  %2027 = vmatmul.mubr.msk.f32.gmra.mxu0 %vm387_vm6, %v291_v16 }
 0x127   :  { %1898 = vmatprep.mubr.msk.f32.mxu1 %vm2271_vm5, %v2269_v6  ;;  %2029 = vmatprep.mubr.msk.f32.mxu0 %vm2271_vm5, %v2269_v6 }
 0x12a   :  { %1899 = vmatmul.mubr.msk.f32.gmra.mxu1 %vm387_vm6, %v294_v17  ;;  %2030 = vmatmul.mubr.msk.f32.gmra.mxu0 %vm387_vm6, %v294_v17 }
 0x12b   :  { %1901 = vmatprep.mubr.msk.f32.mxu1 %vm2271_vm5, %v2269_v6  ;;  %2032 = vmatprep.mubr.msk.f32.mxu0 %vm2271_vm5, %v2269_v6 }
 0x12e   :  { %1902 = vmatmul.mubr.msk.f32.gmra.mxu1 %vm387_vm6, %v299_v18  ;;  %2033 = vmatmul.mubr.msk.f32.gmra.mxu0 %vm387_vm6, %v299_v18 }
 0x12f   :  { %1904 = vmatprep.mubr.msk.f32.mxu1 %vm2271_vm5, %v2269_v6  ;;  %2035 = vmatprep.mubr.msk.f32.mxu0 %vm2271_vm5, %v2269_v6 }
 0x132   :  { %1905 = vmatmul.mubr.msk.f32.gmra.mxu1 %vm387_vm6, %v302_v19  ;;  %2036 = vmatmul.mubr.msk.f32.gmra.mxu0 %vm387_vm6, %v302_v19 }
 0x133   :  { %1907 = vmatprep.mubr.msk.f32.mxu1 %vm2271_vm5, %v2269_v6  ;;  %2038 = vmatprep.mubr.msk.f32.mxu0 %vm2271_vm5, %v2269_v6 }
 0x136   :  { %1908 = vmatmul.mubr.msk.f32.gmra.mxu1 %vm387_vm6, %v307_v20  ;;  %2039 = vmatmul.mubr.msk.f32.gmra.mxu0 %vm387_vm6, %v307_v20 }
 0x137   :  { %1910 = vmatprep.mubr.msk.f32.mxu1 %vm2271_vm5, %v2269_v6  ;;  %2041 = vmatprep.mubr.msk.f32.mxu0 %vm2271_vm5, %v2269_v6 }
 0x13a   :  { %1911 = vmatmul.mubr.msk.f32.gmra.mxu1 %vm387_vm6, %v310_v21  ;;  %2042 = vmatmul.mubr.msk.f32.gmra.mxu0 %vm387_vm6, %v310_v21 }
 0x13b   :  { %1913 = vmatprep.mubr.msk.f32.mxu1 %vm2271_vm5, %v2269_v6  ;;  %2044 = vmatprep.mubr.msk.f32.mxu0 %vm2271_vm5, %v2269_v6 }
 0x13e   :  { %1914 = vmatmul.mubr.msk.f32.gmra.mxu1 %vm387_vm6, %v315_v22  ;;  %2045 = vmatmul.mubr.msk.f32.gmra.mxu0 %vm387_vm6, %v315_v22 }
 0x13f   :  { %1916 = vmatprep.mubr.msk.f32.mxu1 %vm2271_vm5, %v2269_v6  ;;  %2047 = vmatprep.mubr.msk.f32.mxu0 %vm2271_vm5, %v2269_v6 }
 0x142   :  { %1917 = vmatmul.mubr.msk.f32.gmra.mxu1 %vm387_vm6, %v318_v23  ;;  %2048 = vmatmul.mubr.msk.f32.gmra.mxu0 %vm387_vm6, %v318_v23 }
 0x143   :  { %1919 = vmatprep.mubr.msk.f32.mxu1 %vm2271_vm5, %v2269_v6  ;;  %2050 = vmatprep.mubr.msk.f32.mxu0 %vm2271_vm5, %v2269_v6 }
 0x146   :  { %1920 = vmatmul.mubr.msk.f32.gmra.mxu1 %vm387_vm6, %v323_v24  ;;  %2051 = vmatmul.mubr.msk.f32.gmra.mxu0 %vm387_vm6, %v323_v24 }
 0x147   :  { %1922 = vmatprep.mubr.msk.f32.mxu1 %vm2271_vm5, %v2269_v6  ;;  %2053 = vmatprep.mubr.msk.f32.mxu0 %vm2271_vm5, %v2269_v6 }
 0x14a   :  { %1923 = vmatmul.mubr.msk.f32.gmra.mxu1 %vm387_vm6, %v326_v25  ;;  %2054 = vmatmul.mubr.msk.f32.gmra.mxu0 %vm387_vm6, %v326_v25 }
 0x14b   :  { %1925 = vmatprep.mubr.msk.f32.mxu1 %vm2271_vm5, %v2269_v6 }
 0x14e   :  { %1926 = vmatmul.mubr.msk.f32.gmra.mxu1 %vm387_vm6, %v331_v26 }
 0x14f   :  { %1928 = vmatprep.mubr.msk.f32.mxu1 %vm2271_vm5, %v2269_v6 }
 0x152   :  { %1929 = vmatmul.mubr.msk.f32.gmra.mxu1 %vm387_vm6, %v334_v27 }
 0x153   :  { %1931 = vmatprep.mubr.msk.f32.mxu1 %vm2271_vm5, %v2269_v6 }
 0x156   :  { %1932 = vmatmul.mubr.msk.f32.gmra.mxu1 %vm387_vm6, %v339_v28 }
 0x157   :  { %1934 = vmatprep.mubr.msk.f32.mxu1 %vm2271_vm5, %v2269_v6 }
 0x15a   :  { %1935 = vmatmul.mubr.msk.f32.gmra.mxu1 %vm387_vm6, %v342_v29 }
 0x15b   :  { %1937 = vmatprep.mubr.msk.f32.mxu1 %vm2271_vm5, %v2269_v6 }
 0x15e   :  { %1938 = vmatmul.mubr.msk.f32.gmra.mxu1 %vm387_vm6, %v347_v30 }
 0x15f   :  { %1940 = vmatprep.mubr.msk.f32.mxu1 %vm2271_vm5, %v2269_v6 }
 0x162   :  { %1941 = vmatmul.mubr.msk.f32.gmra.mxu1 %vm387_vm6, %v350_v31 }
 0x163   :  { %1943 = vmatprep.mubr.msk.f32.mxu1 %vm2271_vm5, %v2269_v6 }
 0x166   :  { %1944 = vmatmul.mubr.msk.f32.gmra.mxu1 %vm387_vm6, %v355_v32 }
 0x167   :  { %1946 = vmatprep.mubr.msk.f32.mxu1 %vm2271_vm5, %v2269_v6 }
 0x16a   :  { %1947 = vmatmul.mubr.msk.f32.gmra.mxu1 %vm387_vm6, %v358_v33 }
 0x16b   :  { %1949 = vmatprep.mubr.msk.f32.mxu1 %vm2271_vm5, %v2269_v6 }
 0x16e   :  { %1950 = vmatmul.mubr.msk.f32.gmra.mxu1 %vm387_vm6, %v363_v34 }
 0x16f   :  { %1952 = vmatprep.mubr.msk.f32.mxu1 %vm2271_vm5, %v2269_v6 }
 0x172   :  { %1953 = vmatmul.mubr.msk.f32.gmra.mxu1 %vm387_vm6, %v366_v36 }
 0x173   :  { %1955 = vmatprep.mubr.msk.f32.mxu1 %vm2271_vm5, %v2269_v6 }
 0x176   :  { %1956 = vmatmul.mubr.msk.f32.gmra.mxu1 %vm387_vm6, %v371_v37 }
 0x177   :  { %2056 = vmatprep.mubr.msk.f32.mxu1 %vm2271_vm5, %v2269_v6 }
 0x17a   :  { %2057 = vmatmul.mubr.msk.f32.vlgmr.msra.gmra.mxu1 %vm387_vm6, %v331_v26 }
 0x17b   :  { %2059 = vmatprep.mubr.msk.f32.mxu1 %vm2271_vm5, %v2269_v6 }
 0x17e   :  { %2060 = vmatmul.mubr.msk.f32.gmra.mxu1 %vm387_vm6, %v334_v27 }
 0x17f   :  { %2062 = vmatprep.mubr.msk.f32.mxu1 %vm2271_vm5, %v2269_v6 }
 0x182   :  { %2063 = vmatmul.mubr.msk.f32.gmra.mxu1 %vm387_vm6, %v339_v28 }
 0x183   :  { %2065 = vmatprep.mubr.msk.f32.mxu1 %vm2271_vm5, %v2269_v6 }
 0x186   :  { %2066 = vmatmul.mubr.msk.f32.gmra.mxu1 %vm387_vm6, %v342_v29 }
 0x187   :  { %2068 = vmatprep.mubr.msk.f32.mxu1 %vm2271_vm5, %v2269_v6 }
 0x18a   :  { %2069 = vmatmul.mubr.msk.f32.gmra.mxu1 %vm387_vm6, %v347_v30 }
 0x18b   :  { %2071 = vmatprep.mubr.msk.f32.mxu1 %vm2271_vm5, %v2269_v6 }
 0x18e   :  { %v2813_v13 = vpop.f32.mrf.mxu1  ;;  %v863_v38 = vpop.f32.mrf.mxu0  ;;  %2072 = vmatmul.mubr.msk.f32.gmra.mxu1 %vm387_vm6, %v350_v31 }
 0x18f   :  { %v1627_v39 = vmul.f32 -1.442695, %v863_v38  ;;  %2074 = vmatprep.mubr.msk.f32.mxu1 %vm2271_vm5, %v2269_v6  ;;  %v1077_v22 = vmax.f32 %v2813_v13, 0.0 }
 0x190   :  { %v1831_v40 = vpop.f32.mrf.mxu1  ;;  %v1962_v41 = vpop.f32.mrf.mxu0 }
 0x191   :  { %2096 = vpow2.f32 %v1627_v39 }
 0x192   :  { %v2818_v42 = vpop.f32.mrf.mxu1  ;;  %v868_v43 = vpop.f32.mrf.mxu0  ;;  %2075 = vmatmul.mubr.msk.f32.gmra.mxu1 %vm387_vm6, %v355_v32 }
 0x193   :  { %v1628_v44 = vmul.f32 -1.442695, %v868_v43  ;;  %2077 = vmatprep.mubr.msk.f32.mxu1 %vm2271_vm5, %v2269_v6 }
 0x194   :  { %v1834_v45 = vpop.f32.mrf.mxu1  ;;  %v1965_v46 = vpop.f32.mrf.mxu0 }
 0x195   :  { %2098 = vpow2.f32 %v1628_v44 }
 0x196   :  { %v2823_v47 = vpop.f32.mrf.mxu1  ;;  %v873_v48 = vpop.f32.mrf.mxu0  ;;  %2078 = vmatmul.mubr.msk.f32.gmra.mxu1 %vm387_vm6, %v358_v33  ;;  %v1078_v33 = vmax.f32 %v2818_v42, 0.0 }
 0x197   :  { %v1629_v49 = vmul.f32 -1.442695, %v873_v48  ;;  %2080 = vmatprep.mubr.msk.f32.mxu1 %vm2271_vm5, %v2269_v6  ;;  %v1079_v42 = vmax.f32 %v2823_v47, 0.0 }
 0x198   :  { %v1837_v50 = vpop.f32.mrf.mxu1  ;;  %v1968_v51 = vpop.f32.mrf.mxu0 }
 0x199   :  { %2100 = vpow2.f32 %v1629_v49 }
 0x19a   :  { %v2828_v52 = vpop.f32.mrf.mxu1  ;;  %v878_v53 = vpop.f32.mrf.mxu0  ;;  %2081 = vmatmul.mubr.msk.f32.gmra.mxu1 %vm387_vm6, %v363_v34 }
 0x19b   :  { %v1630_v54 = vmul.f32 -1.442695, %v878_v53  ;;  %2083 = vmatprep.mubr.msk.f32.mxu1 %vm2271_vm5, %v2269_v6  ;;  %v1080_v47 = vmax.f32 %v2828_v52, 0.0 }
 0x19c   :  { %v1840_v55 = vpop.f32.mrf.mxu1  ;;  %v1971_v56 = vpop.f32.mrf.mxu0 }
 0x19d   :  { %2102 = vpow2.f32 %v1630_v54 }
 0x19e   :  { %v2097_v57 = vpop.eup %2096  ;;  %v2833_v58 = vpop.f32.mrf.mxu1  ;;  %2084 = vmatmul.mubr.msk.f32.gmra.mxu1 %vm387_vm6, %v366_v36 }
 0x19f   :  { %v883_v59 = vpop.f32.mrf.mxu0  ;;  %v1249_v60 = vadd.f32 1.0, %v2097_v57  ;;  %2086 = vmatprep.mubr.msk.f32.mxu1 %vm2271_vm5, %v2269_v6 }
 0x1a0   :  { %v1631_v61 = vmul.f32 -1.442695, %v883_v59  ;;  %v1843_v62 = vpop.f32.mrf.mxu1 }
 0x1a1   :  { %v1974_v63 = vpop.f32.mrf.mxu0  ;;  %2104 = vrcp.f32 %v1249_v60 }
 0x1a2   :  { %v2099_v0 = vpop.eup %2098  ;;  %2106 = vpow2.f32 %v1631_v61  ;;  %v2838_v1 = vpop.f32.mrf.mxu1  ;;  %2087 = vmatmul.mubr.msk.f32.gmra.mxu1 %vm387_vm6, %v371_v37 }
 0x1a3   :  { %v888_v2 = vpop.f32.mrf.mxu0  ;;  %v1250_v3 = vadd.f32 1.0, %v2099_v0 }
 0x1a4   :  { %v1632_v4 = vmul.f32 -1.442695, %v888_v2  ;;  %v1846_v5 = vpop.f32.mrf.mxu1 }
 0x1a5   :  { %v1977_v7 = vpop.f32.mrf.mxu0  ;;  %2108 = vrcp.f32 %v1250_v3 }
 0x1a6   :  { %v2101_v8 = vpop.eup %2100  ;;  %2110 = vpow2.f32 %v1632_v4  ;;  %v2841_v9 = vpop.f32.mrf.mxu1  ;;  %v1081_v4 = vmax.f32 %v2833_v58, 0.0  ;;  %v1082_v58 = vmax.f32 %v2838_v1, 0.0 }
 0x1a7   :  { %v893_v6 = vpop.f32.mrf.mxu0  ;;  %v1251_v10 = vadd.f32 1.0, %v2101_v8  ;;  %v1083_v1 = vmax.f32 %v2841_v9, 0.0 }
 0x1a8   :  { %v1633_v11 = vmul.f32 -1.442695, %v893_v6  ;;  %v1849_v12 = vpop.f32.mrf.mxu1 }
 0x1a9   :  { %v1980_v14 = vpop.f32.mrf.mxu0  ;;  %2112 = vrcp.f32 %v1251_v10 }
 0x1aa   :  { %v2103_v15 = vpop.eup %2102  ;;  %2114 = vpow2.f32 %v1633_v11  ;;  %v2843_v16 = vpop.f32.mrf.mxu1 }
 0x1ab   :  { %v898_v17 = vpop.f32.mrf.mxu0  ;;  %v1252_v18 = vadd.f32 1.0, %v2103_v15  ;;  %v1084_v9 = vmax.f32 %v2843_v16, 0.0 }
 0x1ac   :  { %v1634_v19 = vmul.f32 -1.442695, %v898_v17  ;;  %v1852_v20 = vpop.f32.mrf.mxu1 }
 0x1ad   :  { %v1983_v21 = vpop.f32.mrf.mxu0  ;;  %2116 = vrcp.f32 %v1252_v18 }
 0x1ae   :  { %v2105_v23 = vpop.eup %2104  ;;  %2118 = vpow2.f32 %v1634_v19  ;;  %v2846_v24 = vpop.f32.mrf.mxu1 }
 0x1af   :  { %v903_v25 = vpop.f32.mrf.mxu0  ;;  %v2107_v26 = vpop.eup %2106  ;;  %v1378_v27 = vmul.f32 %v2105_v23, %v1077_v22 }
 0x1b0   :  { %v1635_v28 = vmul.f32 -1.442695, %v903_v25  ;;  %v1253_v29 = vadd.f32 1.0, %v2107_v26  ;;  %v1855_v30 = vpop.f32.mrf.mxu1 }
 0x1b1   :  { %v1986_v31 = vpop.f32.mrf.mxu0  ;;  %v1421_v32 = vmax.f32 %v1378_v27, 0.0 }
 0x1b2   :  { %2120 = vpow2.f32 %v1635_v28  ;;  %v2109_v34 = vpop.eup %2108  ;;  %v2849_v35 = vpop.f32.mrf.mxu1 }
 0x1b3   :  { %2122 = vrcp.f32 %v1253_v29  ;;  %v908_v36 = vpop.f32.mrf.mxu0  ;;  %v2111_v37 = vpop.eup %2110  ;;  %1465 = vst.msk [vmem:[%s3132_s3] sm:$0xff] %vm1464_vm7, %v1421_v32  ;;  %v1379_v13 = vmul.f32 %v2109_v34, %v1078_v33 }
 0x1b4   :  { %v1636_v38 = vmul.f32 -1.442695, %v908_v36  ;;  %v1254_v39 = vadd.f32 1.0, %v2111_v37  ;;  %v1858_v40 = vpop.f32.mrf.mxu1 }
 0x1b5   :  { %v1989_v41 = vpop.f32.mrf.mxu0  ;;  %v1422_v43 = vmax.f32 %v1379_v13, 0.0 }
 0x1b6   :  { %2124 = vpow2.f32 %v1636_v38  ;;  %v2113_v44 = vpop.eup %2112  ;;  %v2856_v45 = vpop.f32.mrf.mxu1 }
 0x1b7   :  { %2126 = vrcp.f32 %v1254_v39  ;;  %v913_v46 = vpop.f32.mrf.mxu0  ;;  %v2115_v48 = vpop.eup %2114  ;;  %1466 = vst.msk [vmem:[%s3132_s3 + $0x8] sm:$0xff] %vm1464_vm7, %v1422_v43  ;;  %v1380_v49 = vmul.f32 %v2113_v44, %v1079_v42 }
 0x1b8   :  { %v1637_v50 = vmul.f32 -1.442695, %v913_v46  ;;  %v1255_v51 = vadd.f32 1.0, %v2115_v48  ;;  %v1861_v53 = vpop.f32.mrf.mxu1 }
 0x1b9   :  { %v1992_v54 = vpop.f32.mrf.mxu0  ;;  %v1423_v55 = vmax.f32 %v1380_v49, 0.0  ;;  %v1085_v49 = vmax.f32 %v2846_v24, 0.0  ;;  %v1086_v24 = vmax.f32 %v2849_v35, 0.0  ;;  %v1087_v35 = vmax.f32 %v2856_v45, 0.0 }
 0x1ba   :  { %2128 = vpow2.f32 %v1637_v50  ;;  %v2117_v56 = vpop.eup %2116  ;;  %v2863_v57 = vpop.f32.mrf.mxu1 }
 0x1bb   :  { %2130 = vrcp.f32 %v1255_v51  ;;  %v918_v59 = vpop.f32.mrf.mxu0  ;;  %v2119_v60 = vpop.eup %2118  ;;  %1467 = vst.msk [vmem:[%s3132_s3 + $0x10] sm:$0xff] %vm1464_vm7, %v1423_v55  ;;  %v1381_v61 = vmul.f32 %v2117_v56, %v1080_v47  ;;  %v1088_v45 = vmax.f32 %v2863_v57, 0.0 }
 0x1bc   :  { %v1638_v62 = vmul.f32 -1.442695, %v918_v59  ;;  %v1256_v63 = vadd.f32 1.0, %v2119_v60  ;;  %v1864_v0 = vpop.f32.mrf.mxu1 }
 0x1bd   :  { %v1995_v2 = vpop.f32.mrf.mxu0  ;;  %v1424_v3 = vmax.f32 %v1381_v61, 0.0 }
 0x1be   :  { %2132 = vpow2.f32 %v1638_v62  ;;  %v2870_v5 = vpop.f32.mrf.mxu1 }
 0x1bf   :  { %v2121_v52 = vpop.eup %2120  ;;  %2134 = vrcp.f32 %v1256_v63  ;;  %v923_v7 = vpop.f32.mrf.mxu0  ;;  %1468 = vst.msk [vmem:[%s3132_s3 + $0x18] sm:$0xff] %vm1464_vm7, %v1424_v3 }
 0x1c0   :  { %v2123_v8 = vpop.eup %2122  ;;  %v1257_v6 = vadd.f32 1.0, %v2121_v52  ;;  %v1639_v10 = vmul.f32 -1.442695, %v923_v7  ;;  %v1867_v12 = vpop.f32.mrf.mxu1 }
 0x1c1   :  { %v1382_v11 = vmul.f32 %v2123_v8, %v1081_v4  ;;  %v1998_v14 = vpop.f32.mrf.mxu0 }
 0x1c2   :  { %2136 = vrcp.f32 %v1257_v6  ;;  %v2877_v18 = vpop.f32.mrf.mxu1 }
 0x1c3   :  { %v2125_v15 = vpop.eup %2124  ;;  %v1425_v17 = vmax.f32 %v1382_v11, 0.0  ;;  %2138 = vpow2.f32 %v1639_v10  ;;  %v928_v19 = vpop.f32.mrf.mxu0 }
 0x1c4   :  { %v2127_v20 = vpop.eup %2126  ;;  %v1258_v21 = vadd.f32 1.0, %v2125_v15  ;;  %v1640_v22 = vmul.f32 -1.442695, %v928_v19  ;;  %v1870_v25 = vpop.f32.mrf.mxu1 }
 0x1c5   :  { %1469 = vst.msk [vmem:[%s3132_s3 + $0x20] sm:$0xff] %vm1464_vm7, %v1425_v17  ;;  %v1383_v23 = vmul.f32 %v2127_v20, %v1082_v58  ;;  %v2001_v26 = vpop.f32.mrf.mxu0 }
 0x1c6   :  { %2140 = vrcp.f32 %v1258_v21  ;;  %v2884_v29 = vpop.f32.mrf.mxu1 }
 0x1c7   :  { %v2129_v27 = vpop.eup %2128  ;;  %v1426_v28 = vmax.f32 %v1383_v23, 0.0  ;;  %2142 = vpow2.f32 %v1640_v22  ;;  %v933_v30 = vpop.f32.mrf.mxu0 }
 0x1c8   :  { %v2131_v31 = vpop.eup %2130  ;;  %v1259_v32 = vadd.f32 1.0, %v2129_v27  ;;  %v1641_v33 = vmul.f32 -1.442695, %v933_v30  ;;  %v1873_v36 = vpop.f32.mrf.mxu1 }
 0x1c9   :  { %1470 = vst.msk [vmem:[%s3132_s3 + $0x28] sm:$0xff] %vm1464_vm7, %v1426_v28  ;;  %v1384_v34 = vmul.f32 %v2131_v31, %v1083_v1  ;;  %v2004_v37 = vpop.f32.mrf.mxu0 }
 0x1ca   :  { %2144 = vrcp.f32 %v1259_v32  ;;  %v2891_v39 = vpop.f32.mrf.mxu1 }
 0x1cb   :  { %v2133_v13 = vpop.eup %2132  ;;  %v1427_v38 = vmax.f32 %v1384_v34, 0.0  ;;  %2146 = vpow2.f32 %v1641_v33  ;;  %v938_v40 = vpop.f32.mrf.mxu0  ;;  %v1089_v33 = vmax.f32 %v2870_v5, 0.0  ;;  %v1090_v5 = vmax.f32 %v2877_v18, 0.0 }
 0x1cc   :  { %v2135_v41 = vpop.eup %2134  ;;  %v1260_v43 = vadd.f32 1.0, %v2133_v13  ;;  %v1642_v42 = vmul.f32 -1.442695, %v938_v40  ;;  %v1876_v46 = vpop.f32.mrf.mxu1  ;;  %v1091_v18 = vmax.f32 %v2884_v29, 0.0  ;;  %v1092_v29 = vmax.f32 %v2891_v39, 0.0 }
 0x1cd   :  { %1471 = vst.msk [vmem:[%s3132_s3 + $0x30] sm:$0xff] %vm1464_vm7, %v1427_v38  ;;  %v1385_v44 = vmul.f32 %v2135_v41, %v1084_v9  ;;  %v2007_v48 = vpop.f32.mrf.mxu0 }
 0x1ce   :  { %2148 = vrcp.f32 %v1260_v43  ;;  %v2898_v51 = vpop.f32.mrf.mxu1 }
 0x1cf   :  { %v2137_v50 = vpop.eup %2136  ;;  %v1428_v16 = vmax.f32 %v1385_v44, 0.0  ;;  %2150 = vpow2.f32 %v1642_v42  ;;  %v943_v53 = vpop.f32.mrf.mxu0 }
 0x1d0   :  { %v2139_v54 = vpop.eup %2138  ;;  %v1386_v55 = vmul.f32 %v2137_v50, %v1085_v49  ;;  %v1643_v47 = vmul.f32 -1.442695, %v943_v53  ;;  %v1879_v59 = vpop.f32.mrf.mxu1 }
 0x1d1   :  { %1472 = vst.msk [vmem:[%s3132_s3 + $0x38] sm:$0xff] %vm1464_vm7, %v1428_v16  ;;  %v1261_v56 = vadd.f32 1.0, %v2139_v54  ;;  %v2010_v60 = vpop.f32.mrf.mxu0 }
 0x1d2   :  { %v1429_v61 = vmax.f32 %v1386_v55, 0.0  ;;  %2152 = vpow2.f32 %v1643_v47  ;;  %v2905_v63 = vpop.f32.mrf.mxu1 }
 0x1d3   :  { %v2141_v62 = vpop.eup %2140  ;;  %2154 = vrcp.f32 %v1261_v56  ;;  %v948_v0 = vpop.f32.mrf.mxu0 }
 0x1d4   :  { %v2143_v2 = vpop.eup %2142  ;;  %1473 = vst.msk [vmem:[%s3132_s3 + $0x40] sm:$0xff] %vm1464_vm7, %v1429_v61  ;;  %v1387_v3 = vmul.f32 %v2141_v62, %v1086_v24  ;;  %v1644_v52 = vmul.f32 -1.442695, %v948_v0  ;;  %v1882_v7 = vpop.f32.mrf.mxu1 }
 0x1d5   :  { %v1262_v4 = vadd.f32 1.0, %v2143_v2  ;;  %v2013_v8 = vpop.f32.mrf.mxu0 }
 0x1d6   :  { %v1430_v6 = vmax.f32 %v1387_v3, 0.0  ;;  %2156 = vpow2.f32 %v1644_v52  ;;  %v2912_v11 = vpop.f32.mrf.mxu1 }
 0x1d7   :  { %v2145_v10 = vpop.eup %2144  ;;  %2158 = vrcp.f32 %v1262_v4  ;;  %v953_v12 = vpop.f32.mrf.mxu0 }
 0x1d8   :  { %v2147_v14 = vpop.eup %2146  ;;  %1474 = vst.msk [vmem:[%s3132_s3 + $0x48] sm:$0xff] %vm1464_vm7, %v1430_v6  ;;  %v1388_v15 = vmul.f32 %v2145_v10, %v1087_v35  ;;  %v1645_v17 = vmul.f32 -1.442695, %v953_v12  ;;  %v1885_v19 = vpop.f32.mrf.mxu1 }
 0x1d9   :  { %v1263_v58 = vadd.f32 1.0, %v2147_v14  ;;  %v2016_v20 = vpop.f32.mrf.mxu0 }
 0x1da   :  { %v1431_v21 = vmax.f32 %v1388_v15, 0.0  ;;  %2160 = vpow2.f32 %v1645_v17  ;;  %v2919_v23 = vpop.f32.mrf.mxu1  ;;  %v1093_v15 = vmax.f32 %v2898_v51, 0.0  ;;  %v1094_v51 = vmax.f32 %v2905_v63, 0.0 }
 0x1db   :  { %v2149_v22 = vpop.eup %2148  ;;  %2162 = vrcp.f32 %v1263_v58  ;;  %v958_v25 = vpop.f32.mrf.mxu0  ;;  %v1095_v63 = vmax.f32 %v2912_v11, 0.0  ;;  %v1096_v11 = vmax.f32 %v2919_v23, 0.0 }
 0x1dc   :  { %v2151_v26 = vpop.eup %2150  ;;  %1475 = vst.msk [vmem:[%s3132_s3 + $0x50] sm:$0xff] %vm1464_vm7, %v1431_v21  ;;  %v1389_v27 = vmul.f32 %v2149_v22, %v1088_v45  ;;  %v1646_v28 = vmul.f32 -1.442695, %v958_v25  ;;  %v1888_v30 = vpop.f32.mrf.mxu1 }
 0x1dd   :  { %v1264_v1 = vadd.f32 1.0, %v2151_v26  ;;  %v2019_v31 = vpop.f32.mrf.mxu0 }
 0x1de   :  { %v1432_v32 = vmax.f32 %v1389_v27, 0.0  ;;  %2164 = vpow2.f32 %v1646_v28  ;;  %v2926_v34 = vpop.f32.mrf.mxu1 }
 0x1df   :  { %v2153_v57 = vpop.eup %2152  ;;  %2166 = vrcp.f32 %v1264_v1  ;;  %v963_v36 = vpop.f32.mrf.mxu0 }
 0x1e0   :  { %v2155_v37 = vpop.eup %2154  ;;  %1476 = vst.msk [vmem:[%s3132_s3 + $0x58] sm:$0xff] %vm1464_vm7, %v1432_v32  ;;  %v1265_v13 = vadd.f32 1.0, %v2153_v57  ;;  %v1647_v38 = vmul.f32 -1.442695, %v963_v36  ;;  %v1891_v40 = vpop.f32.mrf.mxu1 }
 0x1e1   :  { %v1390_v9 = vmul.f32 %v2155_v37, %v1089_v33  ;;  %v2022_v41 = vpop.f32.mrf.mxu0 }
 0x1e2   :  { %2168 = vrcp.f32 %v1265_v13  ;;  %v2933_v44 = vpop.f32.mrf.mxu1 }
 0x1e3   :  { %v2157_v43 = vpop.eup %2156  ;;  %v1433_v42 = vmax.f32 %v1390_v9, 0.0  ;;  %2170 = vpow2.f32 %v1647_v38  ;;  %v968_v46 = vpop.f32.mrf.mxu0 }
 0x1e4   :  { %v2159_v48 = vpop.eup %2158  ;;  %v1266_v49 = vadd.f32 1.0, %v2157_v43  ;;  %v1648_v50 = vmul.f32 -1.442695, %v968_v46  ;;  %v1894_v53 = vpop.f32.mrf.mxu1 }
 0x1e5   :  { %1477 = vst.msk [vmem:[%s3132_s3 + $0x60] sm:$0xff] %vm1464_vm7, %v1433_v42  ;;  %v1391_v16 = vmul.f32 %v2159_v48, %v1090_v5  ;;  %v2025_v54 = vpop.f32.mrf.mxu0 }
 0x1e6   :  { %2172 = vrcp.f32 %v1266_v49  ;;  %v2940_v56 = vpop.f32.mrf.mxu1 }
 0x1e7   :  { %v2161_v55 = vpop.eup %2160  ;;  %v1434_v47 = vmax.f32 %v1391_v16, 0.0  ;;  %2174 = vpow2.f32 %v1648_v50  ;;  %v973_v59 = vpop.f32.mrf.mxu0 }
 0x1e8   :  { %v2163_v60 = vpop.eup %2162  ;;  %v1267_v61 = vadd.f32 1.0, %v2161_v55  ;;  %v1649_v24 = vmul.f32 -1.442695, %v973_v59  ;;  %v1897_v0 = vpop.f32.mrf.mxu1 }
 0x1e9   :  { %1478 = vst.msk [vmem:[%s3132_s3 + $0x68] sm:$0xff] %vm1464_vm7, %v1434_v47  ;;  %v1392_v62 = vmul.f32 %v2163_v60, %v1091_v18  ;;  %v2028_v2 = vpop.f32.mrf.mxu0 }
 0x1ea   :  { %2176 = vrcp.f32 %v1267_v61  ;;  %v2947_v4 = vpop.f32.mrf.mxu1 }
 0x1eb   :  { %v2165_v3 = vpop.eup %2164  ;;  %v1435_v52 = vmax.f32 %v1392_v62, 0.0  ;;  %2178 = vpow2.f32 %v1649_v24  ;;  %v978_v7 = vpop.f32.mrf.mxu0  ;;  %v1097_v24 = vmax.f32 %v2926_v34, 0.0  ;;  %v1098_v34 = vmax.f32 %v2933_v44, 0.0 }
 0x1ec   :  { %v2167_v8 = vpop.eup %2166  ;;  %v1268_v6 = vadd.f32 1.0, %v2165_v3  ;;  %v1650_v35 = vmul.f32 -1.442695, %v978_v7  ;;  %v1900_v12 = vpop.f32.mrf.mxu1  ;;  %v1099_v44 = vmax.f32 %v2940_v56, 0.0  ;;  %v1100_v56 = vmax.f32 %v2947_v4, 0.0 }
 0x1ed   :  { %1479 = vst.msk [vmem:[%s3132_s3 + $0x70] sm:$0xff] %vm1464_vm7, %v1435_v52  ;;  %v1393_v10 = vmul.f32 %v2167_v8, %v1092_v29  ;;  %v2031_v14 = vpop.f32.mrf.mxu0 }
 0x1ee   :  { %2180 = vrcp.f32 %v1268_v6  ;;  %v2954_v58 = vpop.f32.mrf.mxu1 }
 0x1ef   :  { %v2169_v17 = vpop.eup %2168  ;;  %v1436_v39 = vmax.f32 %v1393_v10, 0.0  ;;  %2182 = vpow2.f32 %v1650_v35  ;;  %v983_v19 = vpop.f32.mrf.mxu0 }
 0x1f0   :  { %v2171_v20 = vpop.eup %2170  ;;  %v1394_v21 = vmul.f32 %v2169_v17, %v1093_v15  ;;  %v1651_v45 = vmul.f32 -1.442695, %v983_v19  ;;  %v1903_v25 = vpop.f32.mrf.mxu1 }
 0x1f1   :  { %1480 = vst.msk [vmem:[%s3132_s3 + $0x78] sm:$0xff] %vm1464_vm7, %v1436_v39  ;;  %v1269_v22 = vadd.f32 1.0, %v2171_v20  ;;  %v2034_v26 = vpop.f32.mrf.mxu0 }
 0x1f2   :  { %v1437_v27 = vmax.f32 %v1394_v21, 0.0  ;;  %2184 = vpow2.f32 %v1651_v45  ;;  %v2961_v1 = vpop.f32.mrf.mxu1 }
 0x1f3   :  { %v2173_v28 = vpop.eup %2172  ;;  %2186 = vrcp.f32 %v1269_v22  ;;  %v988_v30 = vpop.f32.mrf.mxu0 }
 0x1f4   :  { %v2175_v31 = vpop.eup %2174  ;;  %1481 = vst.msk [vmem:[%s3132_s3 + $0x80] sm:$0xff] %vm1464_vm7, %v1437_v27  ;;  %v1395_v32 = vmul.f32 %v2173_v28, %v1094_v51  ;;  %v1652_v57 = vmul.f32 -1.442695, %v988_v30  ;;  %v1906_v36 = vpop.f32.mrf.mxu1 }
 0x1f5   :  { %v1270_v33 = vadd.f32 1.0, %v2175_v31  ;;  %v2037_v37 = vpop.f32.mrf.mxu0 }
 0x1f6   :  { %v1438_v13 = vmax.f32 %v1395_v32, 0.0  ;;  %2188 = vpow2.f32 %v1652_v57  ;;  %v2968_v9 = vpop.f32.mrf.mxu1 }
 0x1f7   :  { %v2177_v38 = vpop.eup %2176  ;;  %2190 = vrcp.f32 %v1270_v33  ;;  %v993_v40 = vpop.f32.mrf.mxu0 }
 0x1f8   :  { %v2179_v41 = vpop.eup %2178  ;;  %1482 = vst.msk [vmem:[%s3132_s3 + $0x88] sm:$0xff] %vm1464_vm7, %v1438_v13  ;;  %v1396_v43 = vmul.f32 %v2177_v38, %v1095_v63  ;;  %v1653_v42 = vmul.f32 -1.442695, %v993_v40  ;;  %v1909_v46 = vpop.f32.mrf.mxu1 }
 0x1f9   :  { %v1271_v5 = vadd.f32 1.0, %v2179_v41  ;;  %v2040_v48 = vpop.f32.mrf.mxu0 }
 0x1fa   :  { %v1439_v49 = vmax.f32 %v1396_v43, 0.0  ;;  %2192 = vpow2.f32 %v1653_v42  ;;  %v2975_v16 = vpop.f32.mrf.mxu1  ;;  %v1101_v43 = vmax.f32 %v2954_v58, 0.0 }
 0x1fb   :  { %v2181_v50 = vpop.eup %2180  ;;  %2194 = vrcp.f32 %v1271_v5  ;;  %v998_v53 = vpop.f32.mrf.mxu0 }
 0x1fc   :  { %v2183_v54 = vpop.eup %2182  ;;  %1483 = vst.msk [vmem:[%s3132_s3 + $0x90] sm:$0xff] %vm1464_vm7, %v1439_v49  ;;  %v1397_v55 = vmul.f32 %v2181_v50, %v1096_v11  ;;  %v1654_v47 = vmul.f32 -1.442695, %v998_v53  ;;  %v1912_v59 = vpop.f32.mrf.mxu1  ;;  %v1102_v53 = vmax.f32 %v2961_v1, 0.0 }
 0x1fd   :  { %v1272_v18 = vadd.f32 1.0, %v2183_v54  ;;  %v2043_v60 = vpop.f32.mrf.mxu0 }
 0x1fe   :  { %v1440_v61 = vmax.f32 %v1397_v55, 0.0  ;;  %2196 = vpow2.f32 %v1654_v47  ;;  %v2982_v62 = vpop.f32.mrf.mxu1 }
 0x1ff   :  { %v2185_v23 = vpop.eup %2184  ;;  %2198 = vrcp.f32 %v1272_v18  ;;  %v1003_v0 = vpop.f32.mrf.mxu0 }
 0x200   :  { %v2187_v2 = vpop.eup %2186  ;;  %1484 = vst.msk [vmem:[%s3132_s3 + $0x98] sm:$0xff] %vm1464_vm7, %v1440_v61  ;;  %v1273_v3 = vadd.f32 1.0, %v2185_v23  ;;  %v1655_v52 = vmul.f32 -1.442695, %v1003_v0  ;;  %v1915_v7 = vpop.f32.mrf.mxu1  ;;  %v1103_v61 = vmax.f32 %v2968_v9, 0.0 }
 0x201   :  { %v1398_v29 = vmul.f32 %v2187_v2, %v1097_v24  ;;  %v2046_v8 = vpop.f32.mrf.mxu0 }
 0x202   :  { %2200 = vrcp.f32 %v1273_v3  ;;  %v2989_v10 = vpop.f32.mrf.mxu1 }
 0x203   :  { %v2189_v6 = vpop.eup %2188  ;;  %v1441_v35 = vmax.f32 %v1398_v29, 0.0  ;;  %2202 = vpow2.f32 %v1655_v52  ;;  %v1008_v12 = vpop.f32.mrf.mxu0  ;;  %v1104_v29 = vmax.f32 %v2975_v16, 0.0 }
 0x204   :  { %v2191_v14 = vpop.eup %2190  ;;  %v1274_v15 = vadd.f32 1.0, %v2189_v6  ;;  %v1656_v17 = vmul.f32 -1.442695, %v1008_v12  ;;  %v1918_v19 = vpop.f32.mrf.mxu1 }
 0x205   :  { %1485 = vst.msk [vmem:[%s3132_s3 + $0xa0] sm:$0xff] %vm1464_vm7, %v1441_v35  ;;  %v1399_v39 = vmul.f32 %v2191_v14, %v1098_v34  ;;  %v2049_v20 = vpop.f32.mrf.mxu0  ;;  %v1105_v14 = vmax.f32 %v2982_v62, 0.0 }
 0x206   :  { %2204 = vrcp.f32 %v1274_v15  ;;  %v2996_v22 = vpop.f32.mrf.mxu1  ;;  %v1106_v20 = vmax.f32 %v2989_v10, 0.0 }
 0x207   :  { %v2193_v21 = vpop.eup %2192  ;;  %v1442_v45 = vmax.f32 %v1399_v39, 0.0  ;;  %2206 = vpow2.f32 %v1656_v17  ;;  %v1013_v25 = vpop.f32.mrf.mxu0 }
 0x208   :  { %v2195_v26 = vpop.eup %2194  ;;  %v1275_v27 = vadd.f32 1.0, %v2193_v21  ;;  %v1657_v51 = vmul.f32 -1.442695, %v1013_v25  ;;  %v1921_v30 = vpop.f32.mrf.mxu1 }
 0x209   :  { %1486 = vst.msk [vmem:[%s3132_s3 + $0xa8] sm:$0xff] %vm1464_vm7, %v1442_v45  ;;  %v1400_v28 = vmul.f32 %v2195_v26, %v1099_v44  ;;  %v2052_v31 = vpop.f32.mrf.mxu0  ;;  %v1107_v26 = vmax.f32 %v2996_v22, 0.0 }
 0x20a   :  { %2208 = vrcp.f32 %v1275_v27  ;;  %v3003_v33 = vpop.f32.mrf.mxu1 }
 0x20b   :  { %v2197_v32 = vpop.eup %2196  ;;  %v1443_v57 = vmax.f32 %v1400_v28, 0.0  ;;  %2210 = vpow2.f32 %v1657_v51  ;;  %v1018_v36 = vpop.f32.mrf.mxu0  ;;  %v1108_v31 = vmax.f32 %v3003_v33, 0.0 }
 0x20c   :  { %v2199_v37 = vpop.eup %2198  ;;  %v1276_v13 = vadd.f32 1.0, %v2197_v32  ;;  %v1658_v63 = vmul.f32 -1.442695, %v1018_v36  ;;  %v1924_v40 = vpop.f32.mrf.mxu1 }
 0x20d   :  { %1487 = vst.msk [vmem:[%s3132_s3 + $0xb0] sm:$0xff] %vm1464_vm7, %v1443_v57  ;;  %v1401_v38 = vmul.f32 %v2199_v37, %v1100_v56  ;;  %v2055_v41 = vpop.f32.mrf.mxu0 }
 0x20e   :  { %2212 = vrcp.f32 %v1276_v13  ;;  %v3010_v5 = vpop.f32.mrf.mxu1 }
 0x20f   :  { %v2201_v42 = vpop.eup %2200  ;;  %v1444_v4 = vmax.f32 %v1401_v38, 0.0  ;;  %2214 = vpow2.f32 %v1658_v63 }
 0x210   :  { %v2203_v46 = vpop.eup %2202  ;;  %v1402_v48 = vmul.f32 %v2201_v42, %v1101_v43  ;;  %v1927_v11 = vpop.f32.mrf.mxu1 }
 0x211   :  { %1488 = vst.msk [vmem:[%s3132_s3 + $0xb8] sm:$0xff] %vm1464_vm7, %v1444_v4  ;;  %v1277_v49 = vadd.f32 1.0, %v2203_v46 }
 0x212   :  { %v1445_v50 = vmax.f32 %v1402_v48, 0.0  ;;  %v3017_v58 = vpop.f32.mrf.mxu1 }
 0x213   :  { %v2205_v54 = vpop.eup %2204  ;;  %2216 = vrcp.f32 %v1277_v49 }
 0x214   :  { %v2207_v55 = vpop.eup %2206  ;;  %1489 = vst.msk [vmem:[%s3132_s3 + $0xc0] sm:$0xff] %vm1464_vm7, %v1445_v50  ;;  %v1403_v47 = vmul.f32 %v2205_v54, %v1102_v53  ;;  %v1930_v59 = vpop.f32.mrf.mxu1 }
 0x215   :  { %v1278_v18 = vadd.f32 1.0, %v2207_v55 }
 0x216   :  { %v1446_v60 = vmax.f32 %v1403_v47, 0.0  ;;  %v3024_v24 = vpop.f32.mrf.mxu1 }
 0x217   :  { %v2209_v23 = vpop.eup %2208  ;;  %2218 = vrcp.f32 %v1278_v18 }
 0x218   :  { %v2211_v1 = vpop.eup %2210  ;;  %1490 = vst.msk [vmem:[%s3132_s3 + $0xc8] sm:$0xff] %vm1464_vm7, %v1446_v60  ;;  %v1404_v0 = vmul.f32 %v2209_v23, %v1103_v61  ;;  %v1933_v3 = vpop.f32.mrf.mxu1 }
 0x219   :  { %v1279_v2 = vadd.f32 1.0, %v2211_v1 }
 0x21a   :  { %v1447_v52 = vmax.f32 %v1404_v0, 0.0  ;;  %v3031_v8 = vpop.f32.mrf.mxu1 }
 0x21b   :  { %v2213_v7 = vpop.eup %2212  ;;  %2220 = vrcp.f32 %v1279_v2 }
 0x21c   :  { %v2215_v9 = vpop.eup %2214  ;;  %1491 = vst.msk [vmem:[%s3132_s3 + $0xd0] sm:$0xff] %vm1464_vm7, %v1447_v52  ;;  %v1405_v6 = vmul.f32 %v2213_v7, %v1104_v29  ;;  %v1936_v34 = vpop.f32.mrf.mxu1 }
 0x21d   :  { %v1280_v35 = vadd.f32 1.0, %v2215_v9 }
 0x21e   :  { %v1448_v12 = vmax.f32 %v1405_v6, 0.0  ;;  %v3038_v15 = vpop.f32.mrf.mxu1 }
 0x21f   :  { %2222 = vrcp.f32 %v1280_v35 }
 0x220   :  { %v2217_v16 = vpop.eup %2216  ;;  %1492 = vst.msk [vmem:[%s3132_s3 + $0xd8] sm:$0xff] %vm1464_vm7, %v1448_v12  ;;  %v1939_v39 = vpop.f32.mrf.mxu1 }
 0x221   :  { %v1406_v17 = vmul.f32 %v2217_v16, %v1105_v14 }
 0x222   :  { %v3045_v21 = vpop.f32.mrf.mxu1 }
 0x223   :  { %v1449_v19 = vmax.f32 %v1406_v17, 0.0  ;;  %v1109_v17 = vmax.f32 %v3010_v5, 0.0 }
 0x224   :  { %v2219_v45 = vpop.eup %2218  ;;  %v1942_v44 = vpop.f32.mrf.mxu1 }
 0x225   :  { %1493 = vst.msk [vmem:[%s3132_s3 + $0xe0] sm:$0xff] %vm1464_vm7, %v1449_v19  ;;  %v1407_v62 = vmul.f32 %v2219_v45, %v1106_v20 }
 0x226   :  { %v3052_v27 = vpop.f32.mrf.mxu1 }
 0x227   :  { %v1450_v25 = vmax.f32 %v1407_v62, 0.0 }
 0x228   :  { %v2221_v51 = vpop.eup %2220  ;;  %v1945_v28 = vpop.f32.mrf.mxu1 }
 0x229   :  { %1494 = vst.msk [vmem:[%s3132_s3 + $0xe8] sm:$0xff] %vm1464_vm7, %v1450_v25  ;;  %v1408_v10 = vmul.f32 %v2221_v51, %v1107_v26  ;;  %v1110_v26 = vmax.f32 %v3017_v58, 0.0 }
 0x22a   :  { %v3059_v32 = vpop.f32.mrf.mxu1 }
 0x22b   :  { %v1451_v30 = vmax.f32 %v1408_v10, 0.0 }
 0x22c   :  { %v2223_v57 = vpop.eup %2222  ;;  %v1948_v56 = vpop.f32.mrf.mxu1 }
 0x22d   :  { %1495 = vst.msk [vmem:[%s3132_s3 + $0xf0] sm:$0xff] %vm1464_vm7, %v1451_v30  ;;  %v1409_v22 = vmul.f32 %v2223_v57, %v1108_v31  ;;  %v1111_v56 = vmax.f32 %v3024_v24, 0.0 }
 0x22e   :  { %v3065_v37 = vpop.f32.mrf.mxu1 }
 0x22f   :  { %v1452_v36 = vmax.f32 %v1409_v22, 0.0 }
 0x230   :  { %v1951_v13 = vpop.f32.mrf.mxu1 }
 0x231   :  { %1496 = vst.msk [vmem:[%s3132_s3 + $0xf8] sm:$0xff] %vm1464_vm7, %v1452_v36 }
 0x232   :  { %v3071_v33 = vpop.f32.mrf.mxu1 }
 0x234   :  { %v1954_v63 = vpop.f32.mrf.mxu1 }
 0x236   :  { %v3073_v38 = vpop.f32.mrf.mxu1 }
 0x238   :  { %v1957_v40 = vpop.f32.mrf.mxu1 }
 0x23a   :  { %v1023_v41 = vpop.f32.mrf.mxu1 }
 0x23b   :  { %v1659_v43 = vmul.f32 -1.442695, %v1023_v41 }
 0x23c   :  { %v2058_v42 = vpop.f32.mrf.mxu1 }
 0x23d   :  { %2224 = vpow2.f32 %v1659_v43 }
 0x23e   :  { %v1028_v4 = vpop.f32.mrf.mxu1 }
 0x23f   :  { %v1660_v46 = vmul.f32 -1.442695, %v1028_v4  ;;  %v1112_v4 = vmax.f32 %v3031_v8, 0.0 }
 0x240   :  { %v2061_v48 = vpop.f32.mrf.mxu1 }
 0x241   :  { %2226 = vpow2.f32 %v1660_v46 }
 0x242   :  { %v1033_v49 = vpop.f32.mrf.mxu1 }
 0x243   :  { %v1661_v11 = vmul.f32 -1.442695, %v1033_v49 }
 0x244   :  { %v2064_v50 = vpop.f32.mrf.mxu1 }
 0x245   :  { %2228 = vpow2.f32 %v1661_v11 }
 0x246   :  { %v1038_v53 = vpop.f32.mrf.mxu1 }
 0x247   :  { %v1662_v54 = vmul.f32 -1.442695, %v1038_v53 }
 0x248   :  { %v2067_v55 = vpop.f32.mrf.mxu1 }
 0x249   :  { %2230 = vpow2.f32 %v1662_v54  ;;  %v1113_v54 = vmax.f32 %v3038_v15, 0.0 }
 0x24a   :  { %v2225_v47 = vpop.eup %2224  ;;  %v1043_v18 = vpop.f32.mrf.mxu1 }
 0x24b   :  { %v1281_v59 = vadd.f32 1.0, %v2225_v47  ;;  %v1663_v60 = vmul.f32 -1.442695, %v1043_v18 }
 0x24c   :  { %v2070_v61 = vpop.f32.mrf.mxu1 }
 0x24d   :  { %2232 = vrcp.f32 %v1281_v59  ;;  %v1114_v59 = vmax.f32 %v3045_v21, 0.0 }
 0x24e   :  { %v2227_v23 = vpop.eup %2226  ;;  %2234 = vpow2.f32 %v1663_v60  ;;  %v1048_v1 = vpop.f32.mrf.mxu1 }
 0x24f   :  { %v1282_v0 = vadd.f32 1.0, %v2227_v23  ;;  %v1664_v2 = vmul.f32 -1.442695, %v1048_v1 }
 0x250   :  { %v2073_v3 = vpop.f32.mrf.mxu1 }
 0x251   :  { %2236 = vrcp.f32 %v1282_v0  ;;  %v1115_v0 = vmax.f32 %v3052_v27, 0.0 }
 0x252   :  { %v2229_v52 = vpop.eup %2228  ;;  %2238 = vpow2.f32 %v1664_v2  ;;  %v1053_v29 = vpop.f32.mrf.mxu1 }
 0x253   :  { %v1283_v7 = vadd.f32 1.0, %v2229_v52  ;;  %v1665_v9 = vmul.f32 -1.442695, %v1053_v29  ;;  %v1116_v29 = vmax.f32 %v3059_v32, 0.0  ;;  %v1118_v32 = vmax.f32 %v3071_v33, 0.0 }
 0x254   :  { %v2076_v6 = vpop.f32.mrf.mxu1 }
 0x255   :  { %2240 = vrcp.f32 %v1283_v7  ;;  %v1117_v6 = vmax.f32 %v3065_v37, 0.0  ;;  %v1119_v37 = vmax.f32 %v3073_v38, 0.0 }
 0x256   :  { %v2231_v35 = vpop.eup %2230  ;;  %2242 = vpow2.f32 %v1665_v9  ;;  %v1058_v34 = vpop.f32.mrf.mxu1 }
 0x257   :  { %v1284_v12 = vadd.f32 1.0, %v2231_v35  ;;  %v1666_v14 = vmul.f32 -1.442695, %v1058_v34 }
 0x258   :  { %v2079_v16 = vpop.f32.mrf.mxu1 }
 0x259   :  { %2244 = vrcp.f32 %v1284_v12 }
 0x25a   :  { %v2233_v39 = vpop.eup %2232  ;;  %2246 = vpow2.f32 %v1666_v14  ;;  %v1063_v19 = vpop.f32.mrf.mxu1 }
 0x25b   :  { %v2235_v20 = vpop.eup %2234  ;;  %v1410_v45 = vmul.f32 %v2233_v39, %v1109_v17  ;;  %v1667_v62 = vmul.f32 -1.442695, %v1063_v19 }
 0x25c   :  { %v1285_v44 = vadd.f32 1.0, %v2235_v20  ;;  %v2082_v25 = vpop.f32.mrf.mxu1 }
 0x25d   :  { %v1453_v51 = vmax.f32 %v1410_v45, 0.0  ;;  %2248 = vpow2.f32 %v1667_v62 }
 0x25e   :  { %v2237_v10 = vpop.eup %2236  ;;  %2250 = vrcp.f32 %v1285_v44  ;;  %v1068_v28 = vpop.f32.mrf.mxu1 }
 0x25f   :  { %v2239_v30 = vpop.eup %2238  ;;  %1497 = vst.msk [vmem:[%s3132_s3 + $0x100] sm:$0xff] %vm1464_vm7, %v1453_v51  ;;  %v1411_v5 = vmul.f32 %v2237_v10, %v1110_v26  ;;  %v1668_v31 = vmul.f32 -1.442695, %v1068_v28 }
 0x260   :  { %v1286_v57 = vadd.f32 1.0, %v2239_v30  ;;  %v2085_v22 = vpop.f32.mrf.mxu1 }
 0x261   :  { %v1454_v36 = vmax.f32 %v1411_v5, 0.0  ;;  %2252 = vpow2.f32 %v1668_v31 }
 0x262   :  { %v2241_v58 = vpop.eup %2240  ;;  %2254 = vrcp.f32 %v1286_v57  ;;  %v1073_v13 = vpop.f32.mrf.mxu1 }
 0x263   :  { %v2243_v63 = vpop.eup %2242  ;;  %1498 = vst.msk [vmem:[%s3132_s3 + $0x108] sm:$0xff] %vm1464_vm7, %v1454_v36  ;;  %v1412_v40 = vmul.f32 %v2241_v58, %v1111_v56  ;;  %v1669_v41 = vmul.f32 -1.442695, %v1073_v13 }
 0x264   :  { %v1287_v43 = vadd.f32 1.0, %v2243_v63  ;;  %v2088_v42 = vpop.f32.mrf.mxu1 }
 0x265   :  { %v1455_v46 = vmax.f32 %v1412_v40, 0.0  ;;  %2256 = vpow2.f32 %v1669_v41 }
 0x266   :  { %v2245_v24 = vpop.eup %2244  ;;  %2258 = vrcp.f32 %v1287_v43 }
 0x267   :  { %v2247_v48 = vpop.eup %2246  ;;  %1499 = vst.msk [vmem:[%s3132_s3 + $0x110] sm:$0xff] %vm1464_vm7, %v1455_v46  ;;  %v1413_v49 = vmul.f32 %v2245_v24, %v1112_v4 }
 0x268   :  { %v1288_v11 = vadd.f32 1.0, %v2247_v48 }
 0x269   :  { %v1456_v50 = vmax.f32 %v1413_v49, 0.0 }
 0x26a   :  { %v2249_v53 = vpop.eup %2248  ;;  %2260 = vrcp.f32 %v1288_v11 }
 0x26b   :  { %v2251_v55 = vpop.eup %2250  ;;  %1500 = vst.msk [vmem:[%s3132_s3 + $0x118] sm:$0xff] %vm1464_vm7, %v1456_v50  ;;  %v1289_v8 = vadd.f32 1.0, %v2249_v53 }
 0x26c   :  { %v1414_v47 = vmul.f32 %v2251_v55, %v1113_v54 }
 0x26d   :  { %2262 = vrcp.f32 %v1289_v8 }
 0x26e   :  { %v2253_v18 = vpop.eup %2252  ;;  %v1457_v60 = vmax.f32 %v1414_v47, 0.0 }
 0x26f   :  { %v2255_v61 = vpop.eup %2254  ;;  %v1290_v23 = vadd.f32 1.0, %v2253_v18 }
 0x270   :  { %1501 = vst.msk [vmem:[%s3132_s3 + $0x120] sm:$0xff] %vm1464_vm7, %v1457_v60  ;;  %v1415_v15 = vmul.f32 %v2255_v61, %v1114_v59 }
 0x271   :  { %2264 = vrcp.f32 %v1290_v23 }
 0x272   :  { %v2257_v1 = vpop.eup %2256  ;;  %v1458_v2 = vmax.f32 %v1415_v15, 0.0 }
 0x273   :  { %v2259_v3 = vpop.eup %2258  ;;  %v1291_v52 = vadd.f32 1.0, %v2257_v1 }
 0x274   :  { %1502 = vst.msk [vmem:[%s3132_s3 + $0x128] sm:$0xff] %vm1464_vm7, %v1458_v2  ;;  %v1416_v21 = vmul.f32 %v2259_v3, %v1115_v0 }
 0x275   :  { %2266 = vrcp.f32 %v1291_v52 }
 0x276   :  { %v1459_v7 = vmax.f32 %v1416_v21, 0.0 }
 0x277   :  { %v2261_v9 = vpop.eup %2260 }
 0x278   :  { %1503 = vst.msk [vmem:[%s3132_s3 + $0x130] sm:$0xff] %vm1464_vm7, %v1459_v7  ;;  %v1417_v27 = vmul.f32 %v2261_v9, %v1116_v29 }
 0x27a   :  { %v2263_v35 = vpop.eup %2262  ;;  %v1460_v34 = vmax.f32 %v1417_v27, 0.0 }
 0x27b   :  { %v1418_v12 = vmul.f32 %v2263_v35, %v1117_v6 }
 0x27c   :  { %1504 = vst.msk [vmem:[%s3132_s3 + $0x138] sm:$0xff] %vm1464_vm7, %v1460_v34 }
 0x27d   :  { %v1461_v14 = vmax.f32 %v1418_v12, 0.0 }
 0x27e   :  { %v2265_v16 = vpop.eup %2264 }
 0x27f   :  { %1505 = vst.msk [vmem:[%s3132_s3 + $0x140] sm:$0xff] %vm1464_vm7, %v1461_v14  ;;  %v1419_v17 = vmul.f32 %v2265_v16, %v1118_v32 }
 0x281   :  { %v1462_v39 = vmax.f32 %v1419_v17, 0.0 }
 0x282   :  { %v2267_v19 = vpop.eup %2266 }
 0x283   :  { %1506 = vst.msk [vmem:[%s3132_s3 + $0x148] sm:$0xff] %vm1464_vm7, %v1462_v39  ;;  %v1420_v20 = vmul.f32 %v2267_v19, %v1119_v37 }
 0x285   :  { %v1463_v33 = vmax.f32 %v1420_v20, 0.0 }
 0x287   :  { %1508 = vst.msk [vmem:[%s3132_s3 + $0x150] sm:$0x3] %vm1507_vm8, %v1463_v33 }

// kernel: _lambda_.4
= control target key start
LH: loop header
LB: loop body
LE: loop exit
PB: predicated region body
PF: predicated region fallthrough
CT: control target
= control target key end

     0   :  { %vm151_vm0 = vcmask 1041408   ;;  %vm96_vm1 = vcmask 293888   ;;  %v332_v58 = vlaneseq  ;;  %v1811_v61 = vmov 0.0   ;;  %s2420_s1 = inlined_call_operand.vmem [shape: bf16[36,2], index: 1, kind: input, shape index: {}]   ;;  %s2421_s0 = inlined_call_operand.vmem [shape: f32[288,36], index: 0, kind: input, shape index: {}]   ;;  %s2422_s2 = inlined_call_operand.vmem [shape: f32[1,2], index: 2, kind: input, shape index: {}]   ;;  %s2423_s3 = inlined_call_operand.vmem [shape: f32[288,1], index: 3, kind: output, shape index: {}]  }
   0x1   :  { %v1664_v0 = vld [vmem:[%s2420_s1 + $0x10] ss:$0 sps:$4 sm:$0x33]   ;;  %v1665_v1 = vld [vmem:[%s2420_s1 + $0x8] sm:$0xff]   ;;  %v15_v3 = vld [vmem:[%s2421_s0] sm:$0xff]  ;;  %vm343_vm4 = vcmask 15360  }
   0x2   :  { %1662 = vmatprep.subr.msk.bf16.mxu0 %vm151_vm0, %v1664_v0  ;;  %v153_v2 = vsel %vm151_vm0, %v1664_v0, 0  ;;  %v16_v4 = vld [vmem:[%s2421_s0 + $0x8] sm:$0xff]  ;;  %v1666_v5 = vld [vmem:[%s2420_s1] sm:$0xff]   ;;  %v17_v7 = vld [vmem:[%s2421_s0 + $0x10] sm:$0xff]  ;;  %v333_v59 = vshrl.u32 %v332_v58, 7  ;;  %v335_v60 = vand.u32 127, %v332_v58 }
   0x3   :  { %1507 = vmatpush3.bf16.msra.mxu0 %v153_v2  ;;  %v51_v6 = vpack.c.bf16 %v16_v4, %v15_v3  ;;  %v18_v8 = vld [vmem:[%s2421_s0 + $0x18] sm:$0xff]  ;;  %v19_v9 = vld [vmem:[%s2421_s0 + $0x20] sm:$0xff]  ;;  %v20_v10 = vld [vmem:[%s2421_s0 + $0x28] sm:$0xff]  ;;  %vm1236_vm5 = vcmask 7168  }
   0x4   :  { %1508 = vmatprep.subr.bf16.mxu0 %v1665_v1  ;;  %v52_v11 = vpack.c.bf16 %v18_v8, %v17_v7  ;;  %v53_v12 = vpack.c.bf16 %v20_v10, %v19_v9  ;;  %v21_v13 = vld [vmem:[%s2421_s0 + $0x30] sm:$0xff]  ;;  %v22_v14 = vld [vmem:[%s2421_s0 + $0x38] sm:$0xff]  ;;  %v23_v15 = vld [vmem:[%s2421_s0 + $0x40] sm:$0xff]  ;;  %vm336_vm2 = vcmp.eq.s32.totalorder %v333_v59, %v335_v60  ;;  %v339_v63 = vadd.s32 1, %v335_v60 }
   0x5   :  { %1512 = vmatprep.mubr.msk.bf16.mxu0 %vm96_vm1, %v51_v6  ;;  %v24_v16 = vld [vmem:[%s2421_s0 + $0x48] sm:$0xff]  ;;  %v54_v17 = vpack.c.bf16 %v22_v14, %v21_v13  ;;  %v25_v19 = vld [vmem:[%s2421_s0 + $0x50] sm:$0xff]  ;;  %v26_v20 = vld [vmem:[%s2421_s0 + $0x58] sm:$0xff]  ;;  %v1299_v62 = vsel %vm336_vm2, 1.0, %v1811_v61 }
   0x6   :  { %v55_v18 = vpack.c.bf16 %v24_v16, %v23_v15  ;;  %v27_v21 = vld [vmem:[%s2421_s0 + $0x60] sm:$0xff]  ;;  %v28_v22 = vld [vmem:[%s2421_s0 + $0x68] sm:$0xff]  ;;  %v56_v23 = vpack.c.bf16 %v26_v20, %v25_v19  ;;  %v29_v25 = vld [vmem:[%s2421_s0 + $0x70] sm:$0xff]  ;;  %1660 = vmatprep.subr.msk.mxu1 %vm151_vm0, %v1299_v62  ;;  %vm340_vm3 = vcmp.eq.s32.totalorder %v333_v59, %v339_v63 }
   0x7   :  { %1509 = vmatpush3.bf16.msra.mxu0 %v1665_v1  ;;  %v57_v24 = vpack.c.bf16 %v28_v22, %v27_v21  ;;  %v30_v26 = vld [vmem:[%s2421_s0 + $0x78] sm:$0xff]  ;;  %v31_v27 = vld [vmem:[%s2421_s0 + $0x80] sm:$0xff]  ;;  %v32_v28 = vld [vmem:[%s2421_s0 + $0x88] sm:$0xff]  ;;  %1661 = vmatpush3.msk.msra.mxu1 %vm151_vm0, %v1299_v62  ;;  %v1300_v0 = vsel %vm340_vm3, 1.0, %v1811_v61 }
   0x8   :  { %1510 = vmatprep.subr.bf16.mxu0 %v1666_v5  ;;  %v58_v29 = vpack.c.bf16 %v30_v26, %v29_v25  ;;  %v59_v30 = vpack.c.bf16 %v32_v28, %v31_v27  ;;  %v33_v31 = vld [vmem:[%s2421_s0 + $0x90] sm:$0xff]  ;;  %v34_v32 = vld [vmem:[%s2421_s0 + $0x98] sm:$0xff]  ;;  %v35_v33 = vld [vmem:[%s2421_s0 + $0xa0] sm:$0xff]  ;;  %1604 = vmatprep.subr.msk.mxu1 %vm151_vm0, %v1300_v0 }
   0x9   :  { %v36_v34 = vld [vmem:[%s2421_s0 + $0xa8] sm:$0xff]  ;;  %v60_v35 = vpack.c.bf16 %v34_v32, %v33_v31  ;;  %v37_v37 = vld [vmem:[%s2421_s0 + $0xb0] sm:$0xff]  ;;  %v38_v38 = vld [vmem:[%s2421_s0 + $0xb8] sm:$0xff] }
   0xa   :  { %v61_v36 = vpack.c.bf16 %v36_v34, %v35_v33  ;;  %v39_v39 = vld [vmem:[%s2421_s0 + $0xc0] sm:$0xff]  ;;  %v40_v40 = vld [vmem:[%s2421_s0 + $0xc8] sm:$0xff]  ;;  %v62_v41 = vpack.c.bf16 %v38_v38, %v37_v37  ;;  %v41_v43 = vld [vmem:[%s2421_s0 + $0xd0] sm:$0xff] }
   0xb   :  { %1511 = vmatpush3.bf16.msra.mxu0 %v1666_v5  ;;  %v63_v42 = vpack.c.bf16 %v40_v40, %v39_v39  ;;  %v42_v44 = vld [vmem:[%s2421_s0 + $0xd8] sm:$0xff]  ;;  %v43_v45 = vld [vmem:[%s2421_s0 + $0xe0] sm:$0xff]  ;;  %v44_v46 = vld [vmem:[%s2421_s0 + $0xe8] sm:$0xff] }
   0xc   :  { %v64_v47 = vpack.c.bf16 %v42_v44, %v41_v43  ;;  %v65_v48 = vpack.c.bf16 %v44_v46, %v43_v45  ;;  %v45_v49 = vld [vmem:[%s2421_s0 + $0xf0] sm:$0xff]  ;;  %v46_v50 = vld [vmem:[%s2421_s0 + $0xf8] sm:$0xff]  ;;  %v47_v51 = vld [vmem:[%s2421_s0 + $0x100] sm:$0xff]  ;;  %1548 = vmatprep.subr.msk.mxu0 %vm151_vm0, %v1299_v62 }
   0xd   :  { %v48_v52 = vld [vmem:[%s2421_s0 + $0x108] sm:$0xff]  ;;  %v66_v53 = vpack.c.bf16 %v46_v50, %v45_v49  ;;  %v49_v55 = vld [vmem:[%s2421_s0 + $0x110] sm:$0xff]  ;;  %v50_v56 = vld [vmem:[%s2421_s0 + $0x118] sm:$0xff] }
   0xe   :  { %1513 = vmatmul.mubr.msk.bf16.vlgmr.msra.gmra.mxu0 %vm96_vm1, %v52_v11  ;;  %v67_v54 = vpack.c.bf16 %v48_v52, %v47_v51  ;;  %v68_v57 = vpack.c.bf16 %v50_v56, %v49_v55  ;;  %v1977_v2 = vld [vmem:[%s2422_s2] ss:$0 sm:$0xff] }
   0xf   :  { %1516 = vmatprep.mubr.msk.bf16.mxu0 %vm96_vm1, %v53_v12  ;;  %1549 = vmatpush3.msk.msra.mxu0 %vm151_vm0, %v1299_v62 }
  0x16   :  { %1517 = vmatmul.mubr.msk.bf16.gmra.mxu0 %vm96_vm1, %v54_v17 }
  0x17   :  { %1520 = vmatprep.mubr.msk.bf16.mxu0 %vm96_vm1, %v55_v18 }
  0x1e   :  { %1521 = vmatmul.mubr.msk.bf16.gmra.mxu0 %vm96_vm1, %v56_v23 }
  0x1f   :  { %1524 = vmatprep.mubr.msk.bf16.mxu0 %vm96_vm1, %v57_v24 }
  0x26   :  { %1525 = vmatmul.mubr.msk.bf16.gmra.mxu0 %vm96_vm1, %v58_v29 }
  0x27   :  { %1528 = vmatprep.mubr.msk.bf16.mxu0 %vm96_vm1, %v59_v30 }
  0x2e   :  { %1529 = vmatmul.mubr.msk.bf16.gmra.mxu0 %vm96_vm1, %v60_v35 }
  0x2f   :  { %1532 = vmatprep.mubr.msk.bf16.mxu0 %vm96_vm1, %v61_v36 }
  0x36   :  { %1533 = vmatmul.mubr.msk.bf16.gmra.mxu0 %vm96_vm1, %v62_v41 }
  0x37   :  { %1536 = vmatprep.mubr.msk.bf16.mxu0 %vm96_vm1, %v63_v42 }
  0x3e   :  { %1537 = vmatmul.mubr.msk.bf16.gmra.mxu0 %vm96_vm1, %v64_v47 }
  0x3f   :  { %1540 = vmatprep.mubr.msk.bf16.mxu0 %vm96_vm1, %v65_v48 }
  0x46   :  { %1541 = vmatmul.mubr.msk.bf16.gmra.mxu0 %vm96_vm1, %v66_v53 }
  0x47   :  { %1544 = vmatprep.mubr.msk.bf16.mxu0 %vm96_vm1, %v67_v54 }
  0x4e   :  { %1545 = vmatmul.mubr.msk.bf16.gmra.mxu0 %vm96_vm1, %v68_v57 }
  0xce   :  { %v1514_v1 = vpop.f32.mrf.mxu0 }
  0xcf   :  { %v1988_v8 = vadd.f32 %v1514_v1, %v1977_v2 }
  0xd0   :  { %v189_v3 = vpop.f32.mrf.mxu0 }
  0xd1   :  { %v1980_v4 = vadd.f32 %v1977_v2, %v189_v3 }
  0xd2   :  { %v1515_v5 = vpop.f32.mrf.mxu0 }
  0xd3   :  { %1550 = vmatprep.mubr.msk.f32.mxu0 %vm343_vm4, %v1980_v4  ;;  %v1995_v11 = vadd.f32 %v1515_v5, %v1977_v2 }
  0xd4   :  { %v192_v6 = vpop.f32.mrf.mxu0 }
  0xd5   :  { %v1985_v7 = vadd.f32 %v1977_v2, %v192_v6 }
  0xd6   :  { %v1518_v9 = vpop.f32.mrf.mxu0 }
  0xd7   :  { %1551 = vmatmul.mubr.msk.f32.vlgmr.msra.gmra.mxu0 %vm343_vm4, %v1985_v7  ;;  %v2008_v16 = vadd.f32 %v1518_v9, %v1977_v2 }
  0xd8   :  { %v205_v10 = vpop.f32.mrf.mxu0  ;;  %1553 = vmatprep.mubr.msk.f32.mxu0 %vm343_vm4, %v1988_v8 }
  0xd9   :  { %v1998_v12 = vadd.f32 %v1977_v2, %v205_v10 }
  0xda   :  { %v1519_v13 = vpop.f32.mrf.mxu0 }
  0xdb   :  { %1554 = vmatmul.mubr.msk.f32.gmra.mxu0 %vm343_vm4, %v1995_v11  ;;  %v2015_v19 = vadd.f32 %v1519_v13, %v1977_v2 }
  0xdc   :  { %v208_v14 = vpop.f32.mrf.mxu0  ;;  %1556 = vmatprep.mubr.msk.f32.mxu0 %vm343_vm4, %v1998_v12 }
  0xdd   :  { %v2005_v15 = vadd.f32 %v1977_v2, %v208_v14 }
  0xde   :  { %v1522_v17 = vpop.f32.mrf.mxu0 }
  0xdf   :  { %1557 = vmatmul.mubr.msk.f32.gmra.mxu0 %vm343_vm4, %v2005_v15  ;;  %v2028_v24 = vadd.f32 %v1522_v17, %v1977_v2 }
  0xe0   :  { %v221_v18 = vpop.f32.mrf.mxu0  ;;  %1559 = vmatprep.mubr.msk.f32.mxu0 %vm343_vm4, %v2008_v16 }
  0xe1   :  { %v2018_v20 = vadd.f32 %v1977_v2, %v221_v18 }
  0xe2   :  { %v1523_v21 = vpop.f32.mrf.mxu0 }
  0xe3   :  { %1560 = vmatmul.mubr.msk.f32.gmra.mxu0 %vm343_vm4, %v2015_v19  ;;  %v2038_v28 = vadd.f32 %v1523_v21, %v1977_v2 }
  0xe4   :  { %v224_v22 = vpop.f32.mrf.mxu0  ;;  %1562 = vmatprep.mubr.msk.f32.mxu0 %vm343_vm4, %v2018_v20 }
  0xe5   :  { %v2025_v23 = vadd.f32 %v1977_v2, %v224_v22 }
  0xe6   :  { %v1526_v25 = vpop.f32.mrf.mxu0 }
  0xe7   :  { %v2031_v26 = vadd.f32 %v1526_v25, %v1977_v2  ;;  %1563 = vmatmul.mubr.msk.f32.gmra.mxu0 %vm343_vm4, %v2025_v23 }
  0xe8   :  { %v237_v27 = vpop.f32.mrf.mxu0  ;;  %1565 = vmatprep.mubr.msk.f32.mxu0 %vm343_vm4, %v2028_v24 }
  0xe9   :  { %v2041_v29 = vadd.f32 %v1977_v2, %v237_v27  ;;  %1571 = vmatprep.mubr.msk.f32.mxu1 %vm343_vm4, %v2031_v26 }
  0xea   :  { %v1527_v30 = vpop.f32.mrf.mxu0 }
  0xeb   :  { %v2046_v31 = vadd.f32 %v1527_v30, %v1977_v2  ;;  %1566 = vmatmul.mubr.msk.f32.gmra.mxu0 %vm343_vm4, %v2038_v28 }
  0xec   :  { %v240_v32 = vpop.f32.mrf.mxu0  ;;  %1568 = vmatprep.mubr.msk.f32.mxu0 %vm343_vm4, %v2041_v29 }
  0xed   :  { %v2053_v33 = vadd.f32 %v1977_v2, %v240_v32  ;;  %1572 = vmatmul.mubr.msk.f32.vlgmr.msra.gmra.mxu1 %vm343_vm4, %v2046_v31 }
  0xee   :  { %v1530_v34 = vpop.f32.mrf.mxu0  ;;  %1605 = vmatpush3.msk.msra.mxu1 %vm151_vm0, %v1300_v0 }
  0xef   :  { %1569 = vmatmul.mubr.msk.f32.gmra.mxu0 %vm343_vm4, %v2053_v33  ;;  %v2069_v40 = vadd.f32 %v1530_v34, %v1977_v2 }
  0xf0   :  { %v253_v35 = vpop.f32.mrf.mxu0 }
  0xf1   :  { %v2061_v36 = vadd.f32 %v1977_v2, %v253_v35 }
  0xf2   :  { %v1531_v37 = vpop.f32.mrf.mxu0 }
  0xf3   :  { %1574 = vmatprep.mubr.msk.f32.mxu1 %vm343_vm4, %v2061_v36  ;;  %v2076_v43 = vadd.f32 %v1531_v37, %v1977_v2 }
  0xf4   :  { %v256_v38 = vpop.f32.mrf.mxu0 }
  0xf5   :  { %v2066_v39 = vadd.f32 %v1977_v2, %v256_v38 }
  0xf6   :  { %v1534_v41 = vpop.f32.mrf.mxu0 }
  0xf7   :  { %1575 = vmatmul.mubr.msk.f32.gmra.mxu1 %vm343_vm4, %v2066_v39  ;;  %v2089_v48 = vadd.f32 %v1534_v41, %v1977_v2 }
  0xf8   :  { %v269_v42 = vpop.f32.mrf.mxu0  ;;  %1577 = vmatprep.mubr.msk.f32.mxu1 %vm343_vm4, %v2069_v40 }
  0xf9   :  { %v2079_v44 = vadd.f32 %v1977_v2, %v269_v42 }
  0xfa   :  { %v1535_v45 = vpop.f32.mrf.mxu0 }
  0xfb   :  { %1578 = vmatmul.mubr.msk.f32.gmra.mxu1 %vm343_vm4, %v2076_v43  ;;  %v281_v51 = vadd.f32 %v1535_v45, %v1977_v2 }
  0xfc   :  { %v272_v46 = vpop.f32.mrf.mxu0  ;;  %1580 = vmatprep.mubr.msk.f32.mxu1 %vm343_vm4, %v2079_v44 }
  0xfd   :  { %v2086_v47 = vadd.f32 %v1977_v2, %v272_v46 }
  0xfe   :  { %v1538_v49 = vpop.f32.mrf.mxu0 }
  0xff   :  { %1581 = vmatmul.mubr.msk.f32.gmra.mxu1 %vm343_vm4, %v2086_v47  ;;  %v294_v56 = vadd.f32 %v1538_v49, %v1977_v2 }
 0x100   :  { %v285_v50 = vpop.f32.mrf.mxu0  ;;  %1583 = vmatprep.mubr.msk.f32.mxu1 %vm343_vm4, %v2089_v48 }
 0x101   :  { %v286_v52 = vadd.f32 %v1977_v2, %v285_v50 }
 0x102   :  { %v1539_v53 = vpop.f32.mrf.mxu0 }
 0x103   :  { %1584 = vmatmul.mubr.msk.f32.gmra.mxu1 %vm343_vm4, %v281_v51  ;;  %v297_v59 = vadd.f32 %v1539_v53, %v1977_v2 }
 0x104   :  { %v288_v54 = vpop.f32.mrf.mxu0  ;;  %1586 = vmatprep.mubr.msk.f32.mxu1 %vm343_vm4, %v286_v52 }
 0x105   :  { %v289_v55 = vadd.f32 %v1977_v2, %v288_v54 }
 0x106   :  { %v1542_v57 = vpop.f32.mrf.mxu0 }
 0x107   :  { %1587 = vmatmul.mubr.msk.f32.gmra.mxu1 %vm343_vm4, %v289_v55  ;;  %v310_v0 = vadd.f32 %v1542_v57, %v1977_v2 }
 0x108   :  { %v301_v58 = vpop.f32.mrf.mxu0  ;;  %1589 = vmatprep.mubr.msk.f32.mxu1 %vm343_vm4, %v294_v56 }
 0x109   :  { %v302_v60 = vadd.f32 %v1977_v2, %v301_v58 }
 0x10a   :  { %v1543_v61 = vpop.f32.mrf.mxu0 }
 0x10b   :  { %1590 = vmatmul.mubr.msk.f32.gmra.mxu1 %vm343_vm4, %v297_v59  ;;  %v313_v5 = vadd.f32 %v1543_v61, %v1977_v2 }
 0x10c   :  { %v304_v62 = vpop.f32.mrf.mxu0  ;;  %1592 = vmatprep.mubr.msk.f32.mxu1 %vm343_vm4, %v302_v60 }
 0x10d   :  { %v305_v63 = vadd.f32 %v1977_v2, %v304_v62 }
 0x10e   :  { %v1546_v1 = vpop.f32.mrf.mxu0 }
 0x10f   :  { %1593 = vmatmul.mubr.msk.f32.gmra.mxu1 %vm343_vm4, %v305_v63  ;;  %v326_v14 = vadd.f32 %v1546_v1, %v1977_v2 }
 0x110   :  { %v317_v3 = vpop.f32.mrf.mxu0  ;;  %1595 = vmatprep.mubr.msk.f32.mxu1 %vm343_vm4, %v310_v0 }
 0x111   :  { %v318_v6 = vadd.f32 %v1977_v2, %v317_v3 }
 0x112   :  { %v1547_v9 = vpop.f32.mrf.mxu0 }
 0x113   :  { %1596 = vmatmul.mubr.msk.f32.gmra.mxu1 %vm343_vm4, %v313_v5  ;;  %v329_v17 = vadd.f32 %v1547_v9, %v1977_v2 }
 0x114   :  { %v320_v10 = vpop.f32.mrf.mxu0  ;;  %1598 = vmatprep.mubr.msk.f32.mxu1 %vm343_vm4, %v318_v6 }
 0x115   :  { %v321_v13 = vadd.f32 %v1977_v2, %v320_v10 }
 0x117   :  { %1599 = vmatmul.mubr.msk.f32.gmra.mxu1 %vm343_vm4, %v321_v13 }
 0x118   :  { %1601 = vmatprep.mubr.msk.f32.mxu1 %vm343_vm4, %v326_v14 }
 0x11b   :  { %1602 = vmatmul.mubr.msk.f32.gmra.mxu1 %vm343_vm4, %v329_v17 }
 0x11c   :  { %1606 = vmatprep.mubr.msk.f32.mxu1 %vm343_vm4, %v1980_v4 }
 0x11f   :  { %1607 = vmatmul.mubr.msk.f32.vlgmr.msra.gmra.mxu1 %vm343_vm4, %v1985_v7 }
 0x120   :  { %1609 = vmatprep.mubr.msk.f32.mxu1 %vm343_vm4, %v1988_v8 }
 0x123   :  { %1610 = vmatmul.mubr.msk.f32.gmra.mxu1 %vm343_vm4, %v1995_v11 }
 0x124   :  { %1612 = vmatprep.mubr.msk.f32.mxu1 %vm343_vm4, %v1998_v12 }
 0x127   :  { %1613 = vmatmul.mubr.msk.f32.gmra.mxu1 %vm343_vm4, %v2005_v15 }
 0x128   :  { %1615 = vmatprep.mubr.msk.f32.mxu1 %vm343_vm4, %v2008_v16 }
 0x12b   :  { %1616 = vmatmul.mubr.msk.f32.gmra.mxu1 %vm343_vm4, %v2015_v19 }
 0x12c   :  { %1618 = vmatprep.mubr.msk.f32.mxu1 %vm343_vm4, %v2018_v20 }
 0x12f   :  { %1619 = vmatmul.mubr.msk.f32.gmra.mxu1 %vm343_vm4, %v2025_v23 }
 0x130   :  { %1621 = vmatprep.mubr.msk.f32.mxu1 %vm343_vm4, %v2028_v24 }
 0x133   :  { %1622 = vmatmul.mubr.msk.f32.gmra.mxu1 %vm343_vm4, %v2038_v28 }
 0x134   :  { %1624 = vmatprep.mubr.msk.f32.mxu1 %vm343_vm4, %v2041_v29 }
 0x137   :  { %1625 = vmatmul.mubr.msk.f32.gmra.mxu1 %vm343_vm4, %v2053_v33 }
 0x138   :  { %1627 = vmatprep.mubr.msk.f32.mxu1 %vm343_vm4, %v2031_v26 }
 0x13b   :  { %1628 = vmatmul.mubr.msk.f32.gmra.mxu1 %vm343_vm4, %v2046_v31 }
 0x13c   :  { %1630 = vmatprep.mubr.msk.f32.mxu1 %vm343_vm4, %v2061_v36 }
 0x13f   :  { %1631 = vmatmul.mubr.msk.f32.gmra.mxu1 %vm343_vm4, %v2066_v39 }
 0x140   :  { %1633 = vmatprep.mubr.msk.f32.mxu1 %vm343_vm4, %v2069_v40 }
 0x143   :  { %1634 = vmatmul.mubr.msk.f32.gmra.mxu1 %vm343_vm4, %v2076_v43 }
 0x144   :  { %1636 = vmatprep.mubr.msk.f32.mxu1 %vm343_vm4, %v2079_v44 }
 0x147   :  { %1637 = vmatmul.mubr.msk.f32.gmra.mxu1 %vm343_vm4, %v2086_v47 }
 0x148   :  { %1639 = vmatprep.mubr.msk.f32.mxu1 %vm343_vm4, %v2089_v48 }
 0x14b   :  { %1640 = vmatmul.mubr.msk.f32.gmra.mxu1 %vm343_vm4, %v281_v51 }
 0x14c   :  { %1642 = vmatprep.mubr.msk.f32.mxu1 %vm343_vm4, %v286_v52 }
 0x14f   :  { %1643 = vmatmul.mubr.msk.f32.gmra.mxu1 %vm343_vm4, %v289_v55 }
 0x150   :  { %1645 = vmatprep.mubr.msk.f32.mxu1 %vm343_vm4, %v294_v56 }
 0x153   :  { %1646 = vmatmul.mubr.msk.f32.gmra.mxu1 %vm343_vm4, %v297_v59 }
 0x154   :  { %1648 = vmatprep.mubr.msk.f32.mxu1 %vm343_vm4, %v302_v60 }
 0x157   :  { %1649 = vmatmul.mubr.msk.f32.gmra.mxu1 %vm343_vm4, %v305_v63 }
 0x158   :  { %1651 = vmatprep.mubr.msk.f32.mxu1 %vm343_vm4, %v310_v0 }
 0x15b   :  { %1652 = vmatmul.mubr.msk.f32.gmra.mxu1 %vm343_vm4, %v313_v5 }
 0x15c   :  { %1654 = vmatprep.mubr.msk.f32.mxu1 %vm343_vm4, %v318_v6 }
 0x15f   :  { %1655 = vmatmul.mubr.msk.f32.gmra.mxu1 %vm343_vm4, %v321_v13 }
 0x160   :  { %1657 = vmatprep.mubr.msk.f32.mxu1 %vm343_vm4, %v326_v14 }
 0x163   :  { %1658 = vmatmul.mubr.msk.f32.gmra.mxu1 %vm343_vm4, %v329_v17 }
 0x197   :  { %v2224_v35 = vpop.f32.mrf.mxu0 }
 0x199   :  { %v2226_v40 = vpop.f32.mrf.mxu0 }
 0x19b   :  { %v2228_v45 = vpop.f32.mrf.mxu0 }
 0x19d   :  { %v2230_v50 = vpop.f32.mrf.mxu0 }
 0x19f   :  { %v2232_v58 = vpop.f32.mrf.mxu0 }
 0x1a1   :  { %v2234_v5 = vpop.f32.mrf.mxu0 }
 0x1ad   :  { %v2180_v2 = vpop.f32.mrf.mxu1 }
 0x1af   :  { %v2182_v4 = vpop.f32.mrf.mxu1 }
 0x1b7   :  { %v2184_v7 = vpop.f32.mrf.mxu1 }
 0x1b9   :  { %v2186_v8 = vpop.f32.mrf.mxu1 }
 0x1bb   :  { %v2188_v11 = vpop.f32.mrf.mxu1 }
 0x1bd   :  { %v2190_v12 = vpop.f32.mrf.mxu1 }
 0x1bf   :  { %v2192_v15 = vpop.f32.mrf.mxu1 }
 0x1c1   :  { %v2194_v16 = vpop.f32.mrf.mxu1 }
 0x1c3   :  { %v2196_v18 = vpop.f32.mrf.mxu1 }
 0x1c5   :  { %v2198_v19 = vpop.f32.mrf.mxu1 }
 0x1c7   :  { %v2200_v20 = vpop.f32.mrf.mxu1 }
 0x1c9   :  { %v2202_v21 = vpop.f32.mrf.mxu1 }
 0x1cb   :  { %v2204_v22 = vpop.f32.mrf.mxu1 }
 0x1cd   :  { %v2206_v23 = vpop.f32.mrf.mxu1 }
 0x1cf   :  { %v2208_v24 = vpop.f32.mrf.mxu1 }
 0x1d1   :  { %v2210_v25 = vpop.f32.mrf.mxu1 }
 0x1d3   :  { %v2212_v26 = vpop.f32.mrf.mxu1 }
 0x1d5   :  { %v2214_v27 = vpop.f32.mrf.mxu1 }
 0x1d7   :  { %v2216_v28 = vpop.f32.mrf.mxu1 }
 0x1d9   :  { %v2218_v29 = vpop.f32.mrf.mxu1 }
 0x1db   :  { %v2220_v30 = vpop.f32.mrf.mxu1 }
 0x1dd   :  { %v2222_v31 = vpop.f32.mrf.mxu1 }
 0x1df   :  { %v1608_v32 = vpop.f32.mrf.mxu1 }
 0x1e0   :  { %v1376_v33 = vmul.f32 -1.442695, %v1608_v32 }
 0x1e1   :  { %v769_v34 = vpop.f32.mrf.mxu1 }
 0x1e2   :  { %1667 = vpow2.f32 %v1376_v33  ;;  %v1375_v36 = vmul.f32 -1.442695, %v769_v34  ;;  %v2236_v34 = vpop.f32.mrf.mxu0 }
 0x1e3   :  { %v1611_v37 = vpop.f32.mrf.mxu1 }
 0x1e4   :  { %1669 = vpow2.f32 %v1375_v36  ;;  %v1378_v38 = vmul.f32 -1.442695, %v1611_v37 }
 0x1e5   :  { %v779_v39 = vpop.f32.mrf.mxu1 }
 0x1e6   :  { %1671 = vpow2.f32 %v1378_v38  ;;  %v1377_v41 = vmul.f32 -1.442695, %v779_v39 }
 0x1e7   :  { %v1614_v42 = vpop.f32.mrf.mxu1 }
 0x1e8   :  { %1673 = vpow2.f32 %v1377_v41  ;;  %v1380_v43 = vmul.f32 -1.442695, %v1614_v42 }
 0x1e9   :  { %v789_v44 = vpop.f32.mrf.mxu1 }
 0x1ea   :  { %1675 = vpow2.f32 %v1380_v43  ;;  %v1379_v46 = vmul.f32 -1.442695, %v789_v44 }
 0x1eb   :  { %v1617_v47 = vpop.f32.mrf.mxu1 }
 0x1ec   :  { %1677 = vpow2.f32 %v1379_v46  ;;  %v1382_v48 = vmul.f32 -1.442695, %v1617_v47  ;;  %v949_v46 = vmax.f32 %v2224_v35, 0.0  ;;  %v2239_v47 = vpop.f32.mrf.mxu0 }
 0x1ed   :  { %v799_v49 = vpop.f32.mrf.mxu1 }
 0x1ee   :  { %1679 = vpow2.f32 %v1382_v48  ;;  %v1381_v51 = vmul.f32 -1.442695, %v799_v49 }
 0x1ef   :  { %v1668_v52 = vpop.eup %1667  ;;  %v1620_v53 = vpop.f32.mrf.mxu1 }
 0x1f0   :  { %v1093_v54 = vadd.f32 1.0, %v1668_v52  ;;  %1681 = vpow2.f32 %v1381_v51  ;;  %v1384_v55 = vmul.f32 -1.442695, %v1620_v53 }
 0x1f1   :  { %v1670_v56 = vpop.eup %1669  ;;  %v809_v57 = vpop.f32.mrf.mxu1 }
 0x1f2   :  { %1683 = vrcp.f32 %v1093_v54  ;;  %v1092_v59 = vadd.f32 1.0, %v1670_v56  ;;  %v1383_v60 = vmul.f32 -1.442695, %v809_v57  ;;  %v948_v54 = vmax.f32 %v2226_v40, 0.0 }
 0x1f3   :  { %v1672_v61 = vpop.eup %1671  ;;  %1685 = vpow2.f32 %v1384_v55  ;;  %v1623_v62 = vpop.f32.mrf.mxu1 }
 0x1f4   :  { %1687 = vrcp.f32 %v1092_v59  ;;  %v1095_v63 = vadd.f32 1.0, %v1672_v61  ;;  %v1386_v0 = vmul.f32 -1.442695, %v1623_v62  ;;  %v951_v61 = vmax.f32 %v2228_v45, 0.0  ;;  %v2243_v62 = vpop.f32.mrf.mxu0 }
 0x1f5   :  { %v1674_v1 = vpop.eup %1673  ;;  %1689 = vpow2.f32 %v1383_v60  ;;  %v819_v3 = vpop.f32.mrf.mxu1 }
 0x1f6   :  { %1691 = vrcp.f32 %v1095_v63  ;;  %v1094_v6 = vadd.f32 1.0, %v1674_v1  ;;  %v1385_v9 = vmul.f32 -1.442695, %v819_v3 }
 0x1f7   :  { %v1676_v10 = vpop.eup %1675  ;;  %1693 = vpow2.f32 %v1386_v0  ;;  %v1626_v13 = vpop.f32.mrf.mxu1 }
 0x1f8   :  { %1695 = vrcp.f32 %v1094_v6  ;;  %v1097_v14 = vadd.f32 1.0, %v1676_v10  ;;  %v1388_v17 = vmul.f32 -1.442695, %v1626_v13 }
 0x1f9   :  { %v1678_v32 = vpop.eup %1677  ;;  %1697 = vpow2.f32 %v1385_v9  ;;  %v829_v33 = vpop.f32.mrf.mxu1  ;;  %v950_v9 = vmax.f32 %v2230_v50, 0.0 }
 0x1fa   :  { %1699 = vrcp.f32 %v1097_v14  ;;  %v1096_v36 = vadd.f32 1.0, %v1678_v32  ;;  %v1387_v37 = vmul.f32 -1.442695, %v829_v33  ;;  %v953_v33 = vmax.f32 %v2232_v58, 0.0 }
 0x1fb   :  { %v1680_v38 = vpop.eup %1679  ;;  %1701 = vpow2.f32 %v1388_v17  ;;  %v1629_v39 = vpop.f32.mrf.mxu1 }
 0x1fc   :  { %1703 = vrcp.f32 %v1096_v36  ;;  %v1099_v41 = vadd.f32 1.0, %v1680_v38  ;;  %v1390_v42 = vmul.f32 -1.442695, %v1629_v39  ;;  %v2255_v36 = vpop.f32.mrf.mxu0 }
 0x1fd   :  { %v1682_v43 = vpop.eup %1681  ;;  %1705 = vpow2.f32 %v1387_v37  ;;  %v839_v44 = vpop.f32.mrf.mxu1 }
 0x1fe   :  { %1707 = vrcp.f32 %v1099_v41  ;;  %v1098_v48 = vadd.f32 1.0, %v1682_v43  ;;  %v1389_v49 = vmul.f32 -1.442695, %v839_v44  ;;  %v952_v43 = vmax.f32 %v2234_v5, 0.0 }
 0x1ff   :  { %v1684_v51 = vpop.eup %1683  ;;  %1709 = vpow2.f32 %v1390_v42  ;;  %v1632_v52 = vpop.f32.mrf.mxu1 }
 0x200   :  { %v1686_v53 = vpop.eup %1685  ;;  %v1201_v55 = vmul.f32 %v1684_v51, %v949_v46  ;;  %1711 = vrcp.f32 %v1098_v48  ;;  %v1392_v56 = vmul.f32 -1.442695, %v1632_v52  ;;  %v955_v52 = vmax.f32 %v2236_v34, 0.0 }
 0x201   :  { %v1688_v57 = vpop.eup %1687  ;;  %v1101_v59 = vadd.f32 1.0, %v1686_v53  ;;  %1713 = vpow2.f32 %v1389_v49  ;;  %v849_v60 = vpop.f32.mrf.mxu1 }
 0x202   :  { %v1690_v35 = vpop.eup %1689  ;;  %1238 = vst.msk [vmem:[%s2423_s3 + $0x8] sm:$0xff] %vm1236_vm5, %v1201_v55  ;;  %v1200_v63 = vmul.f32 %v1688_v57, %v948_v54  ;;  %1715 = vpow2.f32 %v1392_v56  ;;  %v1391_v40 = vmul.f32 -1.442695, %v849_v60  ;;  %v1567_v53 = vpop.f32.mrf.mxu0  ;;  %v954_v60 = vmax.f32 %v2239_v47, 0.0 }
 0x203   :  { %v1692_v0 = vpop.eup %1691  ;;  %1717 = vrcp.f32 %v1101_v59  ;;  %v1100_v1 = vadd.f32 1.0, %v1690_v35  ;;  %v1635_v3 = vpop.f32.mrf.mxu1 }
 0x204   :  { %v1694_v6 = vpop.eup %1693  ;;  %1237 = vst.msk [vmem:[%s2423_s3] sm:$0xff] %vm1236_vm5, %v1200_v63  ;;  %v1203_v45 = vmul.f32 %v1692_v0, %v951_v61  ;;  %1719 = vpow2.f32 %v1391_v40  ;;  %v1394_v10 = vmul.f32 -1.442695, %v1635_v3 }
 0x205   :  { %v1696_v13 = vpop.eup %1695  ;;  %1721 = vrcp.f32 %v1100_v1  ;;  %v1103_v14 = vadd.f32 1.0, %v1694_v6  ;;  %v859_v17 = vpop.f32.mrf.mxu1 }
 0x206   :  { %v1698_v32 = vpop.eup %1697  ;;  %1240 = vst.msk [vmem:[%s2423_s3 + $0x18] sm:$0xff] %vm1236_vm5, %v1203_v45  ;;  %v1202_v50 = vmul.f32 %v1696_v13, %v950_v9  ;;  %1723 = vpow2.f32 %v1394_v10  ;;  %v1393_v37 = vmul.f32 -1.442695, %v859_v17  ;;  %v571_v1 = vpop.f32.mrf.mxu0  ;;  %v957_v9 = vmax.f32 %v2243_v62, 0.0 }
 0x207   :  { %v1700_v38 = vpop.eup %1699  ;;  %1725 = vrcp.f32 %v1103_v14  ;;  %v1102_v39 = vadd.f32 1.0, %v1698_v32  ;;  %v1638_v41 = vpop.f32.mrf.mxu1 }
 0x208   :  { %v1702_v42 = vpop.eup %1701  ;;  %1239 = vst.msk [vmem:[%s2423_s3 + $0x10] sm:$0xff] %vm1236_vm5, %v1202_v50  ;;  %v1205_v58 = vmul.f32 %v1700_v38, %v953_v33  ;;  %1727 = vpow2.f32 %v1393_v37  ;;  %v1396_v44 = vmul.f32 -1.442695, %v1638_v41  ;;  %v956_v33 = vmax.f32 %v2255_v36, 0.0  ;;  %v1570_v62 = vpop.f32.mrf.mxu0 }
 0x209   :  { %v1704_v46 = vpop.eup %1703  ;;  %1729 = vrcp.f32 %v1102_v39  ;;  %v1105_v48 = vadd.f32 1.0, %v1702_v42  ;;  %v869_v49 = vpop.f32.mrf.mxu1 }
 0x20a   :  { %v1706_v51 = vpop.eup %1705  ;;  %1242 = vst.msk [vmem:[%s2423_s3 + $0x28] sm:$0xff] %vm1236_vm5, %v1205_v58  ;;  %v1204_v5 = vmul.f32 %v1704_v46, %v952_v43  ;;  %1731 = vpow2.f32 %v1396_v44  ;;  %v1395_v54 = vmul.f32 -1.442695, %v869_v49  ;;  %v959_v43 = vmax.f32 %v1567_v53, 0.0 }
 0x20b   :  { %v1708_v55 = vpop.eup %1707  ;;  %1733 = vrcp.f32 %v1105_v48  ;;  %v1104_v56 = vadd.f32 1.0, %v1706_v51  ;;  %v1641_v57 = vpop.f32.mrf.mxu1  ;;  %v958_v51 = vmax.f32 %v571_v1, 0.0 }
 0x20c   :  { %v1710_v59 = vpop.eup %1709  ;;  %1241 = vst.msk [vmem:[%s2423_s3 + $0x20] sm:$0xff] %vm1236_vm5, %v1204_v5  ;;  %v1207_v34 = vmul.f32 %v1708_v55, %v955_v52  ;;  %1735 = vpow2.f32 %v1395_v54  ;;  %v1398_v35 = vmul.f32 -1.442695, %v1641_v57  ;;  %v581_v54 = vpop.f32.mrf.mxu0 }
 0x20d   :  { %v1712_v61 = vpop.eup %1711  ;;  %1737 = vrcp.f32 %v1104_v56  ;;  %v1107_v63 = vadd.f32 1.0, %v1710_v59  ;;  %v879_v40 = vpop.f32.mrf.mxu1  ;;  %v961_v59 = vmax.f32 %v1570_v62, 0.0 }
 0x20e   :  { %v1714_v0 = vpop.eup %1713  ;;  %1244 = vst.msk [vmem:[%s2423_s3 + $0x38] sm:$0xff] %vm1236_vm5, %v1207_v34  ;;  %v1206_v47 = vmul.f32 %v1712_v61, %v954_v60  ;;  %1739 = vpow2.f32 %v1398_v35  ;;  %v1397_v3 = vmul.f32 -1.442695, %v879_v40 }
 0x20f   :  { %v1716_v6 = vpop.eup %1715  ;;  %1741 = vrcp.f32 %v1107_v63  ;;  %v1106_v45 = vadd.f32 1.0, %v1714_v0  ;;  %v1644_v10 = vpop.f32.mrf.mxu1  ;;  %v960_v0 = vmax.f32 %v581_v54, 0.0 }
 0x210   :  { %v1718_v13 = vpop.eup %1717  ;;  %1243 = vst.msk [vmem:[%s2423_s3 + $0x30] sm:$0xff] %vm1236_vm5, %v1206_v47  ;;  %v1109_v14 = vadd.f32 1.0, %v1716_v6  ;;  %1743 = vpow2.f32 %v1397_v3  ;;  %v1400_v17 = vmul.f32 -1.442695, %v1644_v10  ;;  %v963_v10 = vmax.f32 %v2180_v2, 0.0 }
 0x211   :  { %v1720_v32 = vpop.eup %1719  ;;  %v1209_v50 = vmul.f32 %v1718_v13, %v957_v9  ;;  %1745 = vrcp.f32 %v1106_v45  ;;  %v889_v37 = vpop.f32.mrf.mxu1 }
 0x212   :  { %v1722_v38 = vpop.eup %1721  ;;  %1747 = vrcp.f32 %v1109_v14  ;;  %v1108_v39 = vadd.f32 1.0, %v1720_v32  ;;  %v1399_v41 = vmul.f32 -1.442695, %v889_v37  ;;  %v962_v37 = vmax.f32 %v2182_v4, 0.0 }
 0x213   :  { %v1724_v42 = vpop.eup %1723  ;;  %1246 = vst.msk [vmem:[%s2423_s3 + $0x48] sm:$0xff] %vm1236_vm5, %v1209_v50  ;;  %v1208_v58 = vmul.f32 %v1722_v38, %v956_v33  ;;  %1749 = vpow2.f32 %v1400_v17  ;;  %v1647_v44 = vpop.f32.mrf.mxu1 }
 0x214   :  { %v1726_v46 = vpop.eup %1725  ;;  %1751 = vrcp.f32 %v1108_v39  ;;  %v1111_v36 = vadd.f32 1.0, %v1724_v42  ;;  %v1402_v48 = vmul.f32 -1.442695, %v1647_v44  ;;  %v965_v39 = vmax.f32 %v2184_v7, 0.0 }
 0x215   :  { %v1728_v49 = vpop.eup %1727  ;;  %1245 = vst.msk [vmem:[%s2423_s3 + $0x40] sm:$0xff] %vm1236_vm5, %v1208_v58  ;;  %v1211_v52 = vmul.f32 %v1726_v46, %v959_v43  ;;  %1753 = vpow2.f32 %v1399_v41  ;;  %v899_v53 = vpop.f32.mrf.mxu1  ;;  %v964_v46 = vmax.f32 %v2186_v8, 0.0 }
 0x216   :  { %v1730_v5 = vpop.eup %1729  ;;  %1755 = vrcp.f32 %v1111_v36  ;;  %v1110_v55 = vadd.f32 1.0, %v1728_v49  ;;  %v1401_v56 = vmul.f32 -1.442695, %v899_v53  ;;  %v967_v53 = vmax.f32 %v2188_v11, 0.0 }
 0x217   :  { %v1732_v57 = vpop.eup %1731  ;;  %1248 = vst.msk [vmem:[%s2423_s3 + $0x58] sm:$0xff] %vm1236_vm5, %v1211_v52  ;;  %v1210_v60 = vmul.f32 %v1730_v5, %v958_v51  ;;  %1757 = vpow2.f32 %v1402_v48  ;;  %v1650_v34 = vpop.f32.mrf.mxu1 }
 0x218   :  { %v1734_v35 = vpop.eup %1733  ;;  %1759 = vrcp.f32 %v1110_v55  ;;  %v1113_v61 = vadd.f32 1.0, %v1732_v57  ;;  %v1404_v63 = vmul.f32 -1.442695, %v1650_v34 }
 0x219   :  { %v1736_v40 = vpop.eup %1735  ;;  %1247 = vst.msk [vmem:[%s2423_s3 + $0x50] sm:$0xff] %vm1236_vm5, %v1210_v60  ;;  %v1213_v1 = vmul.f32 %v1734_v35, %v961_v59  ;;  %1761 = vpow2.f32 %v1401_v56  ;;  %v909_v47 = vpop.f32.mrf.mxu1  ;;  %v966_v59 = vmax.f32 %v2190_v12, 0.0 }
 0x21a   :  { %v1738_v3 = vpop.eup %1737  ;;  %1763 = vrcp.f32 %v1113_v61  ;;  %v1112_v6 = vadd.f32 1.0, %v1736_v40  ;;  %v1403_v9 = vmul.f32 -1.442695, %v909_v47  ;;  %v969_v40 = vmax.f32 %v2192_v15, 0.0 }
 0x21b   :  { %v1740_v45 = vpop.eup %1739  ;;  %1250 = vst.msk [vmem:[%s2423_s3 + $0x68] sm:$0xff] %vm1236_vm5, %v1213_v1  ;;  %v1212_v13 = vmul.f32 %v1738_v3, %v960_v0  ;;  %1765 = vpow2.f32 %v1404_v63  ;;  %v1653_v14 = vpop.f32.mrf.mxu1 }
 0x21c   :  { %v1742_v17 = vpop.eup %1741  ;;  %1767 = vrcp.f32 %v1112_v6  ;;  %v1115_v32 = vadd.f32 1.0, %v1740_v45  ;;  %v1406_v33 = vmul.f32 -1.442695, %v1653_v14  ;;  %v968_v6 = vmax.f32 %v2194_v16, 0.0 }
 0x21d   :  { %v1744_v50 = vpop.eup %1743  ;;  %1249 = vst.msk [vmem:[%s2423_s3 + $0x60] sm:$0xff] %vm1236_vm5, %v1212_v13  ;;  %v1215_v2 = vmul.f32 %v1742_v17, %v963_v10  ;;  %1769 = vpow2.f32 %v1403_v9  ;;  %v919_v38 = vpop.f32.mrf.mxu1  ;;  %v971_v13 = vmax.f32 %v2196_v18, 0.0 }
 0x21e   :  { %v1746_v62 = vpop.eup %1745  ;;  %1771 = vrcp.f32 %v1115_v32  ;;  %v1114_v41 = vadd.f32 1.0, %v1744_v50  ;;  %v1405_v42 = vmul.f32 -1.442695, %v919_v38 }
 0x21f   :  { %v1748_v43 = vpop.eup %1747  ;;  %1252 = vst.msk [vmem:[%s2423_s3 + $0x78] sm:$0xff] %vm1236_vm5, %v1215_v2  ;;  %v1214_v4 = vmul.f32 %v1746_v62, %v962_v37  ;;  %1773 = vpow2.f32 %v1406_v33  ;;  %v1656_v58 = vpop.f32.mrf.mxu1  ;;  %v970_v33 = vmax.f32 %v2198_v19, 0.0 }
 0x220   :  { %v1750_v44 = vpop.eup %1749  ;;  %v1217_v36 = vmul.f32 %v1748_v43, %v965_v39  ;;  %1775 = vrcp.f32 %v1114_v41  ;;  %v1408_v48 = vmul.f32 -1.442695, %v1656_v58  ;;  %v973_v39 = vmax.f32 %v2200_v20, 0.0 }
 0x221   :  { %v1752_v49 = vpop.eup %1751  ;;  %1251 = vst.msk [vmem:[%s2423_s3 + $0x70] sm:$0xff] %vm1236_vm5, %v1214_v4  ;;  %v1117_v7 = vadd.f32 1.0, %v1750_v44  ;;  %1777 = vpow2.f32 %v1405_v42  ;;  %v929_v51 = vpop.f32.mrf.mxu1  ;;  %v972_v4 = vmax.f32 %v2202_v21, 0.0  ;;  %v975_v20 = vmax.f32 %v2204_v22, 0.0 }
 0x222   :  { %v1754_v52 = vpop.eup %1753  ;;  %1254 = vst.msk [vmem:[%s2423_s3 + $0x88] sm:$0xff] %vm1236_vm5, %v1217_v36  ;;  %v1216_v8 = vmul.f32 %v1752_v49, %v964_v46  ;;  %1779 = vpow2.f32 %v1408_v48  ;;  %v1407_v5 = vmul.f32 -1.442695, %v929_v51  ;;  %v974_v21 = vmax.f32 %v2206_v23, 0.0 }
 0x223   :  { %v1756_v54 = vpop.eup %1755  ;;  %1781 = vrcp.f32 %v1117_v7  ;;  %v1116_v55 = vadd.f32 1.0, %v1754_v52  ;;  %v1659_v56 = vpop.f32.mrf.mxu1  ;;  %v976_v23 = vmax.f32 %v2210_v25, 0.0 }
 0x224   :  { %v1758_v57 = vpop.eup %1757  ;;  %1253 = vst.msk [vmem:[%s2423_s3 + $0x80] sm:$0xff] %vm1236_vm5, %v1216_v8  ;;  %v1219_v11 = vmul.f32 %v1756_v54, %v967_v53  ;;  %1783 = vpow2.f32 %v1407_v5  ;;  %v1410_v60 = vmul.f32 -1.442695, %v1659_v56  ;;  %v977_v8 = vmax.f32 %v2208_v24, 0.0 }
 0x225   :  { %v1760_v34 = vpop.eup %1759  ;;  %1785 = vrcp.f32 %v1116_v55  ;;  %v1119_v35 = vadd.f32 1.0, %v1758_v57  ;;  %v939_v61 = vpop.f32.mrf.mxu1  ;;  %v979_v57 = vmax.f32 %v2212_v26, 0.0 }
 0x226   :  { %v1762_v63 = vpop.eup %1761  ;;  %1256 = vst.msk [vmem:[%s2423_s3 + $0x98] sm:$0xff] %vm1236_vm5, %v1219_v11  ;;  %v1218_v12 = vmul.f32 %v1760_v34, %v966_v59  ;;  %1787 = vpow2.f32 %v1410_v60  ;;  %v1409_v0 = vmul.f32 -1.442695, %v939_v61  ;;  %v978_v11 = vmax.f32 %v2214_v27, 0.0 }
 0x227   :  { %v1764_v1 = vpop.eup %1763  ;;  %1789 = vrcp.f32 %v1119_v35  ;;  %v1118_v47 = vadd.f32 1.0, %v1762_v63  ;;  %v981_v34 = vmax.f32 %v2216_v28, 0.0  ;;  %v980_v61 = vmax.f32 %v2218_v29, 0.0 }
 0x228   :  { %v1766_v3 = vpop.eup %1765  ;;  %1255 = vst.msk [vmem:[%s2423_s3 + $0x90] sm:$0xff] %vm1236_vm5, %v1218_v12  ;;  %v1221_v15 = vmul.f32 %v1764_v1, %v969_v40  ;;  %1791 = vpow2.f32 %v1409_v0  ;;  %v983_v40 = vmax.f32 %v2220_v30, 0.0  ;;  %v982_v0 = vmax.f32 %v2222_v31, 0.0 }
 0x229   :  { %v1768_v9 = vpop.eup %1767  ;;  %1793 = vrcp.f32 %v1118_v47  ;;  %v1121_v45 = vadd.f32 1.0, %v1766_v3 }
 0x22a   :  { %v1770_v10 = vpop.eup %1769  ;;  %1258 = vst.msk [vmem:[%s2423_s3 + $0xa8] sm:$0xff] %vm1236_vm5, %v1221_v15  ;;  %v1220_v14 = vmul.f32 %v1768_v9, %v968_v6 }
 0x22b   :  { %v1772_v16 = vpop.eup %1771  ;;  %1795 = vrcp.f32 %v1121_v45  ;;  %v1120_v17 = vadd.f32 1.0, %v1770_v10 }
 0x22c   :  { %v1774_v32 = vpop.eup %1773  ;;  %1257 = vst.msk [vmem:[%s2423_s3 + $0xa0] sm:$0xff] %vm1236_vm5, %v1220_v14  ;;  %v1223_v50 = vmul.f32 %v1772_v16, %v971_v13 }
 0x22d   :  { %v1776_v37 = vpop.eup %1775  ;;  %1797 = vrcp.f32 %v1120_v17  ;;  %v1123_v18 = vadd.f32 1.0, %v1774_v32 }
 0x22e   :  { %v1778_v2 = vpop.eup %1777  ;;  %1260 = vst.msk [vmem:[%s2423_s3 + $0xb8] sm:$0xff] %vm1236_vm5, %v1223_v50  ;;  %v1222_v38 = vmul.f32 %v1776_v37, %v970_v33 }
 0x22f   :  { %v1780_v62 = vpop.eup %1779  ;;  %1799 = vrcp.f32 %v1123_v18  ;;  %v1122_v19 = vadd.f32 1.0, %v1778_v2 }
 0x230   :  { %v1782_v41 = vpop.eup %1781  ;;  %1259 = vst.msk [vmem:[%s2423_s3 + $0xb0] sm:$0xff] %vm1236_vm5, %v1222_v38  ;;  %v1125_v42 = vadd.f32 1.0, %v1780_v62 }
 0x231   :  { %v1784_v43 = vpop.eup %1783  ;;  %v1225_v58 = vmul.f32 %v1782_v41, %v973_v39  ;;  %1801 = vrcp.f32 %v1122_v19 }
 0x232   :  { %v1786_v44 = vpop.eup %1785  ;;  %1803 = vrcp.f32 %v1125_v42  ;;  %v1124_v46 = vadd.f32 1.0, %v1784_v43 }
 0x233   :  { %v1788_v36 = vpop.eup %1787  ;;  %1262 = vst.msk [vmem:[%s2423_s3 + $0xc8] sm:$0xff] %vm1236_vm5, %v1225_v58  ;;  %v1224_v48 = vmul.f32 %v1786_v44, %v972_v4 }
 0x234   :  { %v1790_v49 = vpop.eup %1789  ;;  %1805 = vrcp.f32 %v1124_v46  ;;  %v1127_v7 = vadd.f32 1.0, %v1788_v36 }
 0x235   :  { %v1792_v51 = vpop.eup %1791  ;;  %1261 = vst.msk [vmem:[%s2423_s3 + $0xc0] sm:$0xff] %vm1236_vm5, %v1224_v48  ;;  %v1227_v52 = vmul.f32 %v1790_v49, %v975_v20 }
 0x236   :  { %v1794_v53 = vpop.eup %1793  ;;  %1807 = vrcp.f32 %v1127_v7  ;;  %v1126_v22 = vadd.f32 1.0, %v1792_v51 }
 0x237   :  { %1264 = vst.msk [vmem:[%s2423_s3 + $0xd8] sm:$0xff] %vm1236_vm5, %v1227_v52  ;;  %v1226_v5 = vmul.f32 %v1794_v53, %v974_v21 }
 0x238   :  { %v1796_v54 = vpop.eup %1795  ;;  %1809 = vrcp.f32 %v1126_v22 }
 0x239   :  { %1263 = vst.msk [vmem:[%s2423_s3 + $0xd0] sm:$0xff] %vm1236_vm5, %v1226_v5  ;;  %v1229_v55 = vmul.f32 %v1796_v54, %v977_v8 }
 0x23a   :  { %v1798_v56 = vpop.eup %1797 }
 0x23b   :  { %1266 = vst.msk [vmem:[%s2423_s3 + $0xe8] sm:$0xff] %vm1236_vm5, %v1229_v55  ;;  %v1228_v24 = vmul.f32 %v1798_v56, %v976_v23 }
 0x23c   :  { %v1800_v59 = vpop.eup %1799 }
 0x23d   :  { %1265 = vst.msk [vmem:[%s2423_s3 + $0xe0] sm:$0xff] %vm1236_vm5, %v1228_v24  ;;  %v1231_v25 = vmul.f32 %v1800_v59, %v979_v57 }
 0x23e   :  { %v1802_v60 = vpop.eup %1801 }
 0x23f   :  { %v1804_v35 = vpop.eup %1803  ;;  %1268 = vst.msk [vmem:[%s2423_s3 + $0xf8] sm:$0xff] %vm1236_vm5, %v1231_v25  ;;  %v1230_v26 = vmul.f32 %v1802_v60, %v978_v11 }
 0x240   :  { %v1233_v63 = vmul.f32 %v1804_v35, %v981_v34 }
 0x241   :  { %v1806_v27 = vpop.eup %1805  ;;  %1267 = vst.msk [vmem:[%s2423_s3 + $0xf0] sm:$0xff] %vm1236_vm5, %v1230_v26 }
 0x242   :  { %1270 = vst.msk [vmem:[%s2423_s3 + $0x108] sm:$0xff] %vm1236_vm5, %v1233_v63  ;;  %v1232_v28 = vmul.f32 %v1806_v27, %v980_v61 }
 0x243   :  { %v1808_v12 = vpop.eup %1807 }
 0x244   :  { %1269 = vst.msk [vmem:[%s2423_s3 + $0x100] sm:$0xff] %vm1236_vm5, %v1232_v28  ;;  %v1235_v29 = vmul.f32 %v1808_v12, %v983_v40 }
 0x245   :  { %v1810_v1 = vpop.eup %1809 }
 0x246   :  { %1272 = vst.msk [vmem:[%s2423_s3 + $0x118] sm:$0xff] %vm1236_vm5, %v1235_v29  ;;  %v1234_v30 = vmul.f32 %v1810_v1, %v982_v0 }
 0x248   :  { %1271 = vst.msk [vmem:[%s2423_s3 + $0x110] sm:$0xff] %vm1236_vm5, %v1234_v30 }

// kernel: _lambda_.5
= control target key start
LH: loop header
LB: loop body
LE: loop exit
PB: predicated region body
PF: predicated region fallthrough
CT: control target
= control target key end

     0   :  { %v159_v1 = vlaneseq  ;;  %v817_v2 = vmov 0   ;;  %v818_v4 = vmov 0.0   ;;  %v819_v10 = vmov 1.0   ;;  %s1030_s0 = inlined_call_operand.vmem [shape: f32[2,144], index: 0, kind: input, shape index: {}]   ;;  %s1031_s1 = inlined_call_operand.vmem [shape: bf16[144,64], index: 1, kind: input, shape index: {}]   ;;  %s1032_s2 = inlined_call_operand.vmem [shape: f32[1,64], index: 2, kind: input, shape index: {}]   ;;  %s1033_s3 = inlined_call_operand.vmem [shape: bf16[32,20], index: 3, kind: input, shape index: {}]   ;;  %s1034_s4 = inlined_call_operand.vmem [shape: f32[1,20], index: 4, kind: input, shape index: {}]   ;;  %s1035_s5 = inlined_call_operand.hbm [shape: f32[2,10], index: 5, kind: output, shape index: {}]  }
   0x1   :  { %v776_v0 = vld [vmem:[%s1031_s1 + $0x38] sm:$0xff]   ;;  %119 = vmatprep.subr.bf16.mxu0 %v817_v2  ;;  %v777_v3 = vld [vmem:[%s1031_s1 + $0x30] sm:$0xff]   ;;  %707 = vmatprep.subr.mxu1 %v818_v4  ;;  %v778_v8 = vld [vmem:[%s1031_s1 + $0x28] sm:$0xff]   ;;  %vm115_vm3 = vcmask 130048  }
   0x2   :  { %120 = vmatpush1.bf16.msra.mxu0 %v776_v0  ;;  %v861_v5 = vshrl.u32 %v159_v1, 7  ;;  %v863_v6 = vand.u32 127, %v159_v1  ;;  %v625_v12 = vld.sshfl [vmem:[%s1030_s0] sm:$0x33 pattern:$0x76325410] }
   0x3   :  { %121 = vmatprep.subr.bf16.mxu0 %v817_v2  ;;  %v779_v14 = vld [vmem:[%s1031_s1 + $0x20] sm:$0xff]   ;;  %v31_v15 = vcombine.high %v625_v12, %v625_v12 }
   0x4   :  { %v866_v7 = vadd.s32 56, %v861_v5  ;;  %v875_v9 = vadd.s32 48, %v861_v5  ;;  %v879_v11 = vadd.s32 40, %v861_v5  ;;  %v888_v13 = vadd.s32 32, %v861_v5 }
   0x5   :  { %v163_v16 = vadd.s32 24, %v861_v5  ;;  %v35_v17 = vpack.c.bf16 %v31_v15, %v31_v15  ;;  %v903_v18 = vadd.s32 16, %v861_v5 }
   0x6   :  { %122 = vmatpush1.bf16.msra.mxu0 %v777_v3  ;;  %vm177_vm0 = vcmp.eq.s32.totalorder %v866_v7, %v863_v6  ;;  %vm176_vm1 = vcmp.eq.s32.totalorder %v875_v9, %v863_v6  ;;  %vm175_vm2 = vcmp.eq.s32.totalorder %v879_v11, %v863_v6  ;;  %vm174_vm4 = vcmp.eq.s32.totalorder %v888_v13, %v863_v6 }
   0x7   :  { %123 = vmatprep.subr.bf16.mxu0 %v817_v2  ;;  %708 = vmatpush3.msk.msra.mxu1 %vm177_vm0, %v819_v10 }
   0x8   :  { %709 = vmatprep.subr.mxu1 %v818_v4 }
   0x9   :  { %710 = vmatpush3.msk.msra.mxu1 %vm176_vm1, %v819_v10 }
   0xa   :  { %124 = vmatpush1.bf16.msra.mxu0 %v778_v8  ;;  %711 = vmatprep.subr.mxu1 %v818_v4 }
   0xb   :  { %125 = vmatprep.subr.bf16.mxu0 %v817_v2  ;;  %712 = vmatpush3.msk.msra.mxu1 %vm175_vm2, %v819_v10 }
   0xc   :  { %10 = vsyncpa [#allocation3], 0  ;;  %713 = vmatprep.subr.mxu1 %v818_v4  ;;  %v780_v19 = vld [vmem:[%s1031_s1 + $0x18] sm:$0xff]   ;;  %636 = vmatprep.mubr.msk.bf16.mxu0 %vm115_vm3, %v35_v17  ;;  %vm173_vm5 = vcmp.eq.s32.totalorder %v163_v16, %v863_v6  ;;  %v911_v20 = vadd.s32 8, %v861_v5  ;;  %vm172_vm6 = vcmp.eq.s32.totalorder %v903_v18, %v863_v6  ;;  %v781_v21 = vld [vmem:[%s1031_s1 + $0x10] sm:$0xff]   ;;  %v34_v25 = vpack.c.bf16 %v625_v12, %v625_v12  ;;  %s821_s17 = smov [#allocation2]  }
   0xd   :  { %714 = vmatpush3.msk.msra.mxu1 %vm174_vm4, %v819_v10  ;;  %v782_v22 = vld [vmem:[%s1031_s1 + $0x8] sm:$0xff]   ;;  %v783_v23 = vld [vmem:[%s1031_s1] sm:$0xff]   ;;  %vm170_vm8 = vcmp.eq.s32.totalorder %v861_v5, %v863_v6  ;;  %vm820_vm9 = vmmov 0   ;;  %v194_v26 = vadd.s32 32, %v863_v6  ;;  %vm219_vm10 = vcmask 523264   ;;  %s617_s18 = sshll.u32 %s821_s17, 4  ;;  %s618_s18 = int_to_ptr.vmem [resolvable:$true] %s617_s18 }
   0xe   :  { %126 = vmatpush1.bf16.msra.mxu0 %v779_v14  ;;  %715 = vmatprep.subr.mxu1 %v818_v4  ;;  %vm171_vm7 = vcmp.eq.s32.totalorder %v911_v20, %v863_v6  ;;  %v784_v24 = vld [vmem:[%s1031_s1 + $0x40] sm:$0xff]   ;;  %v785_v33 = vld [vmem:[%s1033_s3 + $0x8] sm:$0xff]   ;;  %v639_v35 = vsel %vm172_vm6, 1.0, %v818_v4  ;;  %vm454_vm15 = vcmask 1043456   ;;  %v440_v43 = vadd.s32 10, %v863_v6  ;;  %p800_p1 = scmp.lt.s32.totalorder %s618_s18, %s618_s18 }
   0xf   :  { %127 = vmatprep.subr.bf16.mxu0 %v817_v2  ;;  %716 = vmatpush3.msk.msra.mxu1 %vm173_vm5, %v819_v10  ;;  %v626_v27 = vld [vmem:[%s1032_s2] ss:$0 sm:$0xff]  ;;  %vm202_vm11 = vcmp.eq.s32.totalorder %v866_v7, %v194_v26  ;;  %vm201_vm12 = vcmp.eq.s32.totalorder %v875_v9, %v194_v26  ;;  %vm200_vm13 = vcmp.eq.s32.totalorder %v879_v11, %v194_v26  ;;  %vm396_vm1 = vcmask 261120  }
  0x10   :  { %717 = vmatprep.subr.mxu1 %v818_v4  ;;  %723 = vmatprep.mubr.msk.f32.mxu1 %vm820_vm9, %v818_v4  ;;  %vm199_vm14 = vcmp.eq.s32.totalorder %v888_v13, %v194_v26  ;;  %v786_v34 = vld [vmem:[%s1033_s3] sm:$0xff]   ;;  %vm443_vm0 = vcmp.eq.s32.totalorder %v903_v18, %v440_v43  ;;  %vm442_vm2 = vcmp.eq.s32.totalorder %v911_v20, %v440_v43  ;;  %vm450_vm3 = vcmask 162816  }
  0x11   :  { %718 = vmatpush3.msk.msra.mxu1 %vm172_vm6, %v819_v10  ;;  %v669_v49 = vsel %vm443_vm0, 1.0, %v818_v4  ;;  %v664_v50 = vld [vmem:[%s1034_s4] ss:$0 sm:$0xff]  ;;  %vm609_vm4 = vcmask 74752   ;;  %s795_s4 = scalar_lea.vmem %s618_s18, 32 }
  0x12   :  { %128 = vmatpush1.bf16.msra.mxu0 %v780_v19  ;;  %719 = vmatprep.subr.mxu1 %v818_v4  ;;  %p796_p0 = scmp.ne.s32.totalorder %s618_s18, %s795_s4  ;;  %p801_p2 = scmp.lt.s32.totalorder %s795_s4, %s795_s4 }
  0x13   :  { %129 = vmatprep.subr.bf16.mxu0 %v817_v2  ;;  %720 = vmatpush3.msk.msra.mxu1 %vm171_vm7, %v819_v10 }
  0x14   :  { %721 = vmatprep.subr.mxu1 %v818_v4  ;;  %p802_p3 = por %p801_p2, %p800_p1 }
  0x15   :  { %722 = vmatpush3.msk.msra.mxu1 %vm170_vm8, %v819_v10 }
  0x16   :  { %130 = vmatpush1.bf16.msra.mxu0 %v781_v21  ;;  %726 = vmatprep.subr.mxu1 %v818_v4  ;;  %p803_p4 = pnand %p802_p3, %p796_p0 }
  0x17   :  { %131 = vmatprep.subr.bf16.mxu0 %v817_v2 }
  0x1a   :  { %132 = vmatpush1.bf16.msra.mxu0 %v782_v22 }
  0x1b   :  { %133 = vmatprep.subr.bf16.mxu0 %v817_v2 }
  0x1e   :  { %134 = vmatpush1.bf16.msra.mxu0 %v783_v23 }
  0x1f   :  { %149 = vmatprep.subr.bf16.mxu0 %v817_v2 }
  0x22   :  { %150 = vmatpush2.bf16.msra.mxu0 %v784_v24 }
  0x23   :  { %753 = vmatprep.subr.mxu0 %v818_v4 }
  0x25   :  { %152 = vmatmul.mubr.bf16.vlgmr.msra.gmra.mxu0 %v34_v25 }
  0x26   :  { %759 = vmatprep.mubr.msk.f32.mxu0 %vm820_vm9, %v818_v4  ;;  %754 = vmatpush3.msk.msra.mxu0 %vm454_vm15, %v639_v35 }
  0x27   :  { %755 = vmatprep.subr.mxu0 %v818_v4 }
  0x28   :  { %756 = vmatpush3.msk.msra.mxu0 %vm171_vm7, %v819_v10 }
  0x29   :  { %757 = vmatprep.subr.mxu0 %v818_v4 }
  0x2a   :  { %758 = vmatpush3.msk.msra.mxu0 %vm170_vm8, %v819_v10 }
  0xe5   :  { %v153_v28 = vpop.f32.mrf.mxu0 }
  0xe6   :  { %v154_v29 = vadd.f32 %v626_v27, %v153_v28 }
  0xe7   :  { %v155_v30 = vpop.f32.mrf.mxu0 }
  0xe8   :  { %724 = vmatmul.mubr.msk.f32.vlgmr.msra.gmra.mxu1 %vm219_vm10, %v154_v29 }
  0xe9   :  { %727 = vmatpush3.msk.msra.mxu1 %vm202_vm11, %v819_v10  ;;  %v156_v31 = vpop.f32.mrf.mxu0  ;;  %742 = vmatprep.mubr.msk.f32.mxu1 %vm820_vm9, %v818_v4 }
  0xea   :  { %728 = vmatprep.subr.mxu1 %v818_v4 }
  0xeb   :  { %729 = vmatpush3.msk.msra.mxu1 %vm201_vm12, %v819_v10  ;;  %v157_v32 = vpop.f32.mrf.mxu0 }
  0xec   :  { %730 = vmatprep.subr.mxu1 %v818_v4 }
  0xed   :  { %731 = vmatpush3.msk.msra.mxu1 %vm200_vm13, %v819_v10 }
  0xee   :  { %732 = vmatprep.subr.mxu1 %v818_v4 }
  0xef   :  { %733 = vmatpush3.msk.msra.mxu1 %vm199_vm14, %v819_v10 }
  0xf0   :  { %734 = vmatprep.subr.mxu1 %v818_v4 }
  0xf1   :  { %735 = vmatpush3.msra.mxu1 %v818_v4 }
  0xf2   :  { %736 = vmatprep.subr.mxu1 %v818_v4 }
  0xf3   :  { %737 = vmatpush3.msra.mxu1 %v818_v4 }
  0xf4   :  { %738 = vmatprep.subr.mxu1 %v818_v4 }
  0xf5   :  { %739 = vmatpush3.msra.mxu1 %v818_v4 }
  0xf6   :  { %740 = vmatprep.subr.mxu1 %v818_v4 }
  0xf7   :  { %741 = vmatpush3.msra.mxu1 %v818_v4 }
  0xf8   :  { %743 = vmatmul.mubr.msk.f32.vlgmr.msra.gmra.mxu1 %vm219_vm10, %v154_v29  ;;  %745 = vmatprep.subr.bf16.mxu1 %v818_v4 }
  0xf9   :  { %749 = vmatprep.mubr.msk.bf16.mxu1 %vm820_vm9, %v818_v4  ;;  %746 = vmatpush3.bf16.msra.mxu1 %v785_v33 }
  0xfa   :  { %747 = vmatprep.subr.bf16.mxu1 %v818_v4 }
  0xfd   :  { %748 = vmatpush3.bf16.msra.mxu1 %v786_v34 }
  0xfe   :  { %762 = vmatprep.subr.mxu1 %v818_v4 }
 0x1a8   :  { %v289_v36 = vpop.f32.mrf.mxu1 }
 0x1a9   :  { %v363_v44 = vmax.f32 %v289_v36, 0.0 }
 0x1aa   :  { %v725_v37 = vpop.f32.mrf.mxu1 }
 0x1b8   :  { %v359_v38 = vpop.f32.mrf.mxu1 }
 0x1b9   :  { %v663_v39 = vmul.f32 -1.442695, %v359_v38 }
 0x1ba   :  { %v744_v40 = vpop.f32.mrf.mxu1 }
 0x1bb   :  { %787 = vpow2.f32 %v663_v39 }
 0x1c8   :  { %v788_v41 = vpop.eup %787 }
 0x1c9   :  { %v367_v42 = vadd.f32 1.0, %v788_v41 }
 0x1cb   :  { %789 = vrcp.f32 %v367_v42 }
 0x1d8   :  { %v790_v45 = vpop.eup %789 }
 0x1d9   :  { %v370_v46 = vmul.f32 %v790_v45, %v363_v44 }
 0x1db   :  { %v371_v47 = vmax.f32 %v370_v46, 0.0 }
 0x1dd   :  { %v372_v48 = vpack.c.bf16 %v371_v47, %v371_v47 }
 0x1df   :  { %750 = vmatmul.mubr.msk.bf16.vlgmr.msra.gmra.mxu1 %vm396_vm1, %v372_v48 }
 0x1e0   :  { %763 = vmatpush3.msk.msra.mxu1 %vm454_vm15, %v669_v49  ;;  %768 = vmatprep.mubr.msk.f32.mxu1 %vm820_vm9, %v818_v4 }
 0x1e1   :  { %764 = vmatprep.subr.mxu1 %v818_v4 }
 0x1e2   :  { %765 = vmatpush3.msk.msra.mxu1 %vm442_vm2, %v819_v10 }
 0x1e3   :  { %766 = vmatprep.subr.mxu1 %v818_v4 }
 0x1e4   :  { %767 = vmatpush3.msra.mxu1 %v818_v4 }
 0x29f   :  { %v434_v51 = vpop.f32.mrf.mxu1 }
 0x2a0   :  { %v435_v52 = vadd.f32 %v664_v50, %v434_v51 }
 0x2a1   :  { %v751_v53 = vpop.f32.mrf.mxu1 }
 0x2a2   :  { %760 = vmatmul.mubr.msk.f32.vlgmr.msra.gmra.mxu0 %vm450_vm3, %v435_v52  ;;  %769 = vmatmul.mubr.msk.f32.vlgmr.msra.gmra.mxu1 %vm450_vm3, %v435_v52 }
 0x2a3   :  { %v437_v54 = vpop.f32.mrf.mxu1 }
 0x2a5   :  { %v752_v55 = vpop.f32.mrf.mxu1 }
 0x362   :  { %v524_v56 = vpop.f32.mrf.mxu0  ;;  %v597_v57 = vpop.f32.mrf.mxu1 }
 0x363   :  { %v677_v58 = vmul.f32 -1.442695, %v597_v57  ;;  %v601_v63 = vmax.f32 %v524_v56, 0.0 }
 0x364   :  { %v761_v59 = vpop.f32.mrf.mxu0  ;;  %v770_v60 = vpop.f32.mrf.mxu1 }
 0x365   :  { %791 = vpow2.f32 %v677_v58 }
 0x372   :  { %v792_v61 = vpop.eup %791 }
 0x373   :  { %v605_v62 = vadd.f32 1.0, %v792_v61 }
 0x375   :  { %793 = vrcp.f32 %v605_v62 }
 0x382   :  { %v794_v0 = vpop.eup %793 }
 0x383   :  { %v608_v1 = vmul.f32 %v794_v0, %v601_v63 }
 0x385   :  { %610 = vst.msk [vmem:[#allocation2] sm:$0x3] %vm609_vm4, %v608_v1 }
 0x386   :  { %806 = shalt.err (!%p803_p4)
}
 0x387   :  { %620 = dma.vmem_to_hbm [thread:$0]  %s618_s18, 32, %s1035_s5, [#allocation3]  }
 0x388   :  { %815 = dma.done.wait [#allocation3], 32  }
 0x389   :  { %816 = vsyncadd [#allocation3], 4294967264 }
 0x38a   :  { %624 = vsyncpa [#allocation3], 1 }

</bundles_post_ra>
